<compile_context>
chip_gen: v7x
topology: tpu7x:2x2x1
jax: 0.10.0
libtpu: 0.0.40
codegen_flags: <defaults>
</compile_context>

<pallas_src>
import functools
import math

import jax
import jax.numpy as jnp
from jax.experimental import pallas as pl
from jax.experimental.pallas import tpu as pltpu


# ----------------------------------------------------------------------------
# helpers
# ----------------------------------------------------------------------------
def _apply_act(y, act):
    if act == "relu":
        return jnp.maximum(y, 0.0)
    if act == "sigmoid":
        return jax.nn.sigmoid(y)
    return y


def _nbytes(shape, dtype):
    return int(math.prod(shape)) * jnp.dtype(dtype).itemsize


def _compiler_params(sems, block_bytes):
    # Explicit scoped-VMEM budget: ~double-buffered blocks + headroom, clamped
    # to what every TPU generation can provide (v7x has 64 MiB per TC).
    lim = int(min(max(32 << 20, 3 * block_bytes + (8 << 20)), 64 << 20))
    return pltpu.CompilerParams(dimension_semantics=sems, vmem_limit_bytes=lim)


def _pick_tile_rows(H, W, max_rows):
    """Largest divisor of H <= max_rows keeping (rows*W) 8-aligned."""
    cands = [th for th in range(1, H + 1)
             if H % th == 0 and th <= max_rows and (th * W) % 8 == 0]
    return max(cands) if cands else H


# ----------------------------------------------------------------------------
# Pallas kernels
# ----------------------------------------------------------------------------
def _conv1_hup1_gap_kernel(cols_ref, w_ref, b_ref, feat_ref, h1_ref, gp_ref):
    """Fused: conv1 (sepconv folded to one 3x3) + HUP1 head + GAP partial sums.

    cols: (1, TH*W, 27) bf16  wrapper-built im2col of the 3-channel input
    w   : (27, 64+12)  bf16   [folded conv1 | hup1] weights
    b   : (1, 64+12)   f32
    feat: (1, TH, W, 64) bf16
    h1  : (1, TH, W, 12) f32
    gp  : (1, 1, 8, 64)  f32  per-row-tile channel sums (row 0 is the value)
    """
    TH, W, Cf = feat_ref.shape[1], feat_ref.shape[2], feat_ref.shape[3]
    Ch = h1_ref.shape[3]
    acc = jnp.dot(cols_ref[0], w_ref[...], preferred_element_type=jnp.float32)
    acc = acc + b_ref[0:1, :]
    feat = acc[:, :Cf]
    gp_ref[0, 0] = jnp.broadcast_to(jnp.sum(feat, axis=0, keepdims=True), (8, Cf))
    feat_ref[0] = feat.reshape(TH, W, Cf).astype(feat_ref.dtype)
    h1_ref[0] = acc[:, Cf:Cf + Ch].reshape(TH, W, Ch).astype(h1_ref.dtype)


def _cgm_kernel(gap_ref, w1_ref, b1_ref, w2_ref, b2_ref, g_ref):
    """Both CGM fully-connected layers in one kernel: sigmoid(relu(x@w1+b1)@w2+b2)."""
    h = jnp.dot(gap_ref[...], w1_ref[...], preferred_element_type=jnp.float32)
    h = jnp.maximum(h + b1_ref[0:1, :], 0.0)
    g = jnp.dot(h, w2_ref[...], preferred_element_type=jnp.float32)
    g_ref[...] = jax.nn.sigmoid(g + b2_ref[0:1, :]).astype(g_ref.dtype)


def _conv3x3_kernel(xm_ref, xh_ref, w_ref, b_ref, *out_refs, splits, acts):
    """Stride-1 3x3 conv on a halo'd row tile; multi-head outputs share one
    accumulated MXU chain (9 small dots -- no 9x im2col slab).

    xm: (1, TH, W+2, C) bf16   rows [r*TH, r*TH+TH) of the padded input
    xh: (1, 1, 2, W+2, C) bf16 rows [r*TH+TH, r*TH+TH+2)  (halo)
    w : (9*C, sum(splits)) bf16 (tap-major, cin-minor rows)
    b : (1, sum(splits)) f32
    """
    TH, Wp, C = xm_ref.shape[1], xm_ref.shape[2], xm_ref.shape[3]
    W = out_refs[0].shape[2]
    Ct = w_ref.shape[-1]
    x = jnp.concatenate([xm_ref[0], xh_ref[0, 0]], axis=0)        # (TH+2, Wp, C)
    acc = jnp.zeros((TH * W, Ct), jnp.float32)
    for k in range(9):
        dy, dx = k // 3, k % 3
        t = x[dy:dy + TH, dx:dx + W, :].reshape(TH * W, C)
        acc = acc + jnp.dot(t, w_ref[k * C:(k + 1) * C, :],
                            preferred_element_type=jnp.float32)
    acc = acc + b_ref[0:1, :]
    off = 0
    for o_ref, co, act in zip(out_refs, splits, acts):
        y = _apply_act(acc[:, off:off + co], act)
        o_ref[0] = y.reshape(TH, W, co).astype(o_ref.dtype)
        off += co


def _conv3x3_s2_kernel(xm_ref, xh_ref, w_ref, b_ref, o_ref, *, act):
    """Stride-2 3x3 conv; the stride is handled by an in-VMEM polyphase split
    of the row tile (replaces the old wrapper-side HBM polyphase round trip).
    The CGM gate is pre-folded into the per-batch weights (conv is linear).

    xm: (1, 2*THo, W+2, C) bf16  padded rows [2*r*THo, 2*(r+1)*THo)
    xh: (1, 1, 1, W+2, C)  bf16  padded row 2*(r+1)*THo               (halo)
    w : (1, 9*C, Cout) bf16      per-batch, gate folded in
    b : (1, Cout) f32
    o : (1, THo, Wo, Cout)
    """
    THo, Wo, Cout = o_ref.shape[1], o_ref.shape[2], o_ref.shape[3]
    C = xm_ref.shape[3]
    xm = xm_ref[0]                                     # (2*THo, Wp, C)
    xh = xh_ref[0, 0]                                  # (1, Wp, C)
    xr = xm.reshape(THo, 2, xm.shape[1], C)
    x_even = jnp.concatenate([xr[:, 0], xh], axis=0)   # rows 0,2,...,2*THo
    x_odd = xr[:, 1]                                   # rows 1,3,...,2*THo-1

    def col_phases(a):
        b2 = a.reshape(a.shape[0], Wo + 1, 2, C)
        return b2[:, :, 0, :], b2[:, :, 1, :]

    phases = (col_phases(x_even), col_phases(x_odd))   # [row parity][col parity]

    acc = jnp.zeros((THo * Wo, Cout), jnp.float32)
    for k in range(9):
        dy, dx = k // 3, k % 3
        src = phases[dy % 2][dx % 2]
        t = src[dy // 2:dy // 2 + THo, dx // 2:dx // 2 + Wo, :].reshape(THo * Wo, C)
        acc = acc + jnp.dot(t, w_ref[0, k * C:(k + 1) * C, :],
                            preferred_element_type=jnp.float32)
    acc = _apply_act(acc + b_ref[0:1, :], act)
    o_ref[0] = acc.reshape(THo, Wo, Cout).astype(o_ref.dtype)


# ----------------------------------------------------------------------------
# Pallas wrappers
# ----------------------------------------------------------------------------
def conv1_hup1_gap(cols, w_cat, b_cat, N, H, W, Cf, Ch, max_tile_rows):
    TH = _pick_tile_rows(H, W, max_tile_rows)
    R = H // TH
    K = cols.shape[-1]
    blk = (_nbytes((TH * W, K), jnp.bfloat16)
           + _nbytes((TH, W, Cf), jnp.bfloat16)
           + _nbytes((TH, W, Ch), jnp.float32)
           + _nbytes((K, Cf + Ch), jnp.bfloat16)
           + _nbytes((TH * W, Cf + Ch), jnp.float32))
    return pl.pallas_call(
        _conv1_hup1_gap_kernel,
        grid=(N, R),
        in_specs=[pl.BlockSpec((1, TH * W, K), lambda n, r: (n, r, 0)),
                  pl.BlockSpec((K, Cf + Ch), lambda n, r: (0, 0)),
                  pl.BlockSpec((1, Cf + Ch), lambda n, r: (0, 0))],
        out_specs=(pl.BlockSpec((1, TH, W, Cf), lambda n, r: (n, r, 0, 0)),
                   pl.BlockSpec((1, TH, W, Ch), lambda n, r: (n, r, 0, 0)),
                   pl.BlockSpec((1, 1, 8, Cf), lambda n, r: (n, r, 0, 0))),
        out_shape=(jax.ShapeDtypeStruct((N, H, W, Cf), jnp.bfloat16),
                   jax.ShapeDtypeStruct((N, H, W, Ch), jnp.float32),
                   jax.ShapeDtypeStruct((N, R, 8, Cf), jnp.float32)),
        compiler_params=_compiler_params(("parallel", "parallel"), blk),
    )(cols, w_cat, b_cat)


def conv3x3_tiled(xp, weights, biases, out_dtypes, acts, max_tile_rows):
    """Multi-head stride-1 3x3 conv over a pre-padded NHWC input (halo row tiles)."""
    N, Hp, Wp, C = xp.shape
    H, W = Hp - 2, Wp - 2
    TH = _pick_tile_rows(H, W, max_tile_rows)
    R = H // TH
    # tiny halo side-array (2 rows per tile) so only Blocked BlockSpecs are needed
    halo = jnp.stack([xp[:, (r + 1) * TH:(r + 1) * TH + 2] for r in range(R)], axis=1)
    splits = tuple(int(w.shape[-1]) for w in weights)
    Ct = sum(splits)
    w_cat = jnp.concatenate([w.reshape(9 * C, w.shape[-1]) for w in weights],
                            axis=-1).astype(jnp.bfloat16)
    b_cat = jnp.concatenate([jnp.asarray(b) for b in biases]
                            ).reshape(1, Ct).astype(jnp.float32)
    blk = (_nbytes((TH, Wp, C), xp.dtype) + _nbytes((2, Wp, C), xp.dtype)
           + _nbytes((9 * C, Ct), jnp.bfloat16)
           + sum(_nbytes((TH, W, co), dt) for co, dt in zip(splits, out_dtypes))
           + _nbytes((TH * W, Ct), jnp.float32))
    kern = functools.partial(_conv3x3_kernel, splits=splits, acts=tuple(acts))
    outs = pl.pallas_call(
        kern, grid=(N, R),
        in_specs=[pl.BlockSpec((1, TH, Wp, C), lambda n, r: (n, r, 0, 0)),
                  pl.BlockSpec((1, 1, 2, Wp, C), lambda n, r: (n, r, 0, 0, 0)),
                  pl.BlockSpec((9 * C, Ct), lambda n, r: (0, 0)),
                  pl.BlockSpec((1, Ct), lambda n, r: (0, 0))],
        out_specs=tuple(pl.BlockSpec((1, TH, W, co), lambda n, r: (n, r, 0, 0))
                        for co in splits),
        out_shape=tuple(jax.ShapeDtypeStruct((N, H, W, co), dt)
                        for co, dt in zip(splits, out_dtypes)),
        compiler_params=_compiler_params(("parallel", "parallel"), blk),
    )(xp, halo, w_cat, b_cat)
    return list(outs)


def conv3x3_s2(xp, w_per_batch, b, act, out_dtype, max_tile_rows):
    """Stride-2 3x3 conv on a pre-padded NHWC input with per-batch weights."""
    N, Hp, Wp, C = xp.shape
    Ho, Wo = (Hp - 2) // 2, (Wp - 2) // 2
    Cout = w_per_batch.shape[-1]
    THo = _pick_tile_rows(Ho, Wo, max(1, max_tile_rows // 2))
    Ro = Ho // THo
    halo = jnp.stack([xp[:, 2 * (r + 1) * THo:2 * (r + 1) * THo + 1]
                      for r in range(Ro)], axis=1)
    blk = (3 * _nbytes((2 * THo, Wp, C), xp.dtype)
           + _nbytes((9 * C, Cout), jnp.bfloat16)
           + _nbytes((THo, Wo, Cout), out_dtype)
           + _nbytes((THo * Wo, Cout), jnp.float32))
    kern = functools.partial(_conv3x3_s2_kernel, act=act)
    return pl.pallas_call(
        kern, grid=(N, Ro),
        in_specs=[pl.BlockSpec((1, 2 * THo, Wp, C), lambda n, r: (n, r, 0, 0)),
                  pl.BlockSpec((1, 1, 1, Wp, C), lambda n, r: (n, r, 0, 0, 0)),
                  pl.BlockSpec((1, 9 * C, Cout), lambda n, r: (n, 0, 0)),
                  pl.BlockSpec((1, Cout), lambda n, r: (0, 0))],
        out_specs=pl.BlockSpec((1, THo, Wo, Cout), lambda n, r: (n, r, 0, 0)),
        out_shape=jax.ShapeDtypeStruct((N, Ho, Wo, Cout), out_dtype),
        compiler_params=_compiler_params(("parallel", "parallel"), blk),
    )(xp, halo, w_per_batch, b)


def cgm_gate(gap, p):
    N, C = gap.shape
    r = p["fc1_w"].shape[-1]
    blk = 2 * _nbytes((N, C), jnp.float32) + _nbytes((C, r), jnp.float32) \
        + _nbytes((r, C), jnp.float32)
    return pl.pallas_call(
        _cgm_kernel, grid=(1,),
        in_specs=[pl.BlockSpec((N, C), lambda i: (0, 0)),
                  pl.BlockSpec((C, r), lambda i: (0, 0)),
                  pl.BlockSpec((1, r), lambda i: (0, 0)),
                  pl.BlockSpec((r, C), lambda i: (0, 0)),
                  pl.BlockSpec((1, C), lambda i: (0, 0))],
        out_specs=pl.BlockSpec((N, C), lambda i: (0, 0)),
        out_shape=jax.ShapeDtypeStruct((N, C), jnp.float32),
        compiler_params=_compiler_params(("arbitrary",), blk),
    )(gap.astype(jnp.float32), p["fc1_w"].astype(jnp.float32),
      p["fc1_b"].reshape(1, r).astype(jnp.float32),
      p["fc2_w"].astype(jnp.float32), p["fc2_b"].reshape(1, C).astype(jnp.float32))


# ----------------------------------------------------------------------------
# Module-level composition (glue in plain JAX is tiny scalars / final shuffle)
# ----------------------------------------------------------------------------
def pixel_shuffle_nhwc(x, r):
    # matches torch.nn.PixelShuffle semantics, expressed in NHWC
    N, H, W, C = x.shape
    c = C // (r * r)
    x = x.reshape(N, H, W, c, r, r)
    x = jnp.transpose(x, (0, 1, 4, 2, 5, 3))
    return x.reshape(N, H * r, W * r, c)


def _fold_sepconv(dw_w, dw_b, pw_w, pw_b):
    # exact fold: pointwise(depthwise(x)+db)+pb == full3x3(x) + (db@pw + pb)
    w = dw_w[:, :, :, None] * pw_w[None, None, :, :]          # (3,3,Cin,Cout)
    b = dw_b @ pw_w + pw_b
    return w, b


def _pfin_forward_impl(x_nchw, params, upscale_factor, max_tile_rows):
    x = jnp.transpose(x_nchw, (0, 2, 3, 1)).astype(jnp.float32)   # NCHW -> NHWC
    N, H, W, Cin = x.shape
    base = params["conv1"]["pw_w"].shape[-1]
    uf1 = upscale_factor
    uf0 = 2 * upscale_factor

    # conv1 (folded sepconv) + HUP1 + GAP in one kernel.  Cin=3 -> build the
    # (H*W, 27) im2col in the wrapper (tiny; lane-efficient K=27 MXU operand).
    xp = jnp.pad(x, ((0, 0), (1, 1), (1, 1), (0, 0)))
    cols = jnp.concatenate(
        [xp[:, dy:dy + H, dx:dx + W, :] for dy in range(3) for dx in range(3)],
        axis=-1).reshape(N, H * W, 9 * Cin).astype(jnp.bfloat16)
    p1 = params["conv1"]
    w1, b1 = _fold_sepconv(p1["dw_w"], p1["dw_b"], p1["pw_w"], p1["pw_b"])
    wh1, bh1 = params["hup1"]["w"], params["hup1"]["b"]
    Ch1 = wh1.shape[-1]
    w_c1 = jnp.concatenate([w1.reshape(9 * Cin, base), wh1.reshape(9 * Cin, Ch1)],
                           axis=-1).astype(jnp.bfloat16)
    b_c1 = jnp.concatenate([b1, bh1]).reshape(1, base + Ch1).astype(jnp.float32)
    feat, h1, gp = conv1_hup1_gap(cols, w_c1, b_c1, N, H, W, base, Ch1,
                                  max_tile_rows)

    # CGM: GAP (fused above) -> fc/relu -> fc/sigmoid in one kernel
    gap = gp[:, :, 0, :].sum(axis=1) / float(H * W)               # (N, base)
    g = cgm_gate(gap, params["cgm"])                              # (N, base)

    # PFDM: gate+residual (x*(1+g)) folded into the stride-2 conv's weights
    pf = params["pfdm"]
    scale = 1.0 + g
    w_s2 = (pf["c1_w"][None] * scale[:, None, None, :, None]
            ).reshape(N, 9 * base, base).astype(jnp.bfloat16)
    b_s2 = pf["c1_b"].reshape(1, base).astype(jnp.float32)
    featp = jnp.pad(feat, ((0, 0), (1, 1), (1, 1), (0, 0)))
    y1 = conv3x3_s2(featp, w_s2, b_s2, "relu", jnp.bfloat16, max_tile_rows)

    y1p = jnp.pad(y1, ((0, 0), (1, 1), (1, 1), (0, 0)))
    (pfdm_out,) = conv3x3_tiled(y1p, [pf["c2_w"]], [pf["c2_b"]], [jnp.bfloat16],
                                [None], max(1, max_tile_rows // 2))

    # heads on pfdm_out: HUP0 + conv2 (folded sepconv) fused in one kernel
    pfp = jnp.pad(pfdm_out, ((0, 0), (1, 1), (1, 1), (0, 0)))
    p2 = params["conv2"]
    w2f, b2f = _fold_sepconv(p2["dw_w"], p2["dw_b"], p2["pw_w"], p2["pw_b"])
    h0, E = conv3x3_tiled(pfp, [params["hup0"]["w"], w2f],
                          [params["hup0"]["b"], b2f],
                          [jnp.float32, jnp.float32], [None, None],
                          max(1, max_tile_rows // 2))

    S = pixel_shuffle_nhwc(h0, uf0) + pixel_shuffle_nhwc(h1, uf1)
    return [jnp.transpose(S, (0, 3, 1, 2)),                       # NCHW
            jnp.transpose(E, (0, 3, 1, 2))]


pfin_forward = jax.jit(_pfin_forward_impl, static_argnums=(2, 3))


# ----------------------------------------------------------------------------
# Deterministic parameter init (synthetic — not a checkpoint load)
# ----------------------------------------------------------------------------
def init_params(key, in_channels=3, base=64, upscale_factor=2, reduction=16):
    ks = jax.random.split(key, 12)

    def w(k, shape, scale=0.05):
        return jax.random.normal(k, shape, jnp.float32) * scale

    z = lambda n: jnp.zeros((n,), jnp.float32)
    r = max(base // reduction, 1)
    uf0, uf1 = 2 * upscale_factor, upscale_factor
    return {
        "conv1": dict(dw_w=w(ks[0], (3, 3, in_channels)), dw_b=z(in_channels),
                      pw_w=w(ks[1], (in_channels, base)), pw_b=z(base)),
        "conv2": dict(dw_w=w(ks[2], (3, 3, base)), dw_b=z(base),
                      pw_w=w(ks[3], (base, in_channels)), pw_b=z(in_channels)),
        "cgm": dict(fc1_w=w(ks[4], (base, r)), fc1_b=z(r),
                    fc2_w=w(ks[5], (r, base)), fc2_b=z(base)),
        "pfdm": dict(c1_w=w(ks[6], (3, 3, base, base)), c1_b=z(base),
                     c2_w=w(ks[7], (3, 3, base, base)), c2_b=z(base)),
        # HUP0/HUP1 are constructed inside forward() in the PyTorch code; their
        # (fresh) weights are deterministic here.
        "hup0": dict(w=w(ks[8], (3, 3, base, 3 * uf0 * uf0)), b=z(3 * uf0 * uf0)),
        "hup1": dict(w=w(ks[9], (3, 3, in_channels, 3 * uf1 * uf1)),
                     b=z(3 * uf1 * uf1)),
    }


if __name__ == "__main__":
    key = jax.random.PRNGKey(0)
    k_params, k_x = jax.random.split(key)

    in_channels, base, upscale = 3, 64, 2       # HUP1(in=3) implies 3-ch input
    params = init_params(k_params, in_channels, base, upscale)

    # PyTorch-convention NCHW input
    x = jax.random.normal(k_x, (2, in_channels, 16, 16), jnp.float32)

    # max_tile_rows=8 -> two row tiles per image at H=16, exercising the
    # halo-tiled multi-step grid path (and the fused GAP partial sums).
    S, E = pfin_forward(x, params, upscale, 8)
    S = jax.block_until_ready(S)
    E = jax.block_until_ready(E)

    assert S.shape == (2, 3, 32, 32), S.shape
    assert E.shape == (2, in_channels, 8, 8), E.shape
    assert bool(jnp.all(jnp.isfinite(S))) and bool(jnp.all(jnp.isfinite(E)))
    print("KERNEL_OK")
</pallas_src>

<mosaic_0001>
module attributes {stable_mosaic.version = 11 : i64} {
  func.func @_conv1_hup1_gap_kernel(%arg0: i32, %arg1: i32, %arg2: memref<1x128x27xbf16, #tpu.memory_space<vmem>>, %arg3: memref<27x76xbf16, #tpu.memory_space<vmem>>, %arg4: memref<1x76xf32, #tpu.memory_space<vmem>>, %arg5: memref<1x8x16x64xbf16, #tpu.memory_space<vmem>>, %arg6: memref<1x8x16x12xf32, #tpu.memory_space<vmem>>, %arg7: memref<1x1x8x64xf32, #tpu.memory_space<vmem>>) attributes {dimension_semantics = [#tpu.dimension_semantics<parallel>, #tpu.dimension_semantics<parallel>], iteration_bounds = array<i64: 2, 2>, scalar_prefetch = 0 : i64, scratch_operands = 0 : i64, tpu.core_type = #tpu.core_type<tc>, window_params = [{transform_indices = @transform_0, window_bounds = array<i64: 1, 128, 27>}, {pipeline_mode = #tpu.pipeline_mode<synchronous>, transform_indices = @transform_1, window_bounds = array<i64: 27, 76>}, {pipeline_mode = #tpu.pipeline_mode<synchronous>, transform_indices = @transform_2, window_bounds = array<i64: 1, 76>}, {transform_indices = @transform_3, window_bounds = array<i64: 1, 8, 16, 64>}, {transform_indices = @transform_4, window_bounds = array<i64: 1, 8, 16, 12>}, {transform_indices = @transform_5, window_bounds = array<i64: 1, 1, 8, 64>}]} {
    %c0 = arith.constant 0 : index
    %c0_0 = arith.constant 0 : index
    %c0_1 = arith.constant 0 : index
    %0 = vector.load %arg2[%c0, %c0_0, %c0_1] : memref<1x128x27xbf16, #tpu.memory_space<vmem>>, vector<1x128x27xbf16>
    %1 = vector.shape_cast %0 : vector<1x128x27xbf16> to vector<128x27xbf16>
    %c0_2 = arith.constant 0 : index
    %c0_3 = arith.constant 0 : index
    %2 = vector.load %arg3[%c0_2, %c0_3] : memref<27x76xbf16, #tpu.memory_space<vmem>>, vector<27x76xbf16>
    %cst = arith.constant dense<0.000000e+00> : vector<128x76xf32>
    %3 = tpu.matmul %1, %2, %cst {dimension_numbers = #tpu.dot_dimension_numbers<[1], [0], [0], [1], [0, 0, 1, 1], [], []>} : vector<128x27xbf16>, vector<27x76xbf16>, vector<128x76xf32> -> vector<128x76xf32>
    %c0_4 = arith.constant 0 : index
    %c0_5 = arith.constant 0 : index
    %4 = vector.load %arg4[%c0_4, %c0_5] : memref<1x76xf32, #tpu.memory_space<vmem>>, vector<1x76xf32>
    %5 = vector.broadcast %4 : vector<1x76xf32> to vector<128x76xf32>
    %6 = arith.addf %3, %5 : vector<128x76xf32>
    %7 = vector.extract_strided_slice %6 {offsets = [0, 0], sizes = [128, 64], strides = [1, 1]} : vector<128x76xf32> to vector<128x64xf32>
    %cst_6 = arith.constant dense<0.000000e+00> : vector<64xf32>
    %8 = vector.multi_reduction <add>, %7, %cst_6 [0] : vector<128x64xf32> to vector<64xf32>
    %9 = vector.shape_cast %8 : vector<64xf32> to vector<1x64xf32>
    %10 = vector.shape_cast %9 : vector<1x64xf32> to vector<1x64xf32>
    %11 = vector.broadcast %10 : vector<1x64xf32> to vector<8x64xf32>
    %c0_7 = arith.constant 0 : index
    %c0_8 = arith.constant 0 : index
    %c0_9 = arith.constant 0 : index
    %c0_10 = arith.constant 0 : index
    %12 = vector.load %arg7[%c0_7, %c0_8, %c0_9, %c0_10] : memref<1x1x8x64xf32, #tpu.memory_space<vmem>>, vector<1x1x8x64xf32>
    %13 = vector.shape_cast %12 : vector<1x1x8x64xf32> to vector<8x64xf32>
    %14 = vector.shape_cast %11 : vector<8x64xf32> to vector<1x1x8x64xf32>
    tpu.vector_store %arg7[%c0_7, %c0_8, %c0_9, %c0_10], %14 {strides = array<i32>} : memref<1x1x8x64xf32, #tpu.memory_space<vmem>>, vector<1x1x8x64xf32>,
    %15 = vector.shape_cast %7 : vector<128x64xf32> to vector<8x16x64xf32>
    %16 = arith.truncf %15 : vector<8x16x64xf32> to vector<8x16x64xbf16>
    %c0_11 = arith.constant 0 : index
    %c0_12 = arith.constant 0 : index
    %c0_13 = arith.constant 0 : index
    %c0_14 = arith.constant 0 : index
    %17 = vector.load %arg5[%c0_11, %c0_12, %c0_13, %c0_14] : memref<1x8x16x64xbf16, #tpu.memory_space<vmem>>, vector<1x8x16x64xbf16>
    %18 = vector.shape_cast %17 : vector<1x8x16x64xbf16> to vector<8x16x64xbf16>
    %19 = vector.shape_cast %16 : vector<8x16x64xbf16> to vector<1x8x16x64xbf16>
    tpu.vector_store %arg5[%c0_11, %c0_12, %c0_13, %c0_14], %19 {strides = array<i32>} : memref<1x8x16x64xbf16, #tpu.memory_space<vmem>>, vector<1x8x16x64xbf16>,
    %20 = vector.extract_strided_slice %6 {offsets = [0, 64], sizes = [128, 12], strides = [1, 1]} : vector<128x76xf32> to vector<128x12xf32>
    %21 = vector.shape_cast %20 : vector<128x12xf32> to vector<8x16x12xf32>
    %c0_15 = arith.constant 0 : index
    %c0_16 = arith.constant 0 : index
    %c0_17 = arith.constant 0 : index
    %c0_18 = arith.constant 0 : index
    %22 = vector.load %arg6[%c0_15, %c0_16, %c0_17, %c0_18] : memref<1x8x16x12xf32, #tpu.memory_space<vmem>>, vector<1x8x16x12xf32>
    %23 = vector.shape_cast %22 : vector<1x8x16x12xf32> to vector<8x16x12xf32>
    %24 = vector.shape_cast %21 : vector<8x16x12xf32> to vector<1x8x16x12xf32>
    tpu.vector_store %arg6[%c0_15, %c0_16, %c0_17, %c0_18], %24 {strides = array<i32>} : memref<1x8x16x12xf32, #tpu.memory_space<vmem>>, vector<1x8x16x12xf32>,
    return
  }
  func.func @transform_0(%arg0: i32, %arg1: i32) -> (i32, i32, i32) {
    %c0_i32 = arith.constant 0 : i32
    %c0_i32_0 = arith.constant 0 : i32
    return %arg0, %arg1, %c0_i32 : i32, i32, i32
  }
  func.func @transform_1(%arg0: i32, %arg1: i32) -> (i32, i32) {
    %c0_i32 = arith.constant 0 : i32
    %c0_i32_0 = arith.constant 0 : i32
    %c0_i32_1 = arith.constant 0 : i32
    return %c0_i32, %c0_i32_0 : i32, i32
  }
  func.func @transform_2(%arg0: i32, %arg1: i32) -> (i32, i32) {
    %c0_i32 = arith.constant 0 : i32
    %c0_i32_0 = arith.constant 0 : i32
    %c0_i32_1 = arith.constant 0 : i32
    return %c0_i32, %c0_i32_0 : i32, i32
  }
  func.func @transform_3(%arg0: i32, %arg1: i32) -> (i32, i32, i32, i32) {
    %c0_i32 = arith.constant 0 : i32
    %c0_i32_0 = arith.constant 0 : i32
    %c0_i32_1 = arith.constant 0 : i32
    return %arg0, %arg1, %c0_i32, %c0_i32_0 : i32, i32, i32, i32
  }
  func.func @transform_4(%arg0: i32, %arg1: i32) -> (i32, i32, i32, i32) {
    %c0_i32 = arith.constant 0 : i32
    %c0_i32_0 = arith.constant 0 : i32
    %c0_i32_1 = arith.constant 0 : i32
    return %arg0, %arg1, %c0_i32, %c0_i32_0 : i32, i32, i32, i32
  }
  func.func @transform_5(%arg0: i32, %arg1: i32) -> (i32, i32, i32, i32) {
    %c0_i32 = arith.constant 0 : i32
    %c0_i32_0 = arith.constant 0 : i32
    %c0_i32_1 = arith.constant 0 : i32
    return %arg0, %arg1, %c0_i32, %c0_i32_0 : i32, i32, i32, i32
  }
}

module attributes {stable_mosaic.version = 11 : i64} {
  func.func @_cgm_kernel(%arg0: i32, %arg1: memref<2x64xf32, #tpu.memory_space<vmem>>, %arg2: memref<64x4xf32, #tpu.memory_space<vmem>>, %arg3: memref<1x4xf32, #tpu.memory_space<vmem>>, %arg4: memref<4x64xf32, #tpu.memory_space<vmem>>, %arg5: memref<1x64xf32, #tpu.memory_space<vmem>>, %arg6: memref<2x64xf32, #tpu.memory_space<vmem>>) attributes {dimension_semantics = [#tpu.dimension_semantics<arbitrary>], iteration_bounds = array<i64: 1>, scalar_prefetch = 0 : i64, scratch_operands = 0 : i64, tpu.core_type = #tpu.core_type<tc>, window_params = [{pipeline_mode = #tpu.pipeline_mode<synchronous>, transform_indices = @transform_0, window_bounds = array<i64: 2, 64>}, {pipeline_mode = #tpu.pipeline_mode<synchronous>, transform_indices = @transform_1, window_bounds = array<i64: 64, 4>}, {pipeline_mode = #tpu.pipeline_mode<synchronous>, transform_indices = @transform_2, window_bounds = array<i64: 1, 4>}, {pipeline_mode = #tpu.pipeline_mode<synchronous>, transform_indices = @transform_3, window_bounds = array<i64: 4, 64>}, {pipeline_mode = #tpu.pipeline_mode<synchronous>, transform_indices = @transform_4, window_bounds = array<i64: 1, 64>}, {pipeline_mode = #tpu.pipeline_mode<synchronous>, transform_indices = @transform_5, window_bounds = array<i64: 2, 64>}]} {
    %c0 = arith.constant 0 : index
    %c0_0 = arith.constant 0 : index
    %0 = vector.load %arg1[%c0, %c0_0] : memref<2x64xf32, #tpu.memory_space<vmem>>, vector<2x64xf32>
    %c0_1 = arith.constant 0 : index
    %c0_2 = arith.constant 0 : index
    %1 = vector.load %arg2[%c0_1, %c0_2] : memref<64x4xf32, #tpu.memory_space<vmem>>, vector<64x4xf32>
    %cst = arith.constant dense<0.000000e+00> : vector<2x4xf32>
    %2 = tpu.matmul %0, %1, %cst {dimension_numbers = #tpu.dot_dimension_numbers<[1], [0], [0], [1], [0, 0, 1, 1], [], []>} : vector<2x64xf32>, vector<64x4xf32>, vector<2x4xf32> -> vector<2x4xf32>
    %c0_3 = arith.constant 0 : index
    %c0_4 = arith.constant 0 : index
    %3 = vector.load %arg3[%c0_3, %c0_4] : memref<1x4xf32, #tpu.memory_space<vmem>>, vector<1x4xf32>
    %4 = vector.broadcast %3 : vector<1x4xf32> to vector<2x4xf32>
    %5 = arith.addf %2, %4 : vector<2x4xf32>
    %cst_5 = arith.constant 0.000000e+00 : f32
    %6 = vector.broadcast %cst_5 : f32 to vector<2x4xf32>
    %7 = arith.maximumf %5, %6 : vector<2x4xf32>
    %c0_6 = arith.constant 0 : index
    %c0_7 = arith.constant 0 : index
    %8 = vector.load %arg4[%c0_6, %c0_7] : memref<4x64xf32, #tpu.memory_space<vmem>>, vector<4x64xf32>
    %cst_8 = arith.constant dense<0.000000e+00> : vector<2x64xf32>
    %9 = tpu.matmul %7, %8, %cst_8 {dimension_numbers = #tpu.dot_dimension_numbers<[1], [0], [0], [1], [0, 0, 1, 1], [], []>} : vector<2x4xf32>, vector<4x64xf32>, vector<2x64xf32> -> vector<2x64xf32>
    %c0_9 = arith.constant 0 : index
    %c0_10 = arith.constant 0 : index
    %10 = vector.load %arg5[%c0_9, %c0_10] : memref<1x64xf32, #tpu.memory_space<vmem>>, vector<1x64xf32>
    %11 = vector.broadcast %10 : vector<1x64xf32> to vector<2x64xf32>
    %12 = arith.addf %9, %11 : vector<2x64xf32>
    %13 = arith.negf %12 : vector<2x64xf32>
    %14 = math.exp %13 : vector<2x64xf32>
    %cst_11 = arith.constant 1.000000e+00 : f32
    %15 = vector.broadcast %cst_11 : f32 to vector<2x64xf32>
    %16 = arith.addf %15, %14 : vector<2x64xf32>
    %17 = arith.divf %15, %16 : vector<2x64xf32>
    %c0_12 = arith.constant 0 : index
    %c0_13 = arith.constant 0 : index
    %18 = vector.load %arg6[%c0_12, %c0_13] : memref<2x64xf32, #tpu.memory_space<vmem>>, vector<2x64xf32>
    tpu.vector_store %arg6[%c0_12, %c0_13], %17 {strides = array<i32>} : memref<2x64xf32, #tpu.memory_space<vmem>>, vector<2x64xf32>,
    return
  }
  func.func @transform_0(%arg0: i32) -> (i32, i32) {
    %c0_i32 = arith.constant 0 : i32
    %c0_i32_0 = arith.constant 0 : i32
    %c0_i32_1 = arith.constant 0 : i32
    return %c0_i32, %c0_i32_0 : i32, i32
  }
  func.func @transform_1(%arg0: i32) -> (i32, i32) {
    %c0_i32 = arith.constant 0 : i32
    %c0_i32_0 = arith.constant 0 : i32
    %c0_i32_1 = arith.constant 0 : i32
    return %c0_i32, %c0_i32_0 : i32, i32
  }
  func.func @transform_2(%arg0: i32) -> (i32, i32) {
    %c0_i32 = arith.constant 0 : i32
    %c0_i32_0 = arith.constant 0 : i32
    %c0_i32_1 = arith.constant 0 : i32
    return %c0_i32, %c0_i32_0 : i32, i32
  }
  func.func @transform_3(%arg0: i32) -> (i32, i32) {
    %c0_i32 = arith.constant 0 : i32
    %c0_i32_0 = arith.constant 0 : i32
    %c0_i32_1 = arith.constant 0 : i32
    return %c0_i32, %c0_i32_0 : i32, i32
  }
  func.func @transform_4(%arg0: i32) -> (i32, i32) {
    %c0_i32 = arith.constant 0 : i32
    %c0_i32_0 = arith.constant 0 : i32
    %c0_i32_1 = arith.constant 0 : i32
    return %c0_i32, %c0_i32_0 : i32, i32
  }
  func.func @transform_5(%arg0: i32) -> (i32, i32) {
    %c0_i32 = arith.constant 0 : i32
    %c0_i32_0 = arith.constant 0 : i32
    %c0_i32_1 = arith.constant 0 : i32
    return %c0_i32, %c0_i32_0 : i32, i32
  }
}

module attributes {stable_mosaic.version = 11 : i64} {
  func.func @_conv3x3_s2_kernel(%arg0: i32, %arg1: i32, %arg2: memref<1x8x18x64xbf16, #tpu.memory_space<vmem>>, %arg3: memref<1x1x1x18x64xbf16, #tpu.memory_space<vmem>>, %arg4: memref<1x576x64xbf16, #tpu.memory_space<vmem>>, %arg5: memref<1x64xf32, #tpu.memory_space<vmem>>, %arg6: memref<1x4x8x64xbf16, #tpu.memory_space<vmem>>) attributes {dimension_semantics = [#tpu.dimension_semantics<parallel>, #tpu.dimension_semantics<parallel>], iteration_bounds = array<i64: 2, 2>, scalar_prefetch = 0 : i64, scratch_operands = 0 : i64, tpu.core_type = #tpu.core_type<tc>, window_params = [{transform_indices = @transform_0, window_bounds = array<i64: 1, 8, 18, 64>}, {transform_indices = @transform_1, window_bounds = array<i64: 1, 1, 1, 18, 64>}, {transform_indices = @transform_2, window_bounds = array<i64: 1, 576, 64>}, {pipeline_mode = #tpu.pipeline_mode<synchronous>, transform_indices = @transform_3, window_bounds = array<i64: 1, 64>}, {transform_indices = @transform_4, window_bounds = array<i64: 1, 4, 8, 64>}]} {
    %c0 = arith.constant 0 : index
    %c0_0 = arith.constant 0 : index
    %c0_1 = arith.constant 0 : index
    %c0_2 = arith.constant 0 : index
    %0 = vector.load %arg2[%c0, %c0_0, %c0_1, %c0_2] : memref<1x8x18x64xbf16, #tpu.memory_space<vmem>>, vector<1x8x18x64xbf16>
    %1 = vector.shape_cast %0 : vector<1x8x18x64xbf16> to vector<8x18x64xbf16>
    %c0_3 = arith.constant 0 : index
    %c0_4 = arith.constant 0 : index
    %c0_5 = arith.constant 0 : index
    %c0_6 = arith.constant 0 : index
    %c0_7 = arith.constant 0 : index
    %2 = vector.load %arg3[%c0_3, %c0_4, %c0_5, %c0_6, %c0_7] : memref<1x1x1x18x64xbf16, #tpu.memory_space<vmem>>, vector<1x1x1x18x64xbf16>
    %3 = vector.shape_cast %2 : vector<1x1x1x18x64xbf16> to vector<1x18x64xbf16>
    %4 = vector.shape_cast %1 : vector<8x18x64xbf16> to vector<4x2x18x64xbf16>
    %5 = vector.extract_strided_slice %4 {offsets = [0, 0, 0, 0], sizes = [4, 1, 18, 64], strides = [1, 1, 1, 1]} : vector<4x2x18x64xbf16> to vector<4x1x18x64xbf16>
    %6 = vector.shape_cast %5 : vector<4x1x18x64xbf16> to vector<4x18x64xbf16>
    %7 = tpu.concatenate %6, %3 in 0 : vector<4x18x64xbf16>, vector<1x18x64xbf16> -> vector<5x18x64xbf16>
    %8 = vector.extract_strided_slice %4 {offsets = [0, 1, 0, 0], sizes = [4, 1, 18, 64], strides = [1, 1, 1, 1]} : vector<4x2x18x64xbf16> to vector<4x1x18x64xbf16>
    %9 = vector.shape_cast %8 : vector<4x1x18x64xbf16> to vector<4x18x64xbf16>
    %10 = vector.shape_cast %7 : vector<5x18x64xbf16> to vector<5x9x2x64xbf16>
    %11 = vector.extract_strided_slice %10 {offsets = [0, 0, 0, 0], sizes = [5, 9, 1, 64], strides = [1, 1, 1, 1]} : vector<5x9x2x64xbf16> to vector<5x9x1x64xbf16>
    %12 = vector.shape_cast %11 : vector<5x9x1x64xbf16> to vector<5x9x64xbf16>
    %13 = vector.extract_strided_slice %10 {offsets = [0, 0, 1, 0], sizes = [5, 9, 1, 64], strides = [1, 1, 1, 1]} : vector<5x9x2x64xbf16> to vector<5x9x1x64xbf16>
    %14 = vector.shape_cast %13 : vector<5x9x1x64xbf16> to vector<5x9x64xbf16>
    %15 = vector.shape_cast %9 : vector<4x18x64xbf16> to vector<4x9x2x64xbf16>
    %16 = vector.extract_strided_slice %15 {offsets = [0, 0, 0, 0], sizes = [4, 9, 1, 64], strides = [1, 1, 1, 1]} : vector<4x9x2x64xbf16> to vector<4x9x1x64xbf16>
    %17 = vector.shape_cast %16 : vector<4x9x1x64xbf16> to vector<4x9x64xbf16>
    %18 = vector.extract_strided_slice %15 {offsets = [0, 0, 1, 0], sizes = [4, 9, 1, 64], strides = [1, 1, 1, 1]} : vector<4x9x2x64xbf16> to vector<4x9x1x64xbf16>
    %19 = vector.shape_cast %18 : vector<4x9x1x64xbf16> to vector<4x9x64xbf16>
    %cst = arith.constant 0.000000e+00 : f32
    %20 = vector.broadcast %cst : f32 to vector<32x64xf32>
    %21 = vector.extract_strided_slice %12 {offsets = [0, 0, 0], sizes = [4, 8, 64], strides = [1, 1, 1]} : vector<5x9x64xbf16> to vector<4x8x64xbf16>
    %22 = vector.shape_cast %21 : vector<4x8x64xbf16> to vector<32x64xbf16>
    %c0_8 = arith.constant 0 : index
    %c0_9 = arith.constant 0 : index
    %c0_10 = arith.constant 0 : index
    %23 = vector.load %arg4[%c0_8, %c0_9, %c0_10] : memref<1x576x64xbf16, #tpu.memory_space<vmem>>, vector<1x64x64xbf16>
    %24 = vector.shape_cast %23 : vector<1x64x64xbf16> to vector<64x64xbf16>
    %cst_11 = arith.constant dense<0.000000e+00> : vector<32x64xf32>
    %25 = tpu.matmul %22, %24, %cst_11 {dimension_numbers = #tpu.dot_dimension_numbers<[1], [0], [0], [1], [0, 0, 1, 1], [], []>} : vector<32x64xbf16>, vector<64x64xbf16>, vector<32x64xf32> -> vector<32x64xf32>
    %26 = arith.addf %20, %25 : vector<32x64xf32>
    %27 = vector.extract_strided_slice %14 {offsets = [0, 0, 0], sizes = [4, 8, 64], strides = [1, 1, 1]} : vector<5x9x64xbf16> to vector<4x8x64xbf16>
    %28 = vector.shape_cast %27 : vector<4x8x64xbf16> to vector<32x64xbf16>
    %c0_12 = arith.constant 0 : index
    %c64 = arith.constant 64 : index
    %c0_13 = arith.constant 0 : index
    %29 = vector.load %arg4[%c0_12, %c64, %c0_13] : memref<1x576x64xbf16, #tpu.memory_space<vmem>>, vector<1x64x64xbf16>
    %30 = vector.shape_cast %29 : vector<1x64x64xbf16> to vector<64x64xbf16>
    %cst_14 = arith.constant dense<0.000000e+00> : vector<32x64xf32>
    %31 = tpu.matmul %28, %30, %cst_14 {dimension_numbers = #tpu.dot_dimension_numbers<[1], [0], [0], [1], [0, 0, 1, 1], [], []>} : vector<32x64xbf16>, vector<64x64xbf16>, vector<32x64xf32> -> vector<32x64xf32>
    %32 = arith.addf %26, %31 : vector<32x64xf32>
    %33 = vector.extract_strided_slice %12 {offsets = [0, 1, 0], sizes = [4, 8, 64], strides = [1, 1, 1]} : vector<5x9x64xbf16> to vector<4x8x64xbf16>
    %34 = vector.shape_cast %33 : vector<4x8x64xbf16> to vector<32x64xbf16>
    %c0_15 = arith.constant 0 : index
    %c128 = arith.constant 128 : index
    %c0_16 = arith.constant 0 : index
    %35 = vector.load %arg4[%c0_15, %c128, %c0_16] : memref<1x576x64xbf16, #tpu.memory_space<vmem>>, vector<1x64x64xbf16>
    %36 = vector.shape_cast %35 : vector<1x64x64xbf16> to vector<64x64xbf16>
    %cst_17 = arith.constant dense<0.000000e+00> : vector<32x64xf32>
    %37 = tpu.matmul %34, %36, %cst_17 {dimension_numbers = #tpu.dot_dimension_numbers<[1], [0], [0], [1], [0, 0, 1, 1], [], []>} : vector<32x64xbf16>, vector<64x64xbf16>, vector<32x64xf32> -> vector<32x64xf32>
    %38 = arith.addf %32, %37 : vector<32x64xf32>
    %39 = vector.extract_strided_slice %17 {offsets = [0, 0, 0], sizes = [4, 8, 64], strides = [1, 1, 1]} : vector<4x9x64xbf16> to vector<4x8x64xbf16>
    %40 = vector.shape_cast %39 : vector<4x8x64xbf16> to vector<32x64xbf16>
    %c0_18 = arith.constant 0 : index
    %c192 = arith.constant 192 : index
    %c0_19 = arith.constant 0 : index
    %41 = vector.load %arg4[%c0_18, %c192, %c0_19] : memref<1x576x64xbf16, #tpu.memory_space<vmem>>, vector<1x64x64xbf16>
    %42 = vector.shape_cast %41 : vector<1x64x64xbf16> to vector<64x64xbf16>
    %cst_20 = arith.constant dense<0.000000e+00> : vector<32x64xf32>
    %43 = tpu.matmul %40, %42, %cst_20 {dimension_numbers = #tpu.dot_dimension_numbers<[1], [0], [0], [1], [0, 0, 1, 1], [], []>} : vector<32x64xbf16>, vector<64x64xbf16>, vector<32x64xf32> -> vector<32x64xf32>
    %44 = arith.addf %38, %43 : vector<32x64xf32>
    %45 = vector.extract_strided_slice %19 {offsets = [0, 0, 0], sizes = [4, 8, 64], strides = [1, 1, 1]} : vector<4x9x64xbf16> to vector<4x8x64xbf16>
    %46 = vector.shape_cast %45 : vector<4x8x64xbf16> to vector<32x64xbf16>
    %c0_21 = arith.constant 0 : index
    %c256 = arith.constant 256 : index
    %c0_22 = arith.constant 0 : index
    %47 = vector.load %arg4[%c0_21, %c256, %c0_22] : memref<1x576x64xbf16, #tpu.memory_space<vmem>>, vector<1x64x64xbf16>
    %48 = vector.shape_cast %47 : vector<1x64x64xbf16> to vector<64x64xbf16>
    %cst_23 = arith.constant dense<0.000000e+00> : vector<32x64xf32>
    %49 = tpu.matmul %46, %48, %cst_23 {dimension_numbers = #tpu.dot_dimension_numbers<[1], [0], [0], [1], [0, 0, 1, 1], [], []>} : vector<32x64xbf16>, vector<64x64xbf16>, vector<32x64xf32> -> vector<32x64xf32>
    %50 = arith.addf %44, %49 : vector<32x64xf32>
    %51 = vector.extract_strided_slice %17 {offsets = [0, 1, 0], sizes = [4, 8, 64], strides = [1, 1, 1]} : vector<4x9x64xbf16> to vector<4x8x64xbf16>
    %52 = vector.shape_cast %51 : vector<4x8x64xbf16> to vector<32x64xbf16>
    %c0_24 = arith.constant 0 : index
    %c320 = arith.constant 320 : index
    %c0_25 = arith.constant 0 : index
    %53 = vector.load %arg4[%c0_24, %c320, %c0_25] : memref<1x576x64xbf16, #tpu.memory_space<vmem>>, vector<1x64x64xbf16>
    %54 = vector.shape_cast %53 : vector<1x64x64xbf16> to vector<64x64xbf16>
    %cst_26 = arith.constant dense<0.000000e+00> : vector<32x64xf32>
    %55 = tpu.matmul %52, %54, %cst_26 {dimension_numbers = #tpu.dot_dimension_numbers<[1], [0], [0], [1], [0, 0, 1, 1], [], []>} : vector<32x64xbf16>, vector<64x64xbf16>, vector<32x64xf32> -> vector<32x64xf32>
    %56 = arith.addf %50, %55 : vector<32x64xf32>
    %57 = vector.extract_strided_slice %12 {offsets = [1, 0, 0], sizes = [4, 8, 64], strides = [1, 1, 1]} : vector<5x9x64xbf16> to vector<4x8x64xbf16>
    %58 = vector.shape_cast %57 : vector<4x8x64xbf16> to vector<32x64xbf16>
    %c0_27 = arith.constant 0 : index
    %c384 = arith.constant 384 : index
    %c0_28 = arith.constant 0 : index
    %59 = vector.load %arg4[%c0_27, %c384, %c0_28] : memref<1x576x64xbf16, #tpu.memory_space<vmem>>, vector<1x64x64xbf16>
    %60 = vector.shape_cast %59 : vector<1x64x64xbf16> to vector<64x64xbf16>
    %cst_29 = arith.constant dense<0.000000e+00> : vector<32x64xf32>
    %61 = tpu.matmul %58, %60, %cst_29 {dimension_numbers = #tpu.dot_dimension_numbers<[1], [0], [0], [1], [0, 0, 1, 1], [], []>} : vector<32x64xbf16>, vector<64x64xbf16>, vector<32x64xf32> -> vector<32x64xf32>
    %62 = arith.addf %56, %61 : vector<32x64xf32>
    %63 = vector.extract_strided_slice %14 {offsets = [1, 0, 0], sizes = [4, 8, 64], strides = [1, 1, 1]} : vector<5x9x64xbf16> to vector<4x8x64xbf16>
    %64 = vector.shape_cast %63 : vector<4x8x64xbf16> to vector<32x64xbf16>
    %c0_30 = arith.constant 0 : index
    %c448 = arith.constant 448 : index
    %c0_31 = arith.constant 0 : index
    %65 = vector.load %arg4[%c0_30, %c448, %c0_31] : memref<1x576x64xbf16, #tpu.memory_space<vmem>>, vector<1x64x64xbf16>
    %66 = vector.shape_cast %65 : vector<1x64x64xbf16> to vector<64x64xbf16>
    %cst_32 = arith.constant dense<0.000000e+00> : vector<32x64xf32>
    %67 = tpu.matmul %64, %66, %cst_32 {dimension_numbers = #tpu.dot_dimension_numbers<[1], [0], [0], [1], [0, 0, 1, 1], [], []>} : vector<32x64xbf16>, vector<64x64xbf16>, vector<32x64xf32> -> vector<32x64xf32>
    %68 = arith.addf %62, %67 : vector<32x64xf32>
    %69 = vector.extract_strided_slice %12 {offsets = [1, 1, 0], sizes = [4, 8, 64], strides = [1, 1, 1]} : vector<5x9x64xbf16> to vector<4x8x64xbf16>
    %70 = vector.shape_cast %69 : vector<4x8x64xbf16> to vector<32x64xbf16>
    %c0_33 = arith.constant 0 : index
    %c512 = arith.constant 512 : index
    %c0_34 = arith.constant 0 : index
    %71 = vector.load %arg4[%c0_33, %c512, %c0_34] : memref<1x576x64xbf16, #tpu.memory_space<vmem>>, vector<1x64x64xbf16>
    %72 = vector.shape_cast %71 : vector<1x64x64xbf16> to vector<64x64xbf16>
    %cst_35 = arith.constant dense<0.000000e+00> : vector<32x64xf32>
    %73 = tpu.matmul %70, %72, %cst_35 {dimension_numbers = #tpu.dot_dimension_numbers<[1], [0], [0], [1], [0, 0, 1, 1], [], []>} : vector<32x64xbf16>, vector<64x64xbf16>, vector<32x64xf32> -> vector<32x64xf32>
    %74 = arith.addf %68, %73 : vector<32x64xf32>
    %c0_36 = arith.constant 0 : index
    %c0_37 = arith.constant 0 : index
    %75 = vector.load %arg5[%c0_36, %c0_37] : memref<1x64xf32, #tpu.memory_space<vmem>>, vector<1x64xf32>
    %76 = vector.broadcast %75 : vector<1x64xf32> to vector<32x64xf32>
    %77 = arith.addf %74, %76 : vector<32x64xf32>
    %cst_38 = arith.constant 0.000000e+00 : f32
    %78 = vector.broadcast %cst_38 : f32 to vector<32x64xf32>
    %79 = arith.maximumf %77, %78 : vector<32x64xf32>
    %80 = vector.shape_cast %79 : vector<32x64xf32> to vector<4x8x64xf32>
    %81 = arith.truncf %80 : vector<4x8x64xf32> to vector<4x8x64xbf16>
    %c0_39 = arith.constant 0 : index
    %c0_40 = arith.constant 0 : index
    %c0_41 = arith.constant 0 : index
    %c0_42 = arith.constant 0 : index
    %82 = vector.load %arg6[%c0_39, %c0_40, %c0_41, %c0_42] : memref<1x4x8x64xbf16, #tpu.memory_space<vmem>>, vector<1x4x8x64xbf16>
    %83 = vector.shape_cast %82 : vector<1x4x8x64xbf16> to vector<4x8x64xbf16>
    %84 = vector.shape_cast %81 : vector<4x8x64xbf16> to vector<1x4x8x64xbf16>
    tpu.vector_store %arg6[%c0_39, %c0_40, %c0_41, %c0_42], %84 {strides = array<i32>} : memref<1x4x8x64xbf16, #tpu.memory_space<vmem>>, vector<1x4x8x64xbf16>,
    return
  }
  func.func @transform_0(%arg0: i32, %arg1: i32) -> (i32, i32, i32, i32) {
    %c0_i32 = arith.constant 0 : i32
    %c0_i32_0 = arith.constant 0 : i32
    %c0_i32_1 = arith.constant 0 : i32
    return %arg0, %arg1, %c0_i32, %c0_i32_0 : i32, i32, i32, i32
  }
  func.func @transform_1(%arg0: i32, %arg1: i32) -> (i32, i32, i32, i32, i32) {
    %c0_i32 = arith.constant 0 : i32
    %c0_i32_0 = arith.constant 0 : i32
    %c0_i32_1 = arith.constant 0 : i32
    %c0_i32_2 = arith.constant 0 : i32
    return %arg0, %arg1, %c0_i32, %c0_i32_0, %c0_i32_1 : i32, i32, i32, i32, i32
  }
  func.func @transform_2(%arg0: i32, %arg1: i32) -> (i32, i32, i32) {
    %c0_i32 = arith.constant 0 : i32
    %c0_i32_0 = arith.constant 0 : i32
    %c0_i32_1 = arith.constant 0 : i32
    return %arg0, %c0_i32, %c0_i32_0 : i32, i32, i32
  }
  func.func @transform_3(%arg0: i32, %arg1: i32) -> (i32, i32) {
    %c0_i32 = arith.constant 0 : i32
    %c0_i32_0 = arith.constant 0 : i32
    %c0_i32_1 = arith.constant 0 : i32
    return %c0_i32, %c0_i32_0 : i32, i32
  }
  func.func @transform_4(%arg0: i32, %arg1: i32) -> (i32, i32, i32, i32) {
    %c0_i32 = arith.constant 0 : i32
    %c0_i32_0 = arith.constant 0 : i32
    %c0_i32_1 = arith.constant 0 : i32
    return %arg0, %arg1, %c0_i32, %c0_i32_0 : i32, i32, i32, i32
  }
}

module attributes {stable_mosaic.version = 11 : i64} {
  func.func @_conv3x3_kernel(%arg0: i32, %arg1: i32, %arg2: memref<1x4x10x64xbf16, #tpu.memory_space<vmem>>, %arg3: memref<1x1x2x10x64xbf16, #tpu.memory_space<vmem>>, %arg4: memref<576x64xbf16, #tpu.memory_space<vmem>>, %arg5: memref<1x64xf32, #tpu.memory_space<vmem>>, %arg6: memref<1x4x8x64xbf16, #tpu.memory_space<vmem>>) attributes {dimension_semantics = [#tpu.dimension_semantics<parallel>, #tpu.dimension_semantics<parallel>], iteration_bounds = array<i64: 2, 2>, scalar_prefetch = 0 : i64, scratch_operands = 0 : i64, tpu.core_type = #tpu.core_type<tc>, window_params = [{transform_indices = @transform_0, window_bounds = array<i64: 1, 4, 10, 64>}, {transform_indices = @transform_1, window_bounds = array<i64: 1, 1, 2, 10, 64>}, {pipeline_mode = #tpu.pipeline_mode<synchronous>, transform_indices = @transform_2, window_bounds = array<i64: 576, 64>}, {pipeline_mode = #tpu.pipeline_mode<synchronous>, transform_indices = @transform_3, window_bounds = array<i64: 1, 64>}, {transform_indices = @transform_4, window_bounds = array<i64: 1, 4, 8, 64>}]} {
    %c0 = arith.constant 0 : index
    %c0_0 = arith.constant 0 : index
    %c0_1 = arith.constant 0 : index
    %c0_2 = arith.constant 0 : index
    %0 = vector.load %arg2[%c0, %c0_0, %c0_1, %c0_2] : memref<1x4x10x64xbf16, #tpu.memory_space<vmem>>, vector<1x4x10x64xbf16>
    %1 = vector.shape_cast %0 : vector<1x4x10x64xbf16> to vector<4x10x64xbf16>
    %c0_3 = arith.constant 0 : index
    %c0_4 = arith.constant 0 : index
    %c0_5 = arith.constant 0 : index
    %c0_6 = arith.constant 0 : index
    %c0_7 = arith.constant 0 : index
    %2 = vector.load %arg3[%c0_3, %c0_4, %c0_5, %c0_6, %c0_7] : memref<1x1x2x10x64xbf16, #tpu.memory_space<vmem>>, vector<1x1x2x10x64xbf16>
    %3 = vector.shape_cast %2 : vector<1x1x2x10x64xbf16> to vector<2x10x64xbf16>
    %4 = tpu.concatenate %1, %3 in 0 : vector<4x10x64xbf16>, vector<2x10x64xbf16> -> vector<6x10x64xbf16>
    %cst = arith.constant 0.000000e+00 : f32
    %5 = vector.broadcast %cst : f32 to vector<32x64xf32>
    %6 = vector.extract_strided_slice %4 {offsets = [0, 0, 0], sizes = [4, 8, 64], strides = [1, 1, 1]} : vector<6x10x64xbf16> to vector<4x8x64xbf16>
    %7 = vector.shape_cast %6 : vector<4x8x64xbf16> to vector<32x64xbf16>
    %c0_8 = arith.constant 0 : index
    %c0_9 = arith.constant 0 : index
    %8 = vector.load %arg4[%c0_8, %c0_9] : memref<576x64xbf16, #tpu.memory_space<vmem>>, vector<64x64xbf16>
    %cst_10 = arith.constant dense<0.000000e+00> : vector<32x64xf32>
    %9 = tpu.matmul %7, %8, %cst_10 {dimension_numbers = #tpu.dot_dimension_numbers<[1], [0], [0], [1], [0, 0, 1, 1], [], []>} : vector<32x64xbf16>, vector<64x64xbf16>, vector<32x64xf32> -> vector<32x64xf32>
    %10 = arith.addf %5, %9 : vector<32x64xf32>
    %11 = vector.extract_strided_slice %4 {offsets = [0, 1, 0], sizes = [4, 8, 64], strides = [1, 1, 1]} : vector<6x10x64xbf16> to vector<4x8x64xbf16>
    %12 = vector.shape_cast %11 : vector<4x8x64xbf16> to vector<32x64xbf16>
    %c64 = arith.constant 64 : index
    %c0_11 = arith.constant 0 : index
    %13 = vector.load %arg4[%c64, %c0_11] : memref<576x64xbf16, #tpu.memory_space<vmem>>, vector<64x64xbf16>
    %cst_12 = arith.constant dense<0.000000e+00> : vector<32x64xf32>
    %14 = tpu.matmul %12, %13, %cst_12 {dimension_numbers = #tpu.dot_dimension_numbers<[1], [0], [0], [1], [0, 0, 1, 1], [], []>} : vector<32x64xbf16>, vector<64x64xbf16>, vector<32x64xf32> -> vector<32x64xf32>
    %15 = arith.addf %10, %14 : vector<32x64xf32>
    %16 = vector.extract_strided_slice %4 {offsets = [0, 2, 0], sizes = [4, 8, 64], strides = [1, 1, 1]} : vector<6x10x64xbf16> to vector<4x8x64xbf16>
    %17 = vector.shape_cast %16 : vector<4x8x64xbf16> to vector<32x64xbf16>
    %c128 = arith.constant 128 : index
    %c0_13 = arith.constant 0 : index
    %18 = vector.load %arg4[%c128, %c0_13] : memref<576x64xbf16, #tpu.memory_space<vmem>>, vector<64x64xbf16>
    %cst_14 = arith.constant dense<0.000000e+00> : vector<32x64xf32>
    %19 = tpu.matmul %17, %18, %cst_14 {dimension_numbers = #tpu.dot_dimension_numbers<[1], [0], [0], [1], [0, 0, 1, 1], [], []>} : vector<32x64xbf16>, vector<64x64xbf16>, vector<32x64xf32> -> vector<32x64xf32>
    %20 = arith.addf %15, %19 : vector<32x64xf32>
    %21 = vector.extract_strided_slice %4 {offsets = [1, 0, 0], sizes = [4, 8, 64], strides = [1, 1, 1]} : vector<6x10x64xbf16> to vector<4x8x64xbf16>
    %22 = vector.shape_cast %21 : vector<4x8x64xbf16> to vector<32x64xbf16>
    %c192 = arith.constant 192 : index
    %c0_15 = arith.constant 0 : index
    %23 = vector.load %arg4[%c192, %c0_15] : memref<576x64xbf16, #tpu.memory_space<vmem>>, vector<64x64xbf16>
    %cst_16 = arith.constant dense<0.000000e+00> : vector<32x64xf32>
    %24 = tpu.matmul %22, %23, %cst_16 {dimension_numbers = #tpu.dot_dimension_numbers<[1], [0], [0], [1], [0, 0, 1, 1], [], []>} : vector<32x64xbf16>, vector<64x64xbf16>, vector<32x64xf32> -> vector<32x64xf32>
    %25 = arith.addf %20, %24 : vector<32x64xf32>
    %26 = vector.extract_strided_slice %4 {offsets = [1, 1, 0], sizes = [4, 8, 64], strides = [1, 1, 1]} : vector<6x10x64xbf16> to vector<4x8x64xbf16>
    %27 = vector.shape_cast %26 : vector<4x8x64xbf16> to vector<32x64xbf16>
    %c256 = arith.constant 256 : index
    %c0_17 = arith.constant 0 : index
    %28 = vector.load %arg4[%c256, %c0_17] : memref<576x64xbf16, #tpu.memory_space<vmem>>, vector<64x64xbf16>
    %cst_18 = arith.constant dense<0.000000e+00> : vector<32x64xf32>
    %29 = tpu.matmul %27, %28, %cst_18 {dimension_numbers = #tpu.dot_dimension_numbers<[1], [0], [0], [1], [0, 0, 1, 1], [], []>} : vector<32x64xbf16>, vector<64x64xbf16>, vector<32x64xf32> -> vector<32x64xf32>
    %30 = arith.addf %25, %29 : vector<32x64xf32>
    %31 = vector.extract_strided_slice %4 {offsets = [1, 2, 0], sizes = [4, 8, 64], strides = [1, 1, 1]} : vector<6x10x64xbf16> to vector<4x8x64xbf16>
    %32 = vector.shape_cast %31 : vector<4x8x64xbf16> to vector<32x64xbf16>
    %c320 = arith.constant 320 : index
    %c0_19 = arith.constant 0 : index
    %33 = vector.load %arg4[%c320, %c0_19] : memref<576x64xbf16, #tpu.memory_space<vmem>>, vector<64x64xbf16>
    %cst_20 = arith.constant dense<0.000000e+00> : vector<32x64xf32>
    %34 = tpu.matmul %32, %33, %cst_20 {dimension_numbers = #tpu.dot_dimension_numbers<[1], [0], [0], [1], [0, 0, 1, 1], [], []>} : vector<32x64xbf16>, vector<64x64xbf16>, vector<32x64xf32> -> vector<32x64xf32>
    %35 = arith.addf %30, %34 : vector<32x64xf32>
    %36 = vector.extract_strided_slice %4 {offsets = [2, 0, 0], sizes = [4, 8, 64], strides = [1, 1, 1]} : vector<6x10x64xbf16> to vector<4x8x64xbf16>
    %37 = vector.shape_cast %36 : vector<4x8x64xbf16> to vector<32x64xbf16>
    %c384 = arith.constant 384 : index
    %c0_21 = arith.constant 0 : index
    %38 = vector.load %arg4[%c384, %c0_21] : memref<576x64xbf16, #tpu.memory_space<vmem>>, vector<64x64xbf16>
    %cst_22 = arith.constant dense<0.000000e+00> : vector<32x64xf32>
    %39 = tpu.matmul %37, %38, %cst_22 {dimension_numbers = #tpu.dot_dimension_numbers<[1], [0], [0], [1], [0, 0, 1, 1], [], []>} : vector<32x64xbf16>, vector<64x64xbf16>, vector<32x64xf32> -> vector<32x64xf32>
    %40 = arith.addf %35, %39 : vector<32x64xf32>
    %41 = vector.extract_strided_slice %4 {offsets = [2, 1, 0], sizes = [4, 8, 64], strides = [1, 1, 1]} : vector<6x10x64xbf16> to vector<4x8x64xbf16>
    %42 = vector.shape_cast %41 : vector<4x8x64xbf16> to vector<32x64xbf16>
    %c448 = arith.constant 448 : index
    %c0_23 = arith.constant 0 : index
    %43 = vector.load %arg4[%c448, %c0_23] : memref<576x64xbf16, #tpu.memory_space<vmem>>, vector<64x64xbf16>
    %cst_24 = arith.constant dense<0.000000e+00> : vector<32x64xf32>
    %44 = tpu.matmul %42, %43, %cst_24 {dimension_numbers = #tpu.dot_dimension_numbers<[1], [0], [0], [1], [0, 0, 1, 1], [], []>} : vector<32x64xbf16>, vector<64x64xbf16>, vector<32x64xf32> -> vector<32x64xf32>
    %45 = arith.addf %40, %44 : vector<32x64xf32>
    %46 = vector.extract_strided_slice %4 {offsets = [2, 2, 0], sizes = [4, 8, 64], strides = [1, 1, 1]} : vector<6x10x64xbf16> to vector<4x8x64xbf16>
    %47 = vector.shape_cast %46 : vector<4x8x64xbf16> to vector<32x64xbf16>
    %c512 = arith.constant 512 : index
    %c0_25 = arith.constant 0 : index
    %48 = vector.load %arg4[%c512, %c0_25] : memref<576x64xbf16, #tpu.memory_space<vmem>>, vector<64x64xbf16>
    %cst_26 = arith.constant dense<0.000000e+00> : vector<32x64xf32>
    %49 = tpu.matmul %47, %48, %cst_26 {dimension_numbers = #tpu.dot_dimension_numbers<[1], [0], [0], [1], [0, 0, 1, 1], [], []>} : vector<32x64xbf16>, vector<64x64xbf16>, vector<32x64xf32> -> vector<32x64xf32>
    %50 = arith.addf %45, %49 : vector<32x64xf32>
    %c0_27 = arith.constant 0 : index
    %c0_28 = arith.constant 0 : index
    %51 = vector.load %arg5[%c0_27, %c0_28] : memref<1x64xf32, #tpu.memory_space<vmem>>, vector<1x64xf32>
    %52 = vector.broadcast %51 : vector<1x64xf32> to vector<32x64xf32>
    %53 = arith.addf %50, %52 : vector<32x64xf32>
    %54 = vector.shape_cast %53 : vector<32x64xf32> to vector<4x8x64xf32>
    %55 = arith.truncf %54 : vector<4x8x64xf32> to vector<4x8x64xbf16>
    %c0_29 = arith.constant 0 : index
    %c0_30 = arith.constant 0 : index
    %c0_31 = arith.constant 0 : index
    %c0_32 = arith.constant 0 : index
    %56 = vector.load %arg6[%c0_29, %c0_30, %c0_31, %c0_32] : memref<1x4x8x64xbf16, #tpu.memory_space<vmem>>, vector<1x4x8x64xbf16>
    %57 = vector.shape_cast %56 : vector<1x4x8x64xbf16> to vector<4x8x64xbf16>
    %58 = vector.shape_cast %55 : vector<4x8x64xbf16> to vector<1x4x8x64xbf16>
    tpu.vector_store %arg6[%c0_29, %c0_30, %c0_31, %c0_32], %58 {strides = array<i32>} : memref<1x4x8x64xbf16, #tpu.memory_space<vmem>>, vector<1x4x8x64xbf16>,
    return
  }
  func.func @transform_0(%arg0: i32, %arg1: i32) -> (i32, i32, i32, i32) {
    %c0_i32 = arith.constant 0 : i32
    %c0_i32_0 = arith.constant 0 : i32
    %c0_i32_1 = arith.constant 0 : i32
    return %arg0, %arg1, %c0_i32, %c0_i32_0 : i32, i32, i32, i32
  }
  func.func @transform_1(%arg0: i32, %arg1: i32) -> (i32, i32, i32, i32, i32) {
    %c0_i32 = arith.constant 0 : i32
    %c0_i32_0 = arith.constant 0 : i32
    %c0_i32_1 = arith.constant 0 : i32
    %c0_i32_2 = arith.constant 0 : i32
    return %arg0, %arg1, %c0_i32, %c0_i32_0, %c0_i32_1 : i32, i32, i32, i32, i32
  }
  func.func @transform_2(%arg0: i32, %arg1: i32) -> (i32, i32) {
    %c0_i32 = arith.constant 0 : i32
    %c0_i32_0 = arith.constant 0 : i32
    %c0_i32_1 = arith.constant 0 : i32
    return %c0_i32, %c0_i32_0 : i32, i32
  }
  func.func @transform_3(%arg0: i32, %arg1: i32) -> (i32, i32) {
    %c0_i32 = arith.constant 0 : i32
    %c0_i32_0 = arith.constant 0 : i32
    %c0_i32_1 = arith.constant 0 : i32
    return %c0_i32, %c0_i32_0 : i32, i32
  }
  func.func @transform_4(%arg0: i32, %arg1: i32) -> (i32, i32, i32, i32) {
    %c0_i32 = arith.constant 0 : i32
    %c0_i32_0 = arith.constant 0 : i32
    %c0_i32_1 = arith.constant 0 : i32
    return %arg0, %arg1, %c0_i32, %c0_i32_0 : i32, i32, i32, i32
  }
}

module attributes {stable_mosaic.version = 11 : i64} {
  func.func @_conv3x3_kernel(%arg0: i32, %arg1: i32, %arg2: memref<1x4x10x64xbf16, #tpu.memory_space<vmem>>, %arg3: memref<1x1x2x10x64xbf16, #tpu.memory_space<vmem>>, %arg4: memref<576x51xbf16, #tpu.memory_space<vmem>>, %arg5: memref<1x51xf32, #tpu.memory_space<vmem>>, %arg6: memref<1x4x8x48xf32, #tpu.memory_space<vmem>>, %arg7: memref<1x4x8x3xf32, #tpu.memory_space<vmem>>) attributes {dimension_semantics = [#tpu.dimension_semantics<parallel>, #tpu.dimension_semantics<parallel>], iteration_bounds = array<i64: 2, 2>, scalar_prefetch = 0 : i64, scratch_operands = 0 : i64, tpu.core_type = #tpu.core_type<tc>, window_params = [{transform_indices = @transform_0, window_bounds = array<i64: 1, 4, 10, 64>}, {transform_indices = @transform_1, window_bounds = array<i64: 1, 1, 2, 10, 64>}, {pipeline_mode = #tpu.pipeline_mode<synchronous>, transform_indices = @transform_2, window_bounds = array<i64: 576, 51>}, {pipeline_mode = #tpu.pipeline_mode<synchronous>, transform_indices = @transform_3, window_bounds = array<i64: 1, 51>}, {transform_indices = @transform_4, window_bounds = array<i64: 1, 4, 8, 48>}, {transform_indices = @transform_5, window_bounds = array<i64: 1, 4, 8, 3>}]} {
    %c0 = arith.constant 0 : index
    %c0_0 = arith.constant 0 : index
    %c0_1 = arith.constant 0 : index
    %c0_2 = arith.constant 0 : index
    %0 = vector.load %arg2[%c0, %c0_0, %c0_1, %c0_2] : memref<1x4x10x64xbf16, #tpu.memory_space<vmem>>, vector<1x4x10x64xbf16>
    %1 = vector.shape_cast %0 : vector<1x4x10x64xbf16> to vector<4x10x64xbf16>
    %c0_3 = arith.constant 0 : index
    %c0_4 = arith.constant 0 : index
    %c0_5 = arith.constant 0 : index
    %c0_6 = arith.constant 0 : index
    %c0_7 = arith.constant 0 : index
    %2 = vector.load %arg3[%c0_3, %c0_4, %c0_5, %c0_6, %c0_7] : memref<1x1x2x10x64xbf16, #tpu.memory_space<vmem>>, vector<1x1x2x10x64xbf16>
    %3 = vector.shape_cast %2 : vector<1x1x2x10x64xbf16> to vector<2x10x64xbf16>
    %4 = tpu.concatenate %1, %3 in 0 : vector<4x10x64xbf16>, vector<2x10x64xbf16> -> vector<6x10x64xbf16>
    %cst = arith.constant 0.000000e+00 : f32
    %5 = vector.broadcast %cst : f32 to vector<32x51xf32>
    %6 = vector.extract_strided_slice %4 {offsets = [0, 0, 0], sizes = [4, 8, 64], strides = [1, 1, 1]} : vector<6x10x64xbf16> to vector<4x8x64xbf16>
    %7 = vector.shape_cast %6 : vector<4x8x64xbf16> to vector<32x64xbf16>
    %c0_8 = arith.constant 0 : index
    %c0_9 = arith.constant 0 : index
    %8 = vector.load %arg4[%c0_8, %c0_9] : memref<576x51xbf16, #tpu.memory_space<vmem>>, vector<64x51xbf16>
    %cst_10 = arith.constant dense<0.000000e+00> : vector<32x51xf32>
    %9 = tpu.matmul %7, %8, %cst_10 {dimension_numbers = #tpu.dot_dimension_numbers<[1], [0], [0], [1], [0, 0, 1, 1], [], []>} : vector<32x64xbf16>, vector<64x51xbf16>, vector<32x51xf32> -> vector<32x51xf32>
    %10 = arith.addf %5, %9 : vector<32x51xf32>
    %11 = vector.extract_strided_slice %4 {offsets = [0, 1, 0], sizes = [4, 8, 64], strides = [1, 1, 1]} : vector<6x10x64xbf16> to vector<4x8x64xbf16>
    %12 = vector.shape_cast %11 : vector<4x8x64xbf16> to vector<32x64xbf16>
    %c64 = arith.constant 64 : index
    %c0_11 = arith.constant 0 : index
    %13 = vector.load %arg4[%c64, %c0_11] : memref<576x51xbf16, #tpu.memory_space<vmem>>, vector<64x51xbf16>
    %cst_12 = arith.constant dense<0.000000e+00> : vector<32x51xf32>
    %14 = tpu.matmul %12, %13, %cst_12 {dimension_numbers = #tpu.dot_dimension_numbers<[1], [0], [0], [1], [0, 0, 1, 1], [], []>} : vector<32x64xbf16>, vector<64x51xbf16>, vector<32x51xf32> -> vector<32x51xf32>
    %15 = arith.addf %10, %14 : vector<32x51xf32>
    %16 = vector.extract_strided_slice %4 {offsets = [0, 2, 0], sizes = [4, 8, 64], strides = [1, 1, 1]} : vector<6x10x64xbf16> to vector<4x8x64xbf16>
    %17 = vector.shape_cast %16 : vector<4x8x64xbf16> to vector<32x64xbf16>
    %c128 = arith.constant 128 : index
    %c0_13 = arith.constant 0 : index
    %18 = vector.load %arg4[%c128, %c0_13] : memref<576x51xbf16, #tpu.memory_space<vmem>>, vector<64x51xbf16>
    %cst_14 = arith.constant dense<0.000000e+00> : vector<32x51xf32>
    %19 = tpu.matmul %17, %18, %cst_14 {dimension_numbers = #tpu.dot_dimension_numbers<[1], [0], [0], [1], [0, 0, 1, 1], [], []>} : vector<32x64xbf16>, vector<64x51xbf16>, vector<32x51xf32> -> vector<32x51xf32>
    %20 = arith.addf %15, %19 : vector<32x51xf32>
    %21 = vector.extract_strided_slice %4 {offsets = [1, 0, 0], sizes = [4, 8, 64], strides = [1, 1, 1]} : vector<6x10x64xbf16> to vector<4x8x64xbf16>
    %22 = vector.shape_cast %21 : vector<4x8x64xbf16> to vector<32x64xbf16>
    %c192 = arith.constant 192 : index
    %c0_15 = arith.constant 0 : index
    %23 = vector.load %arg4[%c192, %c0_15] : memref<576x51xbf16, #tpu.memory_space<vmem>>, vector<64x51xbf16>
    %cst_16 = arith.constant dense<0.000000e+00> : vector<32x51xf32>
    %24 = tpu.matmul %22, %23, %cst_16 {dimension_numbers = #tpu.dot_dimension_numbers<[1], [0], [0], [1], [0, 0, 1, 1], [], []>} : vector<32x64xbf16>, vector<64x51xbf16>, vector<32x51xf32> -> vector<32x51xf32>
    %25 = arith.addf %20, %24 : vector<32x51xf32>
    %26 = vector.extract_strided_slice %4 {offsets = [1, 1, 0], sizes = [4, 8, 64], strides = [1, 1, 1]} : vector<6x10x64xbf16> to vector<4x8x64xbf16>
    %27 = vector.shape_cast %26 : vector<4x8x64xbf16> to vector<32x64xbf16>
    %c256 = arith.constant 256 : index
    %c0_17 = arith.constant 0 : index
    %28 = vector.load %arg4[%c256, %c0_17] : memref<576x51xbf16, #tpu.memory_space<vmem>>, vector<64x51xbf16>
    %cst_18 = arith.constant dense<0.000000e+00> : vector<32x51xf32>
    %29 = tpu.matmul %27, %28, %cst_18 {dimension_numbers = #tpu.dot_dimension_numbers<[1], [0], [0], [1], [0, 0, 1, 1], [], []>} : vector<32x64xbf16>, vector<64x51xbf16>, vector<32x51xf32> -> vector<32x51xf32>
    %30 = arith.addf %25, %29 : vector<32x51xf32>
    %31 = vector.extract_strided_slice %4 {offsets = [1, 2, 0], sizes = [4, 8, 64], strides = [1, 1, 1]} : vector<6x10x64xbf16> to vector<4x8x64xbf16>
    %32 = vector.shape_cast %31 : vector<4x8x64xbf16> to vector<32x64xbf16>
    %c320 = arith.constant 320 : index
    %c0_19 = arith.constant 0 : index
    %33 = vector.load %arg4[%c320, %c0_19] : memref<576x51xbf16, #tpu.memory_space<vmem>>, vector<64x51xbf16>
    %cst_20 = arith.constant dense<0.000000e+00> : vector<32x51xf32>
    %34 = tpu.matmul %32, %33, %cst_20 {dimension_numbers = #tpu.dot_dimension_numbers<[1], [0], [0], [1], [0, 0, 1, 1], [], []>} : vector<32x64xbf16>, vector<64x51xbf16>, vector<32x51xf32> -> vector<32x51xf32>
    %35 = arith.addf %30, %34 : vector<32x51xf32>
    %36 = vector.extract_strided_slice %4 {offsets = [2, 0, 0], sizes = [4, 8, 64], strides = [1, 1, 1]} : vector<6x10x64xbf16> to vector<4x8x64xbf16>
    %37 = vector.shape_cast %36 : vector<4x8x64xbf16> to vector<32x64xbf16>
    %c384 = arith.constant 384 : index
    %c0_21 = arith.constant 0 : index
    %38 = vector.load %arg4[%c384, %c0_21] : memref<576x51xbf16, #tpu.memory_space<vmem>>, vector<64x51xbf16>
    %cst_22 = arith.constant dense<0.000000e+00> : vector<32x51xf32>
    %39 = tpu.matmul %37, %38, %cst_22 {dimension_numbers = #tpu.dot_dimension_numbers<[1], [0], [0], [1], [0, 0, 1, 1], [], []>} : vector<32x64xbf16>, vector<64x51xbf16>, vector<32x51xf32> -> vector<32x51xf32>
    %40 = arith.addf %35, %39 : vector<32x51xf32>
    %41 = vector.extract_strided_slice %4 {offsets = [2, 1, 0], sizes = [4, 8, 64], strides = [1, 1, 1]} : vector<6x10x64xbf16> to vector<4x8x64xbf16>
    %42 = vector.shape_cast %41 : vector<4x8x64xbf16> to vector<32x64xbf16>
    %c448 = arith.constant 448 : index
    %c0_23 = arith.constant 0 : index
    %43 = vector.load %arg4[%c448, %c0_23] : memref<576x51xbf16, #tpu.memory_space<vmem>>, vector<64x51xbf16>
    %cst_24 = arith.constant dense<0.000000e+00> : vector<32x51xf32>
    %44 = tpu.matmul %42, %43, %cst_24 {dimension_numbers = #tpu.dot_dimension_numbers<[1], [0], [0], [1], [0, 0, 1, 1], [], []>} : vector<32x64xbf16>, vector<64x51xbf16>, vector<32x51xf32> -> vector<32x51xf32>
    %45 = arith.addf %40, %44 : vector<32x51xf32>
    %46 = vector.extract_strided_slice %4 {offsets = [2, 2, 0], sizes = [4, 8, 64], strides = [1, 1, 1]} : vector<6x10x64xbf16> to vector<4x8x64xbf16>
    %47 = vector.shape_cast %46 : vector<4x8x64xbf16> to vector<32x64xbf16>
    %c512 = arith.constant 512 : index
    %c0_25 = arith.constant 0 : index
    %48 = vector.load %arg4[%c512, %c0_25] : memref<576x51xbf16, #tpu.memory_space<vmem>>, vector<64x51xbf16>
    %cst_26 = arith.constant dense<0.000000e+00> : vector<32x51xf32>
    %49 = tpu.matmul %47, %48, %cst_26 {dimension_numbers = #tpu.dot_dimension_numbers<[1], [0], [0], [1], [0, 0, 1, 1], [], []>} : vector<32x64xbf16>, vector<64x51xbf16>, vector<32x51xf32> -> vector<32x51xf32>
    %50 = arith.addf %45, %49 : vector<32x51xf32>
    %c0_27 = arith.constant 0 : index
    %c0_28 = arith.constant 0 : index
    %51 = vector.load %arg5[%c0_27, %c0_28] : memref<1x51xf32, #tpu.memory_space<vmem>>, vector<1x51xf32>
    %52 = vector.broadcast %51 : vector<1x51xf32> to vector<32x51xf32>
    %53 = arith.addf %50, %52 : vector<32x51xf32>
    %54 = vector.extract_strided_slice %53 {offsets = [0, 0], sizes = [32, 48], strides = [1, 1]} : vector<32x51xf32> to vector<32x48xf32>
    %55 = vector.shape_cast %54 : vector<32x48xf32> to vector<4x8x48xf32>
    %c0_29 = arith.constant 0 : index
    %c0_30 = arith.constant 0 : index
    %c0_31 = arith.constant 0 : index
    %c0_32 = arith.constant 0 : index
    %56 = vector.load %arg6[%c0_29, %c0_30, %c0_31, %c0_32] : memref<1x4x8x48xf32, #tpu.memory_space<vmem>>, vector<1x4x8x48xf32>
    %57 = vector.shape_cast %56 : vector<1x4x8x48xf32> to vector<4x8x48xf32>
    %58 = vector.shape_cast %55 : vector<4x8x48xf32> to vector<1x4x8x48xf32>
    tpu.vector_store %arg6[%c0_29, %c0_30, %c0_31, %c0_32], %58 {strides = array<i32>} : memref<1x4x8x48xf32, #tpu.memory_space<vmem>>, vector<1x4x8x48xf32>,
    %59 = vector.extract_strided_slice %53 {offsets = [0, 48], sizes = [32, 3], strides = [1, 1]} : vector<32x51xf32> to vector<32x3xf32>
    %60 = vector.shape_cast %59 : vector<32x3xf32> to vector<4x8x3xf32>
    %c0_33 = arith.constant 0 : index
    %c0_34 = arith.constant 0 : index
    %c0_35 = arith.constant 0 : index
    %c0_36 = arith.constant 0 : index
    %61 = vector.load %arg7[%c0_33, %c0_34, %c0_35, %c0_36] : memref<1x4x8x3xf32, #tpu.memory_space<vmem>>, vector<1x4x8x3xf32>
    %62 = vector.shape_cast %61 : vector<1x4x8x3xf32> to vector<4x8x3xf32>
    %63 = vector.shape_cast %60 : vector<4x8x3xf32> to vector<1x4x8x3xf32>
    tpu.vector_store %arg7[%c0_33, %c0_34, %c0_35, %c0_36], %63 {strides = array<i32>} : memref<1x4x8x3xf32, #tpu.memory_space<vmem>>, vector<1x4x8x3xf32>,
    return
  }
  func.func @transform_0(%arg0: i32, %arg1: i32) -> (i32, i32, i32, i32) {
    %c0_i32 = arith.constant 0 : i32
    %c0_i32_0 = arith.constant 0 : i32
    %c0_i32_1 = arith.constant 0 : i32
    return %arg0, %arg1, %c0_i32, %c0_i32_0 : i32, i32, i32, i32
  }
  func.func @transform_1(%arg0: i32, %arg1: i32) -> (i32, i32, i32, i32, i32) {
    %c0_i32 = arith.constant 0 : i32
    %c0_i32_0 = arith.constant 0 : i32
    %c0_i32_1 = arith.constant 0 : i32
    %c0_i32_2 = arith.constant 0 : i32
    return %arg0, %arg1, %c0_i32, %c0_i32_0, %c0_i32_1 : i32, i32, i32, i32, i32
  }
  func.func @transform_2(%arg0: i32, %arg1: i32) -> (i32, i32) {
    %c0_i32 = arith.constant 0 : i32
    %c0_i32_0 = arith.constant 0 : i32
    %c0_i32_1 = arith.constant 0 : i32
    return %c0_i32, %c0_i32_0 : i32, i32
  }
  func.func @transform_3(%arg0: i32, %arg1: i32) -> (i32, i32) {
    %c0_i32 = arith.constant 0 : i32
    %c0_i32_0 = arith.constant 0 : i32
    %c0_i32_1 = arith.constant 0 : i32
    return %c0_i32, %c0_i32_0 : i32, i32
  }
  func.func @transform_4(%arg0: i32, %arg1: i32) -> (i32, i32, i32, i32) {
    %c0_i32 = arith.constant 0 : i32
    %c0_i32_0 = arith.constant 0 : i32
    %c0_i32_1 = arith.constant 0 : i32
    return %arg0, %arg1, %c0_i32, %c0_i32_0 : i32, i32, i32, i32
  }
  func.func @transform_5(%arg0: i32, %arg1: i32) -> (i32, i32, i32, i32) {
    %c0_i32 = arith.constant 0 : i32
    %c0_i32_0 = arith.constant 0 : i32
    %c0_i32_1 = arith.constant 0 : i32
    return %arg0, %arg1, %c0_i32, %c0_i32_0 : i32, i32, i32, i32
  }
}

</mosaic_0001>

<bundles_post_ra>
// kernel: _pfin_forward_impl.6
= control target key start
LH: loop header
LB: loop body
LE: loop exit
PB: predicated region body
PF: predicated region fallthrough
CT: control target
= control target key end

     0   :  { %v269_v0 = vmov 0.0|0.0   ;;  %vm270_vm0 = vmmov 0   ;;  %v271_v4 = vmov 0.0   ;;  %vm36_vm1 = vcmask 523264   ;;  %s341_s1 = inlined_call_operand.vmem [shape: f32[64,4], index: 1, kind: input, shape index: {}]   ;;  %s342_s0 = inlined_call_operand.vmem [shape: f32[2,64], index: 0, kind: input, shape index: {}]   ;;  %s343_s3 = inlined_call_operand.vmem [shape: f32[4,64], index: 3, kind: input, shape index: {}]   ;;  %s344_s2 = inlined_call_operand.vmem [shape: f32[1,4], index: 2, kind: input, shape index: {}]   ;;  %s345_s4 = inlined_call_operand.vmem [shape: f32[1,64], index: 4, kind: input, shape index: {}]   ;;  %s346_s5 = inlined_call_operand.vmem [shape: f32[2,64], index: 5, kind: output, shape index: {}]  }
   0x1   :  { %250 = vmatprep.subr.bf16.mxu0 %v269_v0  ;;  %v21_v1 = vld [vmem:[%s341_s1] sm:$0xff]  ;;  %v22_v2 = vld [vmem:[%s341_s1 + $0x8] sm:$0xff]  ;;  %v23_v3 = vld [vmem:[%s341_s1 + $0x10] sm:$0xff]  ;;  %242 = vmatprep.mubr.msk.f32.mxu0 %vm270_vm0, %v271_v4  ;;  %vm123_vm2 = vcmask 1043456   ;;  %vm119_vm3 = vcmask 31744   ;;  %vm203_vm4 = vcmask 517120  }
   0x2   :  { %v251_v5 = vpack.c.bf16 %v22_v2, %v21_v1  ;;  %v24_v6 = vld [vmem:[%s341_s1 + $0x18] sm:$0xff]  ;;  %245 = vmatprep.subr.mxu1 %v271_v4  ;;  %247 = vmatprep.mubr.msk.f32.mxu1 %vm270_vm0, %v271_v4  ;;  %v25_v8 = vld [vmem:[%s341_s1 + $0x20] sm:$0xff]  ;;  %v26_v9 = vld [vmem:[%s341_s1 + $0x28] sm:$0xff] }
   0x3   :  { %v254_v7 = vpack.c.bf16 %v24_v6, %v23_v3  ;;  %v257_v10 = vpack.c.bf16 %v26_v9, %v25_v8  ;;  %v27_v11 = vld [vmem:[%s341_s1 + $0x30] sm:$0xff]  ;;  %v28_v12 = vld [vmem:[%s341_s1 + $0x38] sm:$0xff]  ;;  %v20_v14 = vld [vmem:[%s342_s0] sm:$0x3] }
   0x4   :  { %252 = vmatpush3.bf16.msra.mxu0 %v251_v5  ;;  %v260_v13 = vpack.c.bf16 %v28_v12, %v27_v11  ;;  %v111_v15 = vld [vmem:[%s343_s3] sm:$0xf] }
   0x5   :  { %253 = vmatprep.subr.bf16.mxu0 %v269_v0  ;;  %246 = vmatpush3.msk.msra.mxu1 %vm123_vm2, %v111_v15  ;;  %v209_v16 = vld [vmem:[%s344_s2] ss:$0 sm:$0xff] }
   0x6   :  { %v211_v21 = vld [vmem:[%s345_s4] ss:$0 sm:$0xff] }
   0x8   :  { %255 = vmatpush3.bf16.msra.mxu0 %v254_v7 }
   0x9   :  { %256 = vmatprep.subr.bf16.mxu0 %v269_v0 }
   0xc   :  { %258 = vmatpush3.bf16.msra.mxu0 %v257_v10 }
   0xd   :  { %259 = vmatprep.subr.bf16.mxu0 %v269_v0 }
  0x10   :  { %261 = vmatpush3.bf16.msra.mxu0 %v260_v13 }
  0x13   :  { %243 = vmatmul.mubr.msk.f32.vlgmr.msra.gmra.mrb[0].mxu0 %vm36_vm1, %v20_v14 }
  0xe6   :  { %v106_v17 = vpop.f32.mrb[0].mxu0 }
  0xe7   :  { %v107_v18 = vadd.f32 %v209_v16, %v106_v17  ;;  %v244_v19 = vpop.f32.mrb[1].mxu0 }
  0xe9   :  { %v110_v20 = vmax.f32 %v107_v18, 0.0 }
  0xeb   :  { %248 = vmatmul.mubr.msk.f32.vlgmr.msra.gmra.mrb[0].mxu1 %vm119_vm3, %v110_v20 }
 0x1be   :  { %v193_v22 = vpop.f32.mrb[0].mxu1 }
 0x1bf   :  { %v194_v23 = vadd.f32 %v211_v21, %v193_v22  ;;  %v249_v24 = vpop.f32.mrb[1].mxu1 }
 0x1c1   :  { %v214_v25 = vmul.f32 -1.442695, %v194_v23 }
 0x1c3   :  { %265 = vpow2.f32 %v214_v25 }
 0x1cd   :  { %v266_v26 = vpop.eup %265 }
 0x1ce   :  { %v200_v27 = vadd.f32 1.0, %v266_v26 }
 0x1d0   :  { %267 = vrcp.f32 %v200_v27 }
 0x1da   :  { %v268_v28 = vpop.eup %267 }
 0x1db   :  { %204 = vst.msk [vmem:[%s346_s5] sm:$0x3] %vm203_vm4, %v268_v28 }

// kernel: _pfin_forward_impl.5
= control target key start
LH: loop header
LB: loop body
LE: loop exit
PB: predicated region body
PF: predicated region fallthrough
CT: control target
= control target key end

     0   :  { %s1149_s18 = smov 0   ;;  %s1151_s19 = smov 0   ;;  %s1390_s0 = inlined_call_operand.vmem [shape: bf16[2,256,27], index: 0, kind: input, shape index: {}]   ;;  %s1391_s1 = inlined_call_operand.vmem [shape: bf16[27,76], index: 1, kind: input, shape index: {}]   ;;  %s1392_s2 = inlined_call_operand.vmem [shape: f32[1,76], index: 2, kind: input, shape index: {}]   ;;  %s1393_s3 = inlined_call_operand.vmem [shape: bf16[2,16,16,64], index: 3, kind: output, shape index: {0}]   ;;  %s1394_s4 = inlined_call_operand.vmem [shape: f32[2,16,16,12], index: 4, kind: output, shape index: {1}]   ;;  %s1395_s5 = inlined_call_operand.vmem [shape: f32[2,2,8,64], index: 5, kind: output, shape index: {2}]  }
   0x1   :  { %s1153_s20 = smov 0   ;;  %s1155_s21 = smov 0  }
   0x2   :  { %s1157_s22 = smov 0  }
   0x3 LB: > { %s25_s23 = sadd.s32 1, %s1107_s20  ;;  %s28_s24 = sadd.s32 1, %s1111_s21  ;;  %s1115_s22 = sphi %s1157_s22, %s16_s22   ;;  %s1111_s21 = sphi %s1155_s21, %s1399_s21   ;;  %s1107_s20 = sphi %s1153_s20, %s1398_s20   ;;  %s1103_s19 = sphi %s1151_s19, %s1397_s19   ;;  %s1099_s18 = sphi %s1149_s18, %s1396_s18  }
   0x4   : > { %p26_p0 = scmp.ge.s32.totalorder %s25_s23, 2  ;;  %p924_p1 = scmp.ge.s32.totalorder %s1115_s22, 1 }
   0x5   : > { %p217_p2 = scmp.lt.s32.totalorder %s1115_s22, 5 }
   0x6   : > { %s1401_s23 = smov (%p26_p0, %s25_s23), 0  ;;  %s1403_s24 = smov (!%p26_p0, %s28_s24), %s1111_s21 }
   0x7   : > { %p218_p3 = pnand %p924_p1, %p217_p2  ;;  %p30_p4 = scmp.ge.s32.totalorder %s1403_s24, 2 }
   0x8   : > { %v1067_v0 = vld [vmem:[%s1391_s1] sm:$0xff] (!%p218_p3)   ;;  %vm416_vm0 = vcmask (!%p218_p3), 1044480   ;;  %v1068_v1 = vld [vmem:[%s1391_s1 + $0x8] sm:$0x3f] (!%p218_p3)   ;;  %vm417_vm1 = vcmask (!%p218_p3), 1045504   ;;  %s925_s29 = sshll.u32 (!%p218_p3), %s1099_s18, 4 }
   0x9   : > { %s1405_s24 = smov (%p30_p4, %s1403_s24), 0  ;;  %221 = sbr.rel (%p218_p3) target bundleno = 382 (0x17e), region = 32 }
   0xa   : > { %1001 = vmatprep.subr.bf16.mxu0 (!%p218_p3), %v1067_v0  ;;  %1021 = vmatprep.subr.bf16.mxu1 (!%p218_p3), %v1067_v0  ;;  %p273_p5 = scmp.lt.s32.totalorder (!%p218_p3), %s1103_s19, 1  ;;  %v1117_v2 = vmov (!%p218_p3), 65535   ;;  %p275_p6 = scmp.lt.s32.totalorder (!%p218_p3), %s925_s29, 31  ;;  %vm391_vm2 = vcmask (!%p218_p3), 220160   ;;  %v1212_v14 = vld [vmem:[%s1392_s2] ss:$0 sm:$0xff] (!%p218_p3) }
   0xb   : > { %1002 = vmatpush3.bf16.msra.mxu0 (!%p218_p3), %v1067_v0  ;;  %1023 = vmatpush3.bf16.msra.mxu1 (!%p218_p3), %v1067_v0  ;;  %v418_v3 = vsel (!%p218_p3), %vm416_vm0, 4294967295, %v1117_v2  ;;  %s928_s11 = sshll.u32 (!%p218_p3), %s1099_s18, 3  ;;  %vm623_vm3 = vcmask (!%p218_p3), 519168   ;;  %s1118_s27 = smov (!%p218_p3), 64   ;;  %vm520_vm4 = vcmask (!%p218_p3), 523264   ;;  %vm704_vm5 = vcmask (!%p218_p3), 97280  }
   0xc   : > { %v419_v4 = vsel (!%p218_p3), %vm417_vm1, %v418_v3, 0  ;;  %p285_p7 = scmp.lt.s32.totalorder (!%p218_p3), %s928_s11, 15  ;;  %p306_p8 = scmp.lt.s32.totalorder (!%p218_p3), %s1099_s18, 1 }
   0xd   : > { %v421_v5 = vand.u32 (!%p218_p3), %v1068_v1, %v419_v4 }
   0xf   : > { %1003 = vmatprep.subr.bf16.mxu0 (!%p218_p3), %v421_v5  ;;  %1022 = vmatprep.subr.bf16.mxu1 (!%p218_p3), %v421_v5 }
  0x10   : > { %s1407_s19 = smov (!%p273_p5, %s1103_s19), 1  ;;  %s1409_s29 = smov (!%p275_p6, %s925_s29), 31  ;;  %1004 = vmatpush3.bf16.msra.mxu0 %v421_v5  ;;  %1024 = vmatpush3.bf16.msra.mxu1 %v421_v5 }
  0x11   : > { %s926_s30 = sshll.u32 %s1407_s19, 5  ;;  %s1411_s11 = smov (!%p285_p7, %s928_s11), 15 }
  0x12   : > { %s278_s6 = sadd.s32 %s926_s30, %s1409_s29  ;;  %s929_s12 = sshll.u32 %s1411_s11, 1 }
  0x13   : > { %s927_s7 = sshll.u32 %s278_s6, 2  ;;  %s1207_s13 = sadd.s32 %s929_s12, %s926_s30 }
  0x14   : > { %s280_s10 = scalar_lea.vmem %s1390_s0, %s927_s7  ;;  %s931_s16 = sshll.u32 %s1207_s13, 2 }
  0x15   : > { %v1069_v6 = vld [vmem:[%s280_s10] sm:$0xff]   ;;  %v1071_v8 = vld [vmem:[%s280_s10 + $0x8] sm:$0xff]   ;;  %v1073_v10 = vld [vmem:[%s280_s10 + $0x10] sm:$0xff]   ;;  %s1219_s26 = scalar_lea.vmem %s1393_s3, %s931_s16  ;;  %s1413_s18 = smov (!%p306_p8, %s1099_s18), 1 }
  0x16   : > { %v1070_v7 = vld [vmem:[%s280_s10 + $0x20] sm:$0xff]   ;;  %1005 = vmatprep.mubr.msk.bf16.mxu0 %vm391_vm2, %v1069_v6  ;;  %v1072_v9 = vld [vmem:[%s280_s10 + $0x28] sm:$0xff]   ;;  %v1075_v11 = vld [vmem:[%s280_s10 + $0x30] sm:$0xff]   ;;  %s936_s28 = sshll.u32 %s1407_s19, 1  ;;  %s935_s9 = sshll.u32 %s1207_s13, 3 }
  0x17   : > { %1013 = vmatprep.mubr.msk.bf16.mxu1 %vm391_vm2, %v1070_v7  ;;  %1006 = vmatmul.mubr.msk.bf16.vlgmr.msra.gmra.mrb[0].mxu0 %vm391_vm2, %v1071_v8  ;;  %v1074_v12 = vld [vmem:[%s280_s10 + $0x18] sm:$0xff]   ;;  %s309_s29 = sadd.s32 %s936_s28, %s1413_s18  ;;  %s1341_s12 = scalar_lea.vmem %s1394_s4, %s935_s9 }
  0x18   : > { %1014 = vmatmul.mubr.msk.bf16.vlgmr.msra.gmra.mrb[0].mxu1 %vm391_vm2, %v1072_v9  ;;  %1009 = vmatprep.mubr.msk.bf16.mxu0 %vm391_vm2, %v1073_v10  ;;  %v1076_v13 = vld [vmem:[%s280_s10 + $0x38] sm:$0xff]   ;;  %s937_s30 = sshll.u32 %s309_s29, 3 }
  0x19   : > { %1017 = vmatprep.mubr.msk.bf16.mxu1 %vm391_vm2, %v1075_v11  ;;  %s311_s8 = scalar_lea.vmem %s1395_s5, %s937_s30 }
  0x1f   : > { %1010 = vmatmul.mubr.msk.bf16.gmra.mrb[4].mxu0 %vm391_vm2, %v1074_v12 }
  0x20   : > { %1018 = vmatmul.mubr.msk.bf16.gmra.mrb[4].mxu1 %vm391_vm2, %v1076_v13 }
  0xea   : > { %v1007_v15 = vpop.f32.mrb[0].mxu0 }
  0xeb   : > { %v466_v16 = vadd.f32 %v1007_v15, %v1212_v14  ;;  %v1015_v17 = vpop.f32.mrb[0].mxu1  ;;  %v457_v18 = vpop.f32.mrb[1].mxu0 }
  0xec   : > { %v1222_v19 = vadd.f32 %v1015_v17, %v1212_v14  ;;  %v458_v20 = vadd.f32 %v1212_v14, %v457_v18  ;;  %v489_v21 = vpop.f32.mrb[1].mxu1  ;;  %v1008_v22 = vpop.f32.mrb[2].mxu0 }
  0xed   : > { %v977_v23 = vpack.c.bf16 %v466_v16, %v466_v16  ;;  %v1226_v24 = vadd.f32 %v1212_v14, %v489_v21  ;;  %v469_v25 = vadd.f32 %v1008_v22, %v1212_v14  ;;  %v1016_v26 = vpop.f32.mrb[2].mxu1  ;;  %660 = vrot.lane.b32.xlu1 %v466_v16, %s1118_s27  ;;  %v460_v27 = vpop.f32.mrb[3].mxu0  ;;  %v524_v50 = vsel %vm520_vm4, %v466_v16, 0.0 }
  0xee   : > { %v985_v28 = vpack.c.bf16 %v1222_v19, %v1222_v19  ;;  %v975_v29 = vpack.c.bf16 %v458_v20, %v458_v20  ;;  %676 = vrot.lane.b32.xlu0 %v1222_v19, %s1118_s27  ;;  %v492_v30 = vpop.f32.mrb[3].mxu1  ;;  %v1243_v33 = vadd.f32 %v1016_v26, %v1212_v14  ;;  %v461_v35 = vadd.f32 %v1212_v14, %v460_v27 }
  0xef   : > { %626 = vst.msk [vmem:[%s1219_s26 + $0x8] sm:$0xf] %vm623_vm3, %v977_v23  ;;  %v983_v31 = vpack.c.bf16 %v1226_v24, %v1226_v24  ;;  %v978_v32 = vpack.c.bf16 %v469_v25, %v469_v25  ;;  %v1246_v34 = vadd.f32 %v1212_v14, %v492_v30  ;;  %v521_v39 = vsel %vm520_vm4, %v458_v20, 0.0 }
  0xf0   : > { %634 = vst.msk [vmem:[%s1219_s26 + $0x28] sm:$0xf] %vm623_vm3, %v985_v28  ;;  %624 = vst.msk [vmem:[%s1219_s26] sm:$0xf] %vm623_vm3, %v975_v29  ;;  %v986_v36 = vpack.c.bf16 %v1243_v33, %v1243_v33  ;;  %v522_v40 = vsel %vm520_vm4, %v461_v35, 0.0  ;;  %v976_v41 = vpack.c.bf16 %v461_v35, %v461_v35  ;;  %v526_v60 = vsel %vm520_vm4, %v469_v25, 0.0 }
  0xf1   : > { %632 = vst.msk [vmem:[%s1219_s26 + $0x20] sm:$0xf] %vm623_vm3, %v983_v31  ;;  %627 = vst.msk [vmem:[%s1219_s26 + $0xc] sm:$0xf] %vm623_vm3, %v978_v32  ;;  %662 = vrot.lane.b32.xlu1 %v469_v25, %s1118_s27  ;;  %v984_v37 = vpack.c.bf16 %v1246_v34, %v1246_v34  ;;  %v523_v45 = vadd.f32 %v522_v40, %v521_v39  ;;  %v538_v16 = vsel %vm520_vm4, %v1246_v34, 0.0  ;;  %v540_v18 = vsel %vm520_vm4, %v1222_v19, 0.0 }
  0xf2   : > { %656 = vrot.lane.b32.xlu0 %v458_v20, %s1118_s27  ;;  %v1011_v38 = vpop.f32.mrb[4].mxu0  ;;  %635 = vst.msk [vmem:[%s1219_s26 + $0x2c] sm:$0xf] %vm623_vm3, %v986_v36  ;;  %625 = vst.msk [vmem:[%s1219_s26 + $0x4] sm:$0xf] %vm623_vm3, %v976_v41  ;;  %v542_v21 = vsel %vm520_vm4, %v1243_v33, 0.0 }
  0xf3   : > { %v482_v42 = vadd.f32 %v1011_v38, %v1212_v14  ;;  %v473_v43 = vpop.f32.mrb[5].mxu0  ;;  %v1019_v44 = vpop.f32.mrb[4].mxu1  ;;  %633 = vst.msk [vmem:[%s1219_s26 + $0x24] sm:$0xf] %vm623_vm3, %v984_v37  ;;  %v525_v56 = vadd.f32 %v524_v50, %v523_v45 }
  0xf4   : > { %v474_v46 = vadd.f32 %v1212_v14, %v473_v43  ;;  %v1012_v47 = vpop.f32.mrb[6].mxu0  ;;  %v1268_v48 = vadd.f32 %v1019_v44, %v1212_v14  ;;  %v505_v49 = vpop.f32.mrb[5].mxu1 }
  0xf5   : > { %v981_v51 = vpack.c.bf16 %v482_v42, %v482_v42  ;;  %v485_v52 = vadd.f32 %v1012_v47, %v1212_v14  ;;  %678 = vrot.lane.b32.xlu1 %v1243_v33, %s1118_s27  ;;  %v476_v53 = vpop.f32.mrb[7].mxu0  ;;  %v506_v54 = vadd.f32 %v1212_v14, %v505_v49  ;;  %v1020_v55 = vpop.f32.mrb[6].mxu1  ;;  %v527_v0 = vadd.f32 %v526_v60, %v525_v56 }
  0xf6   : > { %v979_v57 = vpack.c.bf16 %v474_v46, %v474_v46  ;;  %v477_v58 = vadd.f32 %v1212_v14, %v476_v53  ;;  %672 = vrot.lane.b32.xlu0 %v1226_v24, %s1118_s27  ;;  %v508_v59 = vpop.f32.mrb[7].mxu1  ;;  %v528_v61 = vsel %vm520_vm4, %v474_v46, 0.0  ;;  %v989_v63 = vpack.c.bf16 %v1268_v48, %v1268_v48 }
  0xf7   : > { %630 = vst.msk [vmem:[%s1219_s26 + $0x18] sm:$0xf] %vm623_vm3, %v981_v51  ;;  %v982_v62 = vpack.c.bf16 %v485_v52, %v485_v52  ;;  %v987_v3 = vpack.c.bf16 %v506_v54, %v506_v54  ;;  %v517_v4 = vadd.f32 %v1020_v55, %v1212_v14  ;;  %v509_v5 = vadd.f32 %v1212_v14, %v508_v59 }
  0xf8   : > { %628 = vst.msk [vmem:[%s1219_s26 + $0x10] sm:$0xf] %vm623_vm3, %v979_v57  ;;  %v980_v1 = vpack.c.bf16 %v477_v58, %v477_v58  ;;  %v530_v2 = vsel %vm520_vm4, %v477_v58, 0.0  ;;  %638 = vst.msk [vmem:[%s1219_s26 + $0x38] sm:$0xf] %vm623_vm3, %v989_v63  ;;  %v529_v6 = vadd.f32 %v528_v61, %v527_v0  ;;  %v532_v7 = vsel %vm520_vm4, %v482_v42, 0.0 }
  0xf9   : > { %631 = vst.msk [vmem:[%s1219_s26 + $0x1c] sm:$0xf] %vm623_vm3, %v982_v62  ;;  %674 = vrot.lane.b32.xlu1 %v1246_v34, %s1118_s27  ;;  %636 = vst.msk [vmem:[%s1219_s26 + $0x30] sm:$0xf] %vm623_vm3, %v987_v3  ;;  %v990_v8 = vpack.c.bf16 %v517_v4, %v517_v4  ;;  %v988_v9 = vpack.c.bf16 %v509_v5, %v509_v5  ;;  %v534_v11 = vsel %vm520_vm4, %v485_v52, 0.0  ;;  %v536_v14 = vsel %vm520_vm4, %v1226_v24, 0.0 }
  0xfa   : > { %629 = vst.msk [vmem:[%s1219_s26 + $0x14] sm:$0xf] %vm623_vm3, %v980_v1  ;;  %658 = vrot.lane.b32.xlu0 %v461_v35, %s1118_s27  ;;  %v531_v10 = vadd.f32 %v530_v2, %v529_v6  ;;  %v544_v23 = vsel %vm520_vm4, %v506_v54, 0.0  ;;  %v546_v19 = vsel %vm520_vm4, %v509_v5, 0.0  ;;  %v548_v26 = vsel %vm520_vm4, %v1268_v48, 0.0 }
  0xfb   : > { %639 = vst.msk [vmem:[%s1219_s26 + $0x3c] sm:$0xf] %vm623_vm3, %v990_v8  ;;  %637 = vst.msk [vmem:[%s1219_s26 + $0x34] sm:$0xf] %vm623_vm3, %v988_v9  ;;  %v550_v28 = vsel %vm520_vm4, %v517_v4, 0.0 }
  0xfc   : > { %v533_v12 = vadd.f32 %v532_v7, %v531_v10 }
  0xfd   : > { %670 = vrot.lane.b32.xlu1 %v485_v52, %s1118_s27 }
  0xfe   : > { %668 = vrot.lane.b32.xlu0 %v482_v42, %s1118_s27  ;;  %v535_v13 = vadd.f32 %v534_v11, %v533_v12 }
 0x100   : > { %v537_v15 = vadd.f32 %v536_v14, %v535_v13 }
 0x101   : > { %666 = vrot.lane.b32.xlu1 %v477_v58, %s1118_s27 }
 0x102   : > { %664 = vrot.lane.b32.xlu0 %v474_v46, %s1118_s27  ;;  %v539_v17 = vadd.f32 %v538_v16, %v537_v15 }
 0x104   : > { %v541_v20 = vadd.f32 %v540_v18, %v539_v17 }
 0x105   : > { %682 = vrot.lane.b32.xlu1 %v509_v5, %s1118_s27 }
 0x106   : > { %680 = vrot.lane.b32.xlu0 %v506_v54, %s1118_s27  ;;  %v543_v22 = vadd.f32 %v542_v21, %v541_v20 }
 0x108   : > { %v545_v24 = vadd.f32 %v544_v23, %v543_v22 }
 0x109   : > { %686 = vrot.lane.b32.xlu1 %v517_v4, %s1118_s27 }
 0x10a   : > { %684 = vrot.lane.b32.xlu0 %v1268_v48, %s1118_s27  ;;  %v547_v25 = vadd.f32 %v546_v19, %v545_v24 }
 0x10c   : > { %v549_v27 = vadd.f32 %v548_v26, %v547_v25 }
 0x10e   : > { %v551_v29 = vadd.f32 %v550_v28, %v549_v27 }
 0x110   : > { %v552_v30 = vrot.slane %v551_v29, 4 }
 0x112   : > { %v553_v31 = vadd.f32 %v552_v30, %v551_v29 }
 0x114   : > { %v554_v32 = vrot.slane %v553_v31, 2 }
 0x116   : > { %v555_v33 = vadd.f32 %v554_v32, %v553_v31 }
 0x118   : > { %v556_v34 = vrot.slane %v555_v33, 1 }
 0x11a   : > { %v557_v35 = vadd.f32 %v556_v34, %v555_v33 }
 0x11c   : > { %558 = vst.msk [vmem:[%s311_s8] sm:$0xff] %vm520_vm4, %v557_v35 }
 0x15f   : > { %v661_v36 = vpop.permute.xlu1 %660 }
 0x160   : > { %v677_v37 = vpop.permute.xlu0 %676  ;;  %707 = vst.msk [vmem:[%s1341_s12 + $0x10] sm:$0xff] %vm704_vm5, %v661_v36 }
 0x161   : > { %715 = vst.msk [vmem:[%s1341_s12 + $0x50] sm:$0xff] %vm704_vm5, %v677_v37 }
 0x163   : > { %v663_v38 = vpop.permute.xlu1 %662 }
 0x164   : > { %708 = vst.msk [vmem:[%s1341_s12 + $0x18] sm:$0xff] %vm704_vm5, %v663_v38  ;;  %v657_v39 = vpop.permute.xlu0 %656 }
 0x165   : > { %705 = vst.msk [vmem:[%s1341_s12] sm:$0xff] %vm704_vm5, %v657_v39 }
 0x167   : > { %v679_v40 = vpop.permute.xlu1 %678 }
 0x168   : > { %716 = vst.msk [vmem:[%s1341_s12 + $0x58] sm:$0xff] %vm704_vm5, %v679_v40  ;;  %v673_v41 = vpop.permute.xlu0 %672 }
 0x169   : > { %713 = vst.msk [vmem:[%s1341_s12 + $0x40] sm:$0xff] %vm704_vm5, %v673_v41 }
 0x16b   : > { %v675_v42 = vpop.permute.xlu1 %674 }
 0x16c   : > { %714 = vst.msk [vmem:[%s1341_s12 + $0x48] sm:$0xff] %vm704_vm5, %v675_v42  ;;  %v659_v43 = vpop.permute.xlu0 %658 }
 0x16d   : > { %706 = vst.msk [vmem:[%s1341_s12 + $0x8] sm:$0xff] %vm704_vm5, %v659_v43 }
 0x16f   : > { %v671_v44 = vpop.permute.xlu1 %670 }
 0x170   : > { %712 = vst.msk [vmem:[%s1341_s12 + $0x38] sm:$0xff] %vm704_vm5, %v671_v44  ;;  %v669_v45 = vpop.permute.xlu0 %668 }
 0x171   : > { %711 = vst.msk [vmem:[%s1341_s12 + $0x30] sm:$0xff] %vm704_vm5, %v669_v45 }
 0x173   : > { %v667_v46 = vpop.permute.xlu1 %666 }
 0x174   : > { %710 = vst.msk [vmem:[%s1341_s12 + $0x28] sm:$0xff] %vm704_vm5, %v667_v46  ;;  %v665_v47 = vpop.permute.xlu0 %664 }
 0x175   : > { %709 = vst.msk [vmem:[%s1341_s12 + $0x20] sm:$0xff] %vm704_vm5, %v665_v47 }
 0x177   : > { %v683_v48 = vpop.permute.xlu1 %682 }
 0x178   : > { %718 = vst.msk [vmem:[%s1341_s12 + $0x68] sm:$0xff] %vm704_vm5, %v683_v48  ;;  %v681_v49 = vpop.permute.xlu0 %680 }
 0x179   : > { %717 = vst.msk [vmem:[%s1341_s12 + $0x60] sm:$0xff] %vm704_vm5, %v681_v49 }
 0x17b   : > { %v687_v50 = vpop.permute.xlu1 %686 }
 0x17c   : > { %720 = vst.msk [vmem:[%s1341_s12 + $0x78] sm:$0xff] %vm704_vm5, %v687_v50  ;;  %v685_v51 = vpop.permute.xlu0 %684 }
 0x17d   : > { %719 = vst.msk [vmem:[%s1341_s12 + $0x70] sm:$0xff] %vm704_vm5, %v685_v51 }
 0x17e PF: > { %s16_s22 = sadd.s32 1, %s1115_s22   ;;  %s1396_s18 = smov %s1107_s20 }
 0x17f   : > { %p13_p9 = scmp.ge.s32.totalorder %s16_s22, 6   ;;  %s1397_s19 = smov %s1111_s21 }
 0x180   : > { %s1398_s20 = smov %s1401_s23  ;;  %s1399_s21 = smov %s1405_s24 }
 0x181   :  { %15 = sbr.rel (!%p13_p9) target bundleno = 3 (0x3), region = 86 }

// kernel: _pfin_forward_impl.8
= control target key start
LH: loop header
LB: loop body
LE: loop exit
PB: predicated region body
PF: predicated region fallthrough
CT: control target
= control target key end

     0   :  { %s1840_s15 = smov 0   ;;  %s1842_s16 = smov 0   ;;  %s2174_s0 = inlined_call_operand.vmem [shape: bf16[2,10,10,64], index: 0, kind: input, shape index: {}]   ;;  %s2175_s1 = inlined_call_operand.vmem [shape: bf16[2,2,2,10,64], index: 1, kind: input, shape index: {}]   ;;  %s2176_s2 = inlined_call_operand.vmem [shape: bf16[576,64], index: 2, kind: input, shape index: {}]   ;;  %s2177_s3 = inlined_call_operand.vmem [shape: f32[1,64], index: 3, kind: input, shape index: {}]   ;;  %s2178_s4 = inlined_call_operand.vmem [shape: bf16[2,8,8,64], index: 4, kind: output, shape index: {}]  }
   0x1   :  { %s1844_s17 = smov 0   ;;  %s1846_s18 = smov 0  }
   0x2   :  { %s1848_s19 = smov 0  }
   0x3 LB: > { %s23_s20 = sadd.s32 1, %s1805_s17  ;;  %s26_s21 = sadd.s32 1, %s1809_s18  ;;  %s1813_s19 = sphi %s1848_s19, %s14_s19   ;;  %s1809_s18 = sphi %s1846_s18, %s2186_s18   ;;  %s1805_s17 = sphi %s1844_s17, %s2185_s17   ;;  %s1801_s16 = sphi %s1842_s16, %s2184_s16   ;;  %s1797_s15 = sphi %s1840_s15, %s2183_s15  }
   0x4   : > { %p24_p0 = scmp.ge.s32.totalorder %s23_s20, 2  ;;  %p1412_p1 = scmp.ge.s32.totalorder %s1813_s19, 1 }
   0x5   : > { %p210_p2 = scmp.lt.s32.totalorder %s1813_s19, 5 }
   0x6   : > { %s2188_s20 = smov (%p24_p0, %s23_s20), 0  ;;  %s2190_s21 = smov (!%p24_p0, %s26_s21), %s1809_s18 }
   0x7   : > { %p211_p3 = pnand %p1412_p1, %p210_p2  ;;  %p28_p4 = scmp.ge.s32.totalorder %s2190_s21, 2 }
   0x8   : > { %v1735_v0 = vld [vmem:[%s2176_s2 + $0x20] sm:$0xff] (!%p211_p3)   ;;  %s1876_s24 = sshll.u32 (!%p211_p3), %s1797_s15, 2  ;;  %p265_p5 = scmp.lt.s32.totalorder (!%p211_p3), %s1801_s16, 1  ;;  %v1737_v2 = vld [vmem:[%s2176_s2 + $0x28] sm:$0xff] (!%p211_p3)   ;;  %v1739_v4 = vld [vmem:[%s2176_s2 + $0x30] sm:$0xff] (!%p211_p3)   ;;  %vm417_vm3 = vcmask (!%p211_p3), 523264  }
   0x9   : > { %s2192_s21 = smov (%p28_p4, %s2190_s21), 0  ;;  %214 = sbr.rel (%p211_p3) target bundleno = 329 (0x149), region = 36 }
   0xa   : > { %v1736_v1 = vld [vmem:[%s2176_s2 + $0x80] sm:$0xff] (!%p211_p3)   ;;  %1554 = vmatprep.subr.bf16.mxu1 (!%p211_p3), %v1735_v0  ;;  %p267_p6 = scmp.lt.s32.totalorder (!%p211_p3), %s1876_s24, 9  ;;  %v1738_v3 = vld [vmem:[%s2176_s2 + $0x88] sm:$0xff] (!%p211_p3)   ;;  %v1740_v5 = vld [vmem:[%s2176_s2 + $0x90] sm:$0xff] (!%p211_p3)   ;;  %vm320_vm0 = vsmask.f32 (!%p211_p3), 3328 }
   0xb   : > { %1602 = vmatprep.subr.bf16.mxu0 (!%p211_p3), %v1736_v1  ;;  %1555 = vmatpush3.bf16.msra.mxu1 (!%p211_p3), %v1735_v0  ;;  %v1741_v6 = vld [vmem:[%s2176_s2 + $0x38] sm:$0xff] (!%p211_p3)   ;;  %p282_p7 = scmp.lt.s32.totalorder (!%p211_p3), %s1797_s15, 1  ;;  %vm321_vm1 = vsmask.f32 (!%p211_p3), 7440  ;;  %v1931_v18 = vld [vmem:[%s2176_s2] sm:$0xff] (!%p211_p3)   ;;  %vm566_vm4 = vcmask (!%p211_p3), 1042432  }
   0xc   : > { %1603 = vmatpush3.bf16.msra.mxu0 (!%p211_p3), %v1736_v1  ;;  %1556 = vmatprep.subr.bf16.mxu1 (!%p211_p3), %v1737_v2  ;;  %v1742_v7 = vld [vmem:[%s2176_s2 + $0x98] sm:$0xff] (!%p211_p3)   ;;  %v1940_v22 = vld [vmem:[%s2176_s2 + $0xa0] sm:$0xff] (!%p211_p3)   ;;  %vm1958_vm2 = vmor (!%p211_p3), %vm320_vm0, %vm321_vm1  ;;  %vm567_vm5 = vcmask (!%p211_p3), 1046532   ;;  %p292_p8 = scmp.lt.s32.totalorder (!%p211_p3), %s1876_s24, 7  ;;  %vm1289_vm7 = vcmask (!%p211_p3), 519168  }
   0xd   : > { %1604 = vmatprep.subr.bf16.mxu0 (!%p211_p3), %v1738_v3  ;;  %vm2005_vm6 = vmor (!%p211_p3), %vm566_vm4, %vm567_vm5  ;;  %v1773_v31 = vld [vmem:[%s2176_s2 + $0x110] sm:$0xff] (!%p211_p3)  }
   0xf   : > { %1557 = vmatpush3.bf16.msra.mxu1 (!%p211_p3), %v1737_v2 }
  0x10   : > { %s2194_s16 = smov (!%p265_p5, %s1801_s16), 1  ;;  %1605 = vmatpush3.bf16.msra.mxu0 %v1738_v3  ;;  %1558 = vmatprep.subr.bf16.mxu1 %v1739_v4  ;;  %s2196_s15 = smov (!%p282_p7, %s1797_s15), 1 }
  0x11   : > { %s268_s7 = scalar_select %p267_p6, %s1876_s24, 9  ;;  %1606 = vmatprep.subr.bf16.mxu0 %v1740_v5 }
  0x12   : > { %s1694_s10 = smul.u32 20, %s2194_s16  ;;  %s1417_s5 = sshll.u32 %s2194_s16, 3 }
  0x13   : > { %s1414_s11 = sshll.u32 %s268_s7, 1  ;;  %1559 = vmatpush3.bf16.msra.mxu1 %v1739_v4  ;;  %s1416_s8 = sshll.u32 %s2196_s15, 2 }
  0x14   : > { %s271_s12 = sadd.s32 %s1694_s10, %s1414_s11  ;;  %1607 = vmatpush3.bf16.msra.mxu0 %v1740_v5  ;;  %1560 = vmatprep.subr.bf16.mxu1 %v1741_v6  ;;  %s286_s9 = sadd.s32 %s1417_s5, %s1416_s8 }
  0x15   : > { %s1415_s22 = sshll.u32 %s271_s12, 2  ;;  %1608 = vmatprep.subr.bf16.mxu0 %v1742_v7  ;;  %s1418_s15 = sshll.u32 %s286_s9, 2 }
  0x16   : > { %s1907_s28 = scalar_lea.vmem %s2174_s0, %s1415_s22  ;;  %s1969_s12 = scalar_lea.vmem %s2175_s1, %s1418_s15 }
  0x17   : > { %v1911_v8 = vld [vmem:[%s1907_s28] sm:$0xf]  ;;  %v1914_v9 = vld [vmem:[%s1907_s28 + $0x4] sm:$0x1]  ;;  %v1917_v10 = vld [vmem:[%s1907_s28 + $0x8] sm:$0xf]  ;;  %1561 = vmatpush3.bf16.msra.mxu1 %v1741_v6 }
  0x18   : > { %v1920_v11 = vld [vmem:[%s1907_s28 + $0xc] sm:$0x1]  ;;  %v324_v12 = vshrl.u32 %v1911_v8, 16  ;;  %v327_v13 = vshll.u32 %v1911_v8, 16  ;;  %v333_v14 = vshll.u32 %v1914_v9, 16  ;;  %v338_v15 = vshrl.u32 %v1917_v10, 16  ;;  %1609 = vmatpush3.bf16.msra.mxu0 %v1742_v7  ;;  %1566 = vmatprep.subr.bf16.mxu1 %v1931_v18 }
  0x19   : > { %v341_v16 = vshll.u32 %v1917_v10, 16  ;;  %v347_v17 = vshll.u32 %v1920_v11, 16  ;;  %v1943_v26 = vld [vmem:[%s1907_s28 + $0x10] sm:$0xf]  ;;  %v1948_v28 = vld [vmem:[%s1907_s28 + $0x14] sm:$0x1]  ;;  %1614 = vmatprep.subr.bf16.mxu0 %v1940_v22  ;;  %v1430_v63 = vcombine.low %v1911_v8, %v1917_v10 }
  0x1a   : > { %v326_v19 = vrot.slane %v324_v12, 4  ;;  %v329_v20 = vrot.slane %v327_v13, 5  ;;  %v340_v21 = vrot.slane %v338_v15, 4  ;;  %v335_v23 = vrot.slane %v333_v14, 5  ;;  %v1951_v29 = vld [vmem:[%s1907_s28 + $0x18] sm:$0xf] }
  0x1b   : > { %v343_v24 = vrot.slane %v341_v16, 5  ;;  %v349_v25 = vrot.slane %v347_v17, 5  ;;  %v1954_v30 = vld [vmem:[%s1907_s28 + $0x1c] sm:$0x1]  ;;  %v352_v33 = vshrl.u32 %v1943_v26, 16  ;;  %v355_v34 = vshll.u32 %v1943_v26, 16 }
  0x1c   : > { %v330_v27 = vor.u32 %v329_v20, %v326_v19  ;;  %v361_v35 = vshll.u32 %v1948_v28, 16  ;;  %v366_v37 = vshrl.u32 %v1951_v29, 16  ;;  %v369_v38 = vshll.u32 %v1951_v29, 16  ;;  %v1978_v43 = vld [vmem:[%s1969_s12] sm:$0xf]  ;;  %v1745_v6 = vld [vmem:[%s2176_s2 + $0x8] sm:$0xff]  }
  0x1d   : > { %v344_v32 = vor.u32 %v343_v24, %v340_v21  ;;  %v375_v39 = vshll.u32 %v1954_v30, 16  ;;  %v354_v41 = vrot.slane %v352_v33, 4  ;;  %v1981_v44 = vld [vmem:[%s1969_s12 + $0x4] sm:$0x1]  ;;  %v357_v45 = vrot.slane %v355_v34, 5  ;;  %v1746_v15 = vld [vmem:[%s2176_s2 + $0xa8] sm:$0xff]  }
  0x1e   : > { %v331_v36 = vrot.slane %v330_v27, 4  ;;  %v368_v47 = vrot.slane %v366_v37, 4  ;;  %v371_v48 = vrot.slane %v369_v38, 5  ;;  %v363_v51 = vrot.slane %v361_v35, 5  ;;  %v1747_v17 = vld [vmem:[%s2176_s2 + $0x10] sm:$0xff]   ;;  %v1749_v24 = vld [vmem:[%s2176_s2 + $0x18] sm:$0xff]  }
  0x1f   : > { %v345_v40 = vrot.slane %v344_v32, 4  ;;  %v358_v50 = vor.u32 %v357_v45, %v354_v41  ;;  %v377_v52 = vrot.slane %v375_v39, 5  ;;  %v778_v54 = vshrl.u32 %v1978_v43, 16  ;;  %v1748_v21 = vld [vmem:[%s2176_s2 + $0xb0] sm:$0xff]   ;;  %v1755_v37 = vld [vmem:[%s2176_s2 + $0x48] sm:$0xff]   ;;  %v1760_v45 = vld [vmem:[%s2176_s2 + $0xd8] sm:$0xff]  }
  0x20   : > { %v336_v42 = vsel %vm1958_vm2, %v331_v36, %v335_v23  ;;  %v372_v53 = vor.u32 %v371_v48, %v368_v47  ;;  %v781_v55 = vshll.u32 %v1978_v43, 16  ;;  %v787_v56 = vshll.u32 %v1981_v44, 16  ;;  %v1753_v36 = vld [vmem:[%s2176_s2 + $0xc0] sm:$0xff]   ;;  %v1757_v41 = vld [vmem:[%s2176_s2 + $0x50] sm:$0xff]   ;;  %v2089_v47 = vld [vmem:[%s1969_s12 + $0x8] sm:$0xf] }
  0x21   : > { %v350_v46 = vsel %vm1958_vm2, %v345_v40, %v349_v25  ;;  %v359_v57 = vrot.slane %v358_v50, 4  ;;  %v780_v59 = vrot.slane %v778_v54, 4  ;;  %v575_v61 = vrot.slane %v1920_v11, 5  ;;  %v1756_v40 = vld [vmem:[%s2176_s2 + $0xc8] sm:$0xff]   ;;  %s2198_s24 = smov (!%p292_p8, %s1876_s24), 7 }
  0x22   : > { %v1422_v49 = vcombine.low %v336_v42, %v350_v46  ;;  %v373_v58 = vrot.slane %v372_v53, 4  ;;  %v783_v60 = vrot.slane %v781_v55, 5  ;;  %v789_v2 = vrot.slane %v787_v56, 5  ;;  %v1758_v42 = vld [vmem:[%s2176_s2 + $0xd0] sm:$0xff]   ;;  %s295_s13 = sadd.s32 %s1417_s5, %s2198_s24  ;;  %v1497_v11 = vld [vmem:[%s2177_s3] ss:$0 sm:$0xff] }
  0x23   : > { %v364_v62 = vsel %vm1958_vm2, %v359_v57, %v363_v51  ;;  %v579_v5 = vrot.slane %v1948_v28, 5  ;;  %v1439_v12 = vrot.slane %v1917_v10, 9  ;;  %v1440_v13 = vrot.slane %v1943_v26, 9  ;;  %v1762_v51 = vld [vmem:[%s2176_s2 + $0xe0] sm:$0xff]   ;;  %v311_v57 = vld [vmem:[%s1969_s12 + $0xc] sm:$0x1] }
  0x24   : > { %1562 = vmatprep.mubr.msk.bf16.mxu1 %vm417_vm3, %v1422_v49  ;;  %v378_v0 = vsel %vm1958_vm2, %v373_v58, %v377_v52  ;;  %v784_v1 = vor.u32 %v783_v60, %v780_v59  ;;  %v1458_v3 = vcombine.low %v350_v46, %v364_v62  ;;  %v571_v23 = vrot.slane %v1914_v9, 5  ;;  %v1761_v46 = vld [vmem:[%s2176_s2 + $0x60] sm:$0xff]   ;;  %v1764_v52 = vld [vmem:[%s2176_s2 + $0x68] sm:$0xff]   ;;  %v1767_v60 = vld [vmem:[%s2176_s2 + $0xf0] sm:$0xff]   ;;  %s1421_s23 = sshll.u32 %s295_s13, 2 }
  0x25   : > { %v1996_v4 = vcombine.low %v364_v62, %v378_v0  ;;  %v576_v19 = vsel %vm2005_vm6, %v1439_v12, %v575_v61  ;;  %v580_v20 = vsel %vm2005_vm6, %v1440_v13, %v579_v5  ;;  %v583_v25 = vrot.slane %v1954_v30, 5  ;;  %v1752_v30 = vld [vmem:[%s2176_s2 + $0x40] sm:$0xff]   ;;  %v1765_v58 = vld [vmem:[%s2176_s2 + $0xe8] sm:$0xff]   ;;  %v1768_v61 = vld [vmem:[%s2176_s2 + $0x78] sm:$0xff]   ;;  %s297_s26 = scalar_lea.vmem %s2178_s4, %s1421_s23 }
  0x26   : > { %v785_v7 = vrot.slane %v784_v1, 4  ;;  %1610 = vmatprep.mubr.msk.bf16.mxu0 %vm417_vm3, %v1458_v3  ;;  %v888_v27 = vrot.slane %v1981_v44, 5  ;;  %v1438_v28 = vrot.slane %v1911_v8, 9  ;;  %v1441_v9 = vrot.slane %v1951_v29, 9  ;;  %v1759_v44 = vld [vmem:[%s2176_s2 + $0x58] sm:$0xff]   ;;  %v1771_v3 = vld [vmem:[%s2176_s2 + $0x100] sm:$0xff]  }
  0x27   : > { %1563 = vmatmul.mubr.msk.bf16.vlgmr.msra.gmra.mrb[0].mxu1 %vm417_vm3, %v1996_v4  ;;  %v1466_v32 = vrot.slane %v1978_v43, 9  ;;  %v1431_v33 = vcombine.low %v1943_v26, %v1951_v29  ;;  %v1076_v49 = vshrl.u32 %v2089_v47, 16  ;;  %v1079_v50 = vshll.u32 %v2089_v47, 16 }
  0x28   : > { %v2013_v14 = vsel %vm1958_vm2, %v785_v7, %v789_v2  ;;  %1567 = vmatpush3.bf16.msra.mxu1 %v1931_v18  ;;  %1574 = vmatprep.mubr.msk.bf16.mxu1 %vm417_vm3, %v1430_v63  ;;  %v1467_v18 = vcombine.low %v576_v19, %v580_v20  ;;  %v572_v34 = vsel %vm2005_vm6, %v1438_v28, %v571_v23  ;;  %v1085_v59 = vshll.u32 %v311_v57, 16 }
  0x29   : > { %v1459_v16 = vcombine.low %v378_v0, %v2013_v14  ;;  %1568 = vmatprep.subr.bf16.mxu1 %v1745_v6  ;;  %v584_v8 = vsel %vm2005_vm6, %v1441_v9, %v583_v25  ;;  %v2057_v35 = vsel %vm2005_vm6, %v1466_v32, %v888_v27  ;;  %v1442_v38 = vcombine.low %v572_v34, %v576_v19  ;;  %v1769_v0 = vld [vmem:[%s2176_s2 + $0xf8] sm:$0xff]  }
  0x2a   : > { %v1468_v39 = vcombine.low %v584_v8, %v2057_v35  ;;  %v1443_v48 = vcombine.low %v580_v20, %v584_v8  ;;  %v1450_v53 = vcombine.low %v1917_v10, %v1943_v26  ;;  %v1475_v54 = vcombine.low %v1978_v43, %v2089_v47  ;;  %v1766_v10 = vld [vmem:[%s2176_s2 + $0x70] sm:$0xff]  }
  0x2b   : > { %1611 = vmatmul.mubr.msk.bf16.vlgmr.msra.gmra.mrb[0].mxu0 %vm417_vm3, %v1459_v16  ;;  %v1078_v55 = vrot.slane %v1076_v49, 4  ;;  %v1081_v56 = vrot.slane %v1079_v50, 5  ;;  %v1087_v63 = vrot.slane %v1085_v59, 5  ;;  %v1451_v1 = vcombine.low %v1951_v29, %v1978_v43  ;;  %v1772_v29 = vld [vmem:[%s2176_s2 + $0x108] sm:$0xff]  }
  0x2c   : > { %1615 = vmatpush3.bf16.msra.mxu0 %v1940_v22  ;;  %1569 = vmatpush3.bf16.msra.mxu1 %v1745_v6  ;;  %v1750_v22 = vld [vmem:[%s2176_s2 + $0xb8] sm:$0xff]   ;;  %v1182_v43 = vrot.slane %v311_v57, 5  ;;  %v1489_v5 = vrot.slane %v2089_v47, 9 }
  0x2d   : > { %1616 = vmatprep.subr.bf16.mxu0 %v1746_v15  ;;  %1570 = vmatprep.subr.bf16.mxu1 %v1747_v17  ;;  %v1082_v26 = vor.u32 %v1081_v56, %v1078_v55  ;;  %v1774_v6 = vld [vmem:[%s2176_s2 + $0x118] sm:$0xff]  }
  0x2e   : > { %1622 = vmatprep.mubr.msk.bf16.mxu0 %vm417_vm3, %v1467_v18  ;;  %v1183_v7 = vsel %vm2005_vm6, %v1489_v5, %v1182_v43 }
  0x2f   : > { %v1083_v62 = vrot.slane %v1082_v26, 4  ;;  %v1490_v12 = vcombine.low %v2057_v35, %v1183_v7 }
  0x30   : > { %1617 = vmatpush3.bf16.msra.mxu0 %v1746_v15  ;;  %1571 = vmatpush3.bf16.msra.mxu1 %v1747_v17 }
  0x31   : > { %1618 = vmatprep.subr.bf16.mxu0 %v1748_v21  ;;  %1572 = vmatprep.subr.bf16.mxu1 %v1749_v24  ;;  %v1088_v2 = vsel %vm1958_vm2, %v1083_v62, %v1087_v63 }
  0x34   : > { %1619 = vmatpush3.bf16.msra.mxu0 %v1748_v21  ;;  %1573 = vmatpush3.bf16.msra.mxu1 %v1749_v24 }
  0x35   : > { %1620 = vmatprep.subr.bf16.mxu0 %v1750_v22  ;;  %1578 = vmatprep.subr.bf16.mxu1 %v1752_v30 }
  0x37   : > { %1575 = vmatmul.mubr.msk.bf16.vlgmr.msra.gmra.mrb[0].mxu1 %vm417_vm3, %v1431_v33 }
  0x38   : > { %1621 = vmatpush3.bf16.msra.mxu0 %v1750_v22  ;;  %1579 = vmatpush3.bf16.msra.mxu1 %v1752_v30 }
  0x39   : > { %1626 = vmatprep.subr.bf16.mxu0 %v1753_v36  ;;  %1580 = vmatprep.subr.bf16.mxu1 %v1755_v37 }
  0x3a   : > { %1586 = vmatprep.mubr.msk.bf16.mxu1 %vm417_vm3, %v1442_v38 }
  0x3b   : > { %1623 = vmatmul.mubr.msk.bf16.vlgmr.msra.gmra.mrb[0].mxu0 %vm417_vm3, %v1468_v39 }
  0x3c   : > { %1627 = vmatpush3.bf16.msra.mxu0 %v1753_v36  ;;  %1581 = vmatpush3.bf16.msra.mxu1 %v1755_v37 }
  0x3d   : > { %1628 = vmatprep.subr.bf16.mxu0 %v1756_v40  ;;  %1582 = vmatprep.subr.bf16.mxu1 %v1757_v41 }
  0x3e   : > { %1634 = vmatprep.mubr.msk.bf16.mxu0 %vm417_vm3, %v1431_v33 }
  0x40   : > { %1629 = vmatpush3.bf16.msra.mxu0 %v1756_v40  ;;  %1583 = vmatpush3.bf16.msra.mxu1 %v1757_v41 }
  0x41   : > { %1630 = vmatprep.subr.bf16.mxu0 %v1758_v42  ;;  %1584 = vmatprep.subr.bf16.mxu1 %v1759_v44 }
  0x44   : > { %1631 = vmatpush3.bf16.msra.mxu0 %v1758_v42  ;;  %1585 = vmatpush3.bf16.msra.mxu1 %v1759_v44 }
  0x45   : > { %1632 = vmatprep.subr.bf16.mxu0 %v1760_v45  ;;  %1590 = vmatprep.subr.bf16.mxu1 %v1761_v46 }
  0x47   : > { %1587 = vmatmul.mubr.msk.bf16.vlgmr.msra.gmra.mrb[0].mxu1 %vm417_vm3, %v1443_v48 }
  0x48   : > { %1633 = vmatpush3.bf16.msra.mxu0 %v1760_v45  ;;  %1591 = vmatpush3.bf16.msra.mxu1 %v1761_v46 }
  0x49   : > { %1638 = vmatprep.subr.bf16.mxu0 %v1762_v51  ;;  %1592 = vmatprep.subr.bf16.mxu1 %v1764_v52 }
  0x4a   : > { %1598 = vmatprep.mubr.msk.bf16.mxu1 %vm417_vm3, %v1450_v53 }
  0x4b   : > { %1635 = vmatmul.mubr.msk.bf16.vlgmr.msra.gmra.mrb[0].mxu0 %vm417_vm3, %v1475_v54 }
  0x4c   : > { %1639 = vmatpush3.bf16.msra.mxu0 %v1762_v51  ;;  %1593 = vmatpush3.bf16.msra.mxu1 %v1764_v52 }
  0x4d   : > { %1640 = vmatprep.subr.bf16.mxu0 %v1765_v58  ;;  %1594 = vmatprep.subr.bf16.mxu1 %v1766_v10 }
  0x4e   : > { %1646 = vmatprep.mubr.msk.bf16.mxu0 %vm417_vm3, %v1996_v4  ;;  %v1482_v4 = vcombine.low %v2013_v14, %v1088_v2 }
  0x50   : > { %1641 = vmatpush3.bf16.msra.mxu0 %v1765_v58  ;;  %1595 = vmatpush3.bf16.msra.mxu1 %v1766_v10 }
  0x51   : > { %1642 = vmatprep.subr.bf16.mxu0 %v1767_v60  ;;  %1596 = vmatprep.subr.bf16.mxu1 %v1768_v61 }
  0x54   : > { %1643 = vmatpush3.bf16.msra.mxu0 %v1767_v60  ;;  %1597 = vmatpush3.bf16.msra.mxu1 %v1768_v61 }
  0x55   : > { %1644 = vmatprep.subr.bf16.mxu0 %v1769_v0 }
  0x57   : > { %1599 = vmatmul.mubr.msk.bf16.vlgmr.msra.gmra.mrb[0].mxu1 %vm417_vm3, %v1451_v1 }
  0x58   : > { %1645 = vmatpush3.bf16.msra.mxu0 %v1769_v0 }
  0x59   : > { %1650 = vmatprep.subr.bf16.mxu0 %v1771_v3 }
  0x5b   : > { %1647 = vmatmul.mubr.msk.bf16.vlgmr.msra.gmra.mrb[0].mxu0 %vm417_vm3, %v1482_v4 }
  0x5c   : > { %1651 = vmatpush3.bf16.msra.mxu0 %v1771_v3  ;;  %1658 = vmatprep.mubr.msk.bf16.mxu0 %vm417_vm3, %v1443_v48 }
  0x5d   : > { %1652 = vmatprep.subr.bf16.mxu0 %v1772_v29 }
  0x60   : > { %1653 = vmatpush3.bf16.msra.mxu0 %v1772_v29 }
  0x61   : > { %1654 = vmatprep.subr.bf16.mxu0 %v1773_v31 }
  0x64   : > { %1655 = vmatpush3.bf16.msra.mxu0 %v1773_v31 }
  0x65   : > { %1656 = vmatprep.subr.bf16.mxu0 %v1774_v6 }
  0x68   : > { %1657 = vmatpush3.bf16.msra.mxu0 %v1774_v6 }
  0x6b   : > { %1659 = vmatmul.mubr.msk.bf16.vlgmr.msra.gmra.mrb[0].mxu0 %vm417_vm3, %v1490_v12 }
 0x12a   : > { %v1600_v13 = vpop.f32.mrb[0].mxu1 }
 0x12b   : > { %v758_v14 = vpop.f32.mrb[1].mxu1 }
 0x12c   : > { %v1601_v15 = vpop.f32.mrb[2].mxu1 }
 0x12d   : > { %v761_v16 = vpop.f32.mrb[3].mxu1 }
 0x13e   : > { %v1660_v17 = vpop.f32.mrb[0].mxu0 }
 0x13f   : > { %v1662_v19 = vadd.f32 %v1660_v17, %v1600_v13  ;;  %v1255_v20 = vpop.f32.mrb[1].mxu0 }
 0x140   : > { %v1663_v18 = vadd.f32 %v1255_v20, %v758_v14  ;;  %v1661_v21 = vpop.f32.mrb[2].mxu0 }
 0x141   : > { %v1283_v23 = vadd.f32 %v1662_v19, %v1497_v11  ;;  %v1664_v24 = vadd.f32 %v1661_v21, %v1601_v15  ;;  %v1258_v25 = vpop.f32.mrb[3].mxu0 }
 0x142   : > { %v1281_v27 = vadd.f32 %v1663_v18, %v1497_v11  ;;  %v1665_v22 = vadd.f32 %v1258_v25, %v761_v16 }
 0x143   : > { %v1287_v28 = vpack.c.bf16 %v1283_v23, %v1283_v23  ;;  %v1284_v9 = vadd.f32 %v1664_v24, %v1497_v11 }
 0x144   : > { %v1285_v32 = vpack.c.bf16 %v1281_v27, %v1281_v27  ;;  %v1282_v30 = vadd.f32 %v1665_v22, %v1497_v11 }
 0x145   : > { %1292 = vst.msk [vmem:[%s297_s26 + $0x8] sm:$0xf] %vm1289_vm7, %v1287_v28  ;;  %v1288_v33 = vpack.c.bf16 %v1284_v9, %v1284_v9 }
 0x146   : > { %1290 = vst.msk [vmem:[%s297_s26] sm:$0xf] %vm1289_vm7, %v1285_v32  ;;  %v1286_v34 = vpack.c.bf16 %v1282_v30, %v1282_v30 }
 0x147   : > { %1293 = vst.msk [vmem:[%s297_s26 + $0xc] sm:$0xf] %vm1289_vm7, %v1288_v33 }
 0x148   : > { %1291 = vst.msk [vmem:[%s297_s26 + $0x4] sm:$0xf] %vm1289_vm7, %v1286_v34 }
 0x149 PF: > { %s14_s19 = sadd.s32 1, %s1813_s19   ;;  %s2183_s15 = smov %s1805_s17 }
 0x14a   : > { %p11_p9 = scmp.ge.s32.totalorder %s14_s19, 6   ;;  %s2184_s16 = smov %s1809_s18 }
 0x14b   : > { %s2185_s17 = smov %s2188_s20  ;;  %s2186_s18 = smov %s2192_s21 }
 0x14c   :  { %13 = sbr.rel (!%p11_p9) target bundleno = 3 (0x3), region = 69 }

// kernel: _pfin_forward_impl.9
= control target key start
LH: loop header
LB: loop body
LE: loop exit
PB: predicated region body
PF: predicated region fallthrough
CT: control target
= control target key end

     0   :  { %s1968_s18 = smov 0   ;;  %s1970_s19 = smov 0   ;;  %s2305_s0 = inlined_call_operand.vmem [shape: bf16[2,10,10,64], index: 0, kind: input, shape index: {}]   ;;  %s2306_s1 = inlined_call_operand.vmem [shape: bf16[2,2,2,10,64], index: 1, kind: input, shape index: {}]   ;;  %s2307_s2 = inlined_call_operand.vmem [shape: bf16[576,51], index: 2, kind: input, shape index: {}]   ;;  %s2308_s3 = inlined_call_operand.vmem [shape: f32[1,51], index: 3, kind: input, shape index: {}]   ;;  %s2309_s4 = inlined_call_operand.vmem [shape: f32[2,8,8,48], index: 4, kind: output, shape index: {0}]   ;;  %s2310_s5 = inlined_call_operand.vmem [shape: f32[2,8,8,3], index: 5, kind: output, shape index: {1}]  }
   0x1   :  { %s1972_s20 = smov 0   ;;  %s1974_s21 = smov 0  }
   0x2   :  { %s1976_s22 = smov 0  }
   0x3 LB: > { %s25_s23 = sadd.s32 1, %s1927_s20  ;;  %s28_s24 = sadd.s32 1, %s1931_s21  ;;  %s1935_s22 = sphi %s1976_s22, %s16_s22   ;;  %s1931_s21 = sphi %s1974_s21, %s2318_s21   ;;  %s1927_s20 = sphi %s1972_s20, %s2317_s20   ;;  %s1923_s19 = sphi %s1970_s19, %s2316_s19   ;;  %s1919_s18 = sphi %s1968_s18, %s2315_s18  }
   0x4   : > { %p26_p0 = scmp.ge.s32.totalorder %s25_s23, 2  ;;  %p1530_p1 = scmp.ge.s32.totalorder %s1935_s22, 1 }
   0x5   : > { %p240_p2 = scmp.lt.s32.totalorder %s1935_s22, 5 }
   0x6   : > { %s2320_s23 = smov (%p26_p0, %s25_s23), 0  ;;  %s2322_s24 = smov (!%p26_p0, %s28_s24), %s1931_s21 }
   0x7   : > { %p241_p3 = pnand %p1530_p1, %p240_p2  ;;  %p30_p4 = scmp.ge.s32.totalorder %s2322_s24, 2 }
   0x8   : > { %v1857_v0 = vld [vmem:[%s2307_s2 + $0x20] sm:$0xff] (!%p241_p3)   ;;  %s2004_s27 = sshll.u32 (!%p241_p3), %s1919_s18, 2  ;;  %p306_p5 = scmp.lt.s32.totalorder (!%p241_p3), %s1923_s19, 1  ;;  %v1859_v2 = vld [vmem:[%s2307_s2 + $0x28] sm:$0xff] (!%p241_p3)   ;;  %v1861_v4 = vld [vmem:[%s2307_s2 + $0x30] sm:$0xff] (!%p241_p3)   ;;  %vm468_vm3 = vcmask (!%p241_p3), 523264  }
   0x9   : > { %s2324_s24 = smov (%p30_p4, %s2322_s24), 0  ;;  %244 = sbr.rel (%p241_p3) target bundleno = 444 (0x1bc), region = 36 }
   0xa   : > { %v1858_v1 = vld [vmem:[%s2307_s2 + $0x80] sm:$0xff] (!%p241_p3)   ;;  %1675 = vmatprep.subr.bf16.mxu1 (!%p241_p3), %v1857_v0  ;;  %p308_p6 = scmp.lt.s32.totalorder (!%p241_p3), %s2004_s27, 9  ;;  %v1860_v3 = vld [vmem:[%s2307_s2 + $0x88] sm:$0xff] (!%p241_p3)   ;;  %v1862_v5 = vld [vmem:[%s2307_s2 + $0x90] sm:$0xff] (!%p241_p3)   ;;  %vm371_vm0 = vsmask.f32 (!%p241_p3), 3328 }
   0xb   : > { %1723 = vmatprep.subr.bf16.mxu0 (!%p241_p3), %v1858_v1  ;;  %1676 = vmatpush3.bf16.msra.mxu1 (!%p241_p3), %v1857_v0  ;;  %v1863_v6 = vld [vmem:[%s2307_s2 + $0x38] sm:$0xff] (!%p241_p3)   ;;  %p323_p7 = scmp.lt.s32.totalorder (!%p241_p3), %s1919_s18, 1  ;;  %vm372_vm1 = vsmask.f32 (!%p241_p3), 7440  ;;  %v2059_v18 = vld [vmem:[%s2307_s2] sm:$0xff] (!%p241_p3)   ;;  %vm617_vm4 = vcmask (!%p241_p3), 1042432  }
   0xc   : > { %1724 = vmatpush3.bf16.msra.mxu0 (!%p241_p3), %v1858_v1  ;;  %1677 = vmatprep.subr.bf16.mxu1 (!%p241_p3), %v1859_v2  ;;  %v1864_v7 = vld [vmem:[%s2307_s2 + $0x98] sm:$0xff] (!%p241_p3)   ;;  %v2068_v22 = vld [vmem:[%s2307_s2 + $0xa0] sm:$0xff] (!%p241_p3)   ;;  %vm2086_vm2 = vmor (!%p241_p3), %vm371_vm0, %vm372_vm1  ;;  %vm618_vm5 = vcmask (!%p241_p3), 1046532   ;;  %p333_p8 = scmp.lt.s32.totalorder (!%p241_p3), %s2004_s27, 7  ;;  %vm1336_vm7 = vcmask (!%p241_p3), 392192   ;;  %vm1357_vm8 = vcmask (!%p241_p3), 23552  }
   0xd   : > { %1725 = vmatprep.subr.bf16.mxu0 (!%p241_p3), %v1860_v3  ;;  %vm2133_vm6 = vmor (!%p241_p3), %vm617_vm4, %vm618_vm5  ;;  %v1895_v31 = vld [vmem:[%s2307_s2 + $0x110] sm:$0xff] (!%p241_p3)  }
   0xf   : > { %1678 = vmatpush3.bf16.msra.mxu1 (!%p241_p3), %v1859_v2 }
  0x10   : > { %s2326_s19 = smov (!%p306_p5, %s1923_s19), 1  ;;  %1726 = vmatpush3.bf16.msra.mxu0 %v1860_v3  ;;  %1679 = vmatprep.subr.bf16.mxu1 %v1861_v4  ;;  %s2328_s18 = smov (!%p323_p7, %s1919_s18), 1 }
  0x11   : > { %s309_s11 = scalar_select %p308_p6, %s2004_s27, 9  ;;  %1727 = vmatprep.subr.bf16.mxu0 %v1862_v5 }
  0x12   : > { %s1815_s14 = smul.u32 20, %s2326_s19  ;;  %s1535_s10 = sshll.u32 %s2326_s19, 3 }
  0x13   : > { %s1532_s15 = sshll.u32 %s309_s11, 1  ;;  %1680 = vmatpush3.bf16.msra.mxu1 %v1861_v4  ;;  %s1534_s13 = sshll.u32 %s2328_s18, 2 }
  0x14   : > { %s312_s16 = sadd.s32 %s1815_s14, %s1532_s15  ;;  %1728 = vmatpush3.bf16.msra.mxu0 %v1862_v5  ;;  %1681 = vmatprep.subr.bf16.mxu1 %v1863_v6  ;;  %s327_s14 = sadd.s32 %s1535_s10, %s1534_s13 }
  0x15   : > { %s1533_s26 = sshll.u32 %s312_s16, 2  ;;  %1729 = vmatprep.subr.bf16.mxu0 %v1864_v7  ;;  %s1536_s18 = sshll.u32 %s327_s14, 2 }
  0x16   : > { %s2035_s7 = scalar_lea.vmem %s2305_s0, %s1533_s26  ;;  %s2097_s17 = scalar_lea.vmem %s2306_s1, %s1536_s18 }
  0x17   : > { %v2039_v8 = vld [vmem:[%s2035_s7] sm:$0xf]  ;;  %v2042_v9 = vld [vmem:[%s2035_s7 + $0x4] sm:$0x1]  ;;  %v2045_v10 = vld [vmem:[%s2035_s7 + $0x8] sm:$0xf]  ;;  %1682 = vmatpush3.bf16.msra.mxu1 %v1863_v6 }
  0x18   : > { %v2048_v11 = vld [vmem:[%s2035_s7 + $0xc] sm:$0x1]  ;;  %v375_v12 = vshrl.u32 %v2039_v8, 16  ;;  %v378_v13 = vshll.u32 %v2039_v8, 16  ;;  %v384_v14 = vshll.u32 %v2042_v9, 16  ;;  %v389_v15 = vshrl.u32 %v2045_v10, 16  ;;  %1730 = vmatpush3.bf16.msra.mxu0 %v1864_v7  ;;  %1687 = vmatprep.subr.bf16.mxu1 %v2059_v18 }
  0x19   : > { %v392_v16 = vshll.u32 %v2045_v10, 16  ;;  %v398_v17 = vshll.u32 %v2048_v11, 16  ;;  %v2071_v26 = vld [vmem:[%s2035_s7 + $0x10] sm:$0xf]  ;;  %v2076_v28 = vld [vmem:[%s2035_s7 + $0x14] sm:$0x1]  ;;  %1735 = vmatprep.subr.bf16.mxu0 %v2068_v22  ;;  %v1551_v63 = vcombine.low %v2039_v8, %v2045_v10 }
  0x1a   : > { %v377_v19 = vrot.slane %v375_v12, 4  ;;  %v380_v20 = vrot.slane %v378_v13, 5  ;;  %v391_v21 = vrot.slane %v389_v15, 4  ;;  %v386_v23 = vrot.slane %v384_v14, 5  ;;  %v2079_v29 = vld [vmem:[%s2035_s7 + $0x18] sm:$0xf] }
  0x1b   : > { %v394_v24 = vrot.slane %v392_v16, 5  ;;  %v400_v25 = vrot.slane %v398_v17, 5  ;;  %v2082_v30 = vld [vmem:[%s2035_s7 + $0x1c] sm:$0x1]  ;;  %v403_v33 = vshrl.u32 %v2071_v26, 16  ;;  %v406_v34 = vshll.u32 %v2071_v26, 16 }
  0x1c   : > { %v381_v27 = vor.u32 %v380_v20, %v377_v19  ;;  %v412_v35 = vshll.u32 %v2076_v28, 16  ;;  %v417_v37 = vshrl.u32 %v2079_v29, 16  ;;  %v420_v38 = vshll.u32 %v2079_v29, 16  ;;  %v2106_v43 = vld [vmem:[%s2097_s17] sm:$0xf]  ;;  %v1867_v6 = vld [vmem:[%s2307_s2 + $0x8] sm:$0xff]  }
  0x1d   : > { %v395_v32 = vor.u32 %v394_v24, %v391_v21  ;;  %v426_v39 = vshll.u32 %v2082_v30, 16  ;;  %v405_v41 = vrot.slane %v403_v33, 4  ;;  %v2109_v44 = vld [vmem:[%s2097_s17 + $0x4] sm:$0x1]  ;;  %v408_v45 = vrot.slane %v406_v34, 5  ;;  %v1868_v15 = vld [vmem:[%s2307_s2 + $0xa8] sm:$0xff]  }
  0x1e   : > { %v382_v36 = vrot.slane %v381_v27, 4  ;;  %v419_v47 = vrot.slane %v417_v37, 4  ;;  %v422_v48 = vrot.slane %v420_v38, 5  ;;  %v414_v51 = vrot.slane %v412_v35, 5  ;;  %v1869_v17 = vld [vmem:[%s2307_s2 + $0x10] sm:$0xff]   ;;  %v1871_v24 = vld [vmem:[%s2307_s2 + $0x18] sm:$0xff]  }
  0x1f   : > { %v396_v40 = vrot.slane %v395_v32, 4  ;;  %v409_v50 = vor.u32 %v408_v45, %v405_v41  ;;  %v428_v52 = vrot.slane %v426_v39, 5  ;;  %v829_v54 = vshrl.u32 %v2106_v43, 16  ;;  %v1870_v21 = vld [vmem:[%s2307_s2 + $0xb0] sm:$0xff]   ;;  %v1877_v37 = vld [vmem:[%s2307_s2 + $0x48] sm:$0xff]   ;;  %v1882_v45 = vld [vmem:[%s2307_s2 + $0xd8] sm:$0xff]  }
  0x20   : > { %v387_v42 = vsel %vm2086_vm2, %v382_v36, %v386_v23  ;;  %v423_v53 = vor.u32 %v422_v48, %v419_v47  ;;  %v832_v55 = vshll.u32 %v2106_v43, 16  ;;  %v838_v56 = vshll.u32 %v2109_v44, 16  ;;  %v1875_v36 = vld [vmem:[%s2307_s2 + $0xc0] sm:$0xff]   ;;  %v1879_v41 = vld [vmem:[%s2307_s2 + $0x50] sm:$0xff]   ;;  %v2217_v47 = vld [vmem:[%s2097_s17 + $0x8] sm:$0xf] }
  0x21   : > { %v401_v46 = vsel %vm2086_vm2, %v396_v40, %v400_v25  ;;  %v410_v57 = vrot.slane %v409_v50, 4  ;;  %v831_v59 = vrot.slane %v829_v54, 4  ;;  %v626_v61 = vrot.slane %v2048_v11, 5  ;;  %v1878_v40 = vld [vmem:[%s2307_s2 + $0xc8] sm:$0xff]   ;;  %s2330_s27 = smov (!%p333_p8, %s2004_s27), 7  ;;  %s1937_s19 = smov 80  }
  0x22   : > { %v1543_v49 = vcombine.low %v387_v42, %v401_v46  ;;  %v424_v58 = vrot.slane %v423_v53, 4  ;;  %v834_v60 = vrot.slane %v832_v55, 5  ;;  %v840_v2 = vrot.slane %v838_v56, 5  ;;  %v1880_v42 = vld [vmem:[%s2307_s2 + $0xd0] sm:$0xff]   ;;  %s336_s29 = sadd.s32 %s1535_s10, %s2330_s27  ;;  %v1618_v11 = vld [vmem:[%s2308_s3] ss:$0 sm:$0xff] }
  0x23   : > { %v415_v62 = vsel %vm2086_vm2, %v410_v57, %v414_v51  ;;  %v630_v5 = vrot.slane %v2076_v28, 5  ;;  %v1560_v12 = vrot.slane %v2045_v10, 9  ;;  %v1561_v13 = vrot.slane %v2071_v26, 9  ;;  %v1884_v51 = vld [vmem:[%s2307_s2 + $0xe0] sm:$0xff]   ;;  %v362_v57 = vld [vmem:[%s2097_s17 + $0xc] sm:$0x1] }
  0x24   : > { %1683 = vmatprep.mubr.msk.bf16.mxu1 %vm468_vm3, %v1543_v49  ;;  %v429_v0 = vsel %vm2086_vm2, %v424_v58, %v428_v52  ;;  %v835_v1 = vor.u32 %v834_v60, %v831_v59  ;;  %v1579_v3 = vcombine.low %v401_v46, %v415_v62  ;;  %v622_v23 = vrot.slane %v2042_v9, 5  ;;  %v1883_v46 = vld [vmem:[%s2307_s2 + $0x60] sm:$0xff]   ;;  %v1886_v52 = vld [vmem:[%s2307_s2 + $0x68] sm:$0xff]   ;;  %v1889_v60 = vld [vmem:[%s2307_s2 + $0xf0] sm:$0xff]   ;;  %s1539_s30 = sshll.u32 %s336_s29, 3 }
  0x25   : > { %v2124_v4 = vcombine.low %v415_v62, %v429_v0  ;;  %v627_v19 = vsel %vm2133_vm6, %v1560_v12, %v626_v61  ;;  %v631_v20 = vsel %vm2133_vm6, %v1561_v13, %v630_v5  ;;  %v634_v25 = vrot.slane %v2082_v30, 5  ;;  %v1874_v30 = vld [vmem:[%s2307_s2 + $0x40] sm:$0xff]   ;;  %v1887_v58 = vld [vmem:[%s2307_s2 + $0xe8] sm:$0xff]   ;;  %v1890_v61 = vld [vmem:[%s2307_s2 + $0x78] sm:$0xff]   ;;  %s338_s9 = scalar_lea.vmem %s2309_s4, %s1539_s30  ;;  %s348_s11 = scalar_lea.vmem %s2310_s5, %s1539_s30 }
  0x26   : > { %v836_v7 = vrot.slane %v835_v1, 4  ;;  %1731 = vmatprep.mubr.msk.bf16.mxu0 %vm468_vm3, %v1579_v3  ;;  %v939_v27 = vrot.slane %v2109_v44, 5  ;;  %v1559_v28 = vrot.slane %v2039_v8, 9  ;;  %v1562_v9 = vrot.slane %v2079_v29, 9  ;;  %v1881_v44 = vld [vmem:[%s2307_s2 + $0x58] sm:$0xff]   ;;  %v1893_v3 = vld [vmem:[%s2307_s2 + $0x100] sm:$0xff]  }
  0x27   : > { %1684 = vmatmul.mubr.msk.bf16.vlgmr.msra.gmra.mrb[0].mxu1 %vm468_vm3, %v2124_v4  ;;  %v1587_v32 = vrot.slane %v2106_v43, 9  ;;  %v1552_v33 = vcombine.low %v2071_v26, %v2079_v29  ;;  %v1127_v49 = vshrl.u32 %v2217_v47, 16  ;;  %v1130_v50 = vshll.u32 %v2217_v47, 16 }
  0x28   : > { %v2141_v14 = vsel %vm2086_vm2, %v836_v7, %v840_v2  ;;  %1688 = vmatpush3.bf16.msra.mxu1 %v2059_v18  ;;  %1695 = vmatprep.mubr.msk.bf16.mxu1 %vm468_vm3, %v1551_v63  ;;  %v1588_v18 = vcombine.low %v627_v19, %v631_v20  ;;  %v623_v34 = vsel %vm2133_vm6, %v1559_v28, %v622_v23  ;;  %v1136_v59 = vshll.u32 %v362_v57, 16 }
  0x29   : > { %v1580_v16 = vcombine.low %v429_v0, %v2141_v14  ;;  %1689 = vmatprep.subr.bf16.mxu1 %v1867_v6  ;;  %v635_v8 = vsel %vm2133_vm6, %v1562_v9, %v634_v25  ;;  %v2185_v35 = vsel %vm2133_vm6, %v1587_v32, %v939_v27  ;;  %v1563_v38 = vcombine.low %v623_v34, %v627_v19  ;;  %v1891_v0 = vld [vmem:[%s2307_s2 + $0xf8] sm:$0xff]  }
  0x2a   : > { %v1589_v39 = vcombine.low %v635_v8, %v2185_v35  ;;  %v1564_v48 = vcombine.low %v631_v20, %v635_v8  ;;  %v1571_v53 = vcombine.low %v2045_v10, %v2071_v26  ;;  %v1596_v54 = vcombine.low %v2106_v43, %v2217_v47  ;;  %v1888_v10 = vld [vmem:[%s2307_s2 + $0x70] sm:$0xff]  }
  0x2b   : > { %1732 = vmatmul.mubr.msk.bf16.vlgmr.msra.gmra.mrb[0].mxu0 %vm468_vm3, %v1580_v16  ;;  %v1129_v55 = vrot.slane %v1127_v49, 4  ;;  %v1132_v56 = vrot.slane %v1130_v50, 5  ;;  %v1138_v63 = vrot.slane %v1136_v59, 5  ;;  %v1572_v1 = vcombine.low %v2079_v29, %v2106_v43  ;;  %v1894_v29 = vld [vmem:[%s2307_s2 + $0x108] sm:$0xff]  }
  0x2c   : > { %1736 = vmatpush3.bf16.msra.mxu0 %v2068_v22  ;;  %1690 = vmatpush3.bf16.msra.mxu1 %v1867_v6  ;;  %v1872_v22 = vld [vmem:[%s2307_s2 + $0xb8] sm:$0xff]   ;;  %v1233_v43 = vrot.slane %v362_v57, 5  ;;  %v1610_v5 = vrot.slane %v2217_v47, 9 }
  0x2d   : > { %1737 = vmatprep.subr.bf16.mxu0 %v1868_v15  ;;  %1691 = vmatprep.subr.bf16.mxu1 %v1869_v17  ;;  %v1133_v26 = vor.u32 %v1132_v56, %v1129_v55  ;;  %v1896_v6 = vld [vmem:[%s2307_s2 + $0x118] sm:$0xff]  }
  0x2e   : > { %1743 = vmatprep.mubr.msk.bf16.mxu0 %vm468_vm3, %v1588_v18  ;;  %v1234_v7 = vsel %vm2133_vm6, %v1610_v5, %v1233_v43 }
  0x2f   : > { %v1134_v62 = vrot.slane %v1133_v26, 4  ;;  %v1611_v12 = vcombine.low %v2185_v35, %v1234_v7 }
  0x30   : > { %1738 = vmatpush3.bf16.msra.mxu0 %v1868_v15  ;;  %1692 = vmatpush3.bf16.msra.mxu1 %v1869_v17 }
  0x31   : > { %1739 = vmatprep.subr.bf16.mxu0 %v1870_v21  ;;  %1693 = vmatprep.subr.bf16.mxu1 %v1871_v24  ;;  %v1139_v2 = vsel %vm2086_vm2, %v1134_v62, %v1138_v63 }
  0x34   : > { %1740 = vmatpush3.bf16.msra.mxu0 %v1870_v21  ;;  %1694 = vmatpush3.bf16.msra.mxu1 %v1871_v24 }
  0x35   : > { %1741 = vmatprep.subr.bf16.mxu0 %v1872_v22  ;;  %1699 = vmatprep.subr.bf16.mxu1 %v1874_v30 }
  0x37   : > { %1696 = vmatmul.mubr.msk.bf16.vlgmr.msra.gmra.mrb[0].mxu1 %vm468_vm3, %v1552_v33 }
  0x38   : > { %1742 = vmatpush3.bf16.msra.mxu0 %v1872_v22  ;;  %1700 = vmatpush3.bf16.msra.mxu1 %v1874_v30 }
  0x39   : > { %1747 = vmatprep.subr.bf16.mxu0 %v1875_v36  ;;  %1701 = vmatprep.subr.bf16.mxu1 %v1877_v37 }
  0x3a   : > { %1707 = vmatprep.mubr.msk.bf16.mxu1 %vm468_vm3, %v1563_v38 }
  0x3b   : > { %1744 = vmatmul.mubr.msk.bf16.vlgmr.msra.gmra.mrb[0].mxu0 %vm468_vm3, %v1589_v39 }
  0x3c   : > { %1748 = vmatpush3.bf16.msra.mxu0 %v1875_v36  ;;  %1702 = vmatpush3.bf16.msra.mxu1 %v1877_v37 }
  0x3d   : > { %1749 = vmatprep.subr.bf16.mxu0 %v1878_v40  ;;  %1703 = vmatprep.subr.bf16.mxu1 %v1879_v41 }
  0x3e   : > { %1755 = vmatprep.mubr.msk.bf16.mxu0 %vm468_vm3, %v1552_v33 }
  0x40   : > { %1750 = vmatpush3.bf16.msra.mxu0 %v1878_v40  ;;  %1704 = vmatpush3.bf16.msra.mxu1 %v1879_v41 }
  0x41   : > { %1751 = vmatprep.subr.bf16.mxu0 %v1880_v42  ;;  %1705 = vmatprep.subr.bf16.mxu1 %v1881_v44 }
  0x44   : > { %1752 = vmatpush3.bf16.msra.mxu0 %v1880_v42  ;;  %1706 = vmatpush3.bf16.msra.mxu1 %v1881_v44 }
  0x45   : > { %1753 = vmatprep.subr.bf16.mxu0 %v1882_v45  ;;  %1711 = vmatprep.subr.bf16.mxu1 %v1883_v46 }
  0x47   : > { %1708 = vmatmul.mubr.msk.bf16.vlgmr.msra.gmra.mrb[0].mxu1 %vm468_vm3, %v1564_v48 }
  0x48   : > { %1754 = vmatpush3.bf16.msra.mxu0 %v1882_v45  ;;  %1712 = vmatpush3.bf16.msra.mxu1 %v1883_v46 }
  0x49   : > { %1759 = vmatprep.subr.bf16.mxu0 %v1884_v51  ;;  %1713 = vmatprep.subr.bf16.mxu1 %v1886_v52 }
  0x4a   : > { %1719 = vmatprep.mubr.msk.bf16.mxu1 %vm468_vm3, %v1571_v53 }
  0x4b   : > { %1756 = vmatmul.mubr.msk.bf16.vlgmr.msra.gmra.mrb[0].mxu0 %vm468_vm3, %v1596_v54 }
  0x4c   : > { %1760 = vmatpush3.bf16.msra.mxu0 %v1884_v51  ;;  %1714 = vmatpush3.bf16.msra.mxu1 %v1886_v52 }
  0x4d   : > { %1761 = vmatprep.subr.bf16.mxu0 %v1887_v58  ;;  %1715 = vmatprep.subr.bf16.mxu1 %v1888_v10 }
  0x4e   : > { %1767 = vmatprep.mubr.msk.bf16.mxu0 %vm468_vm3, %v2124_v4  ;;  %v1603_v4 = vcombine.low %v2141_v14, %v1139_v2 }
  0x50   : > { %1762 = vmatpush3.bf16.msra.mxu0 %v1887_v58  ;;  %1716 = vmatpush3.bf16.msra.mxu1 %v1888_v10 }
  0x51   : > { %1763 = vmatprep.subr.bf16.mxu0 %v1889_v60  ;;  %1717 = vmatprep.subr.bf16.mxu1 %v1890_v61 }
  0x54   : > { %1764 = vmatpush3.bf16.msra.mxu0 %v1889_v60  ;;  %1718 = vmatpush3.bf16.msra.mxu1 %v1890_v61 }
  0x55   : > { %1765 = vmatprep.subr.bf16.mxu0 %v1891_v0 }
  0x57   : > { %1720 = vmatmul.mubr.msk.bf16.vlgmr.msra.gmra.mrb[0].mxu1 %vm468_vm3, %v1572_v1 }
  0x58   : > { %1766 = vmatpush3.bf16.msra.mxu0 %v1891_v0 }
  0x59   : > { %1771 = vmatprep.subr.bf16.mxu0 %v1893_v3 }
  0x5b   : > { %1768 = vmatmul.mubr.msk.bf16.vlgmr.msra.gmra.mrb[0].mxu0 %vm468_vm3, %v1603_v4 }
  0x5c   : > { %1772 = vmatpush3.bf16.msra.mxu0 %v1893_v3  ;;  %1779 = vmatprep.mubr.msk.bf16.mxu0 %vm468_vm3, %v1564_v48 }
  0x5d   : > { %1773 = vmatprep.subr.bf16.mxu0 %v1894_v29 }
  0x60   : > { %1774 = vmatpush3.bf16.msra.mxu0 %v1894_v29 }
  0x61   : > { %1775 = vmatprep.subr.bf16.mxu0 %v1895_v31 }
  0x64   : > { %1776 = vmatpush3.bf16.msra.mxu0 %v1895_v31 }
  0x65   : > { %1777 = vmatprep.subr.bf16.mxu0 %v1896_v6 }
  0x68   : > { %1778 = vmatpush3.bf16.msra.mxu0 %v1896_v6 }
  0x6b   : > { %1780 = vmatmul.mubr.msk.bf16.vlgmr.msra.gmra.mrb[0].mxu0 %vm468_vm3, %v1611_v12 }
 0x12a   : > { %v1721_v13 = vpop.f32.mrb[0].mxu1 }
 0x12b   : > { %v809_v14 = vpop.f32.mrb[1].mxu1 }
 0x12c   : > { %v1722_v15 = vpop.f32.mrb[2].mxu1 }
 0x12d   : > { %v812_v16 = vpop.f32.mrb[3].mxu1 }
 0x13e   : > { %v1781_v17 = vpop.f32.mrb[0].mxu0 }
 0x13f   : > { %v1783_v19 = vadd.f32 %v1781_v17, %v1721_v13  ;;  %v1306_v20 = vpop.f32.mrb[1].mxu0 }
 0x140   : > { %v1784_v18 = vadd.f32 %v1306_v20, %v809_v14  ;;  %v1782_v21 = vpop.f32.mrb[2].mxu0 }
 0x141   : > { %v1785_v23 = vadd.f32 %v1782_v21, %v1722_v15  ;;  %v1309_v24 = vpop.f32.mrb[3].mxu0  ;;  %v1334_v25 = vadd.f32 %v1783_v19, %v1618_v11 }
 0x142   : > { %v1786_v27 = vadd.f32 %v1309_v24, %v812_v16  ;;  %v1332_v22 = vadd.f32 %v1784_v18, %v1618_v11 }
 0x143   : > { %v1335_v28 = vadd.f32 %v1785_v23, %v1618_v11  ;;  %1349 = vrot.lane.b32.xlu1 %v1334_v25, %s1937_s19  ;;  %1339 = vst.msk [vmem:[%s338_s9 + $0x10] sm:$0xff] %vm1336_vm7, %v1334_v25 }
 0x144   : > { %v1333_v9 = vadd.f32 %v1786_v27, %v1618_v11  ;;  %1345 = vrot.lane.b32.xlu0 %v1332_v22, %s1937_s19  ;;  %1337 = vst.msk [vmem:[%s338_s9] sm:$0xff] %vm1336_vm7, %v1332_v22 }
 0x145   : > { %1340 = vst.msk [vmem:[%s338_s9 + $0x18] sm:$0xff] %vm1336_vm7, %v1335_v28 }
 0x146   : > { %1338 = vst.msk [vmem:[%s338_s9 + $0x8] sm:$0xff] %vm1336_vm7, %v1333_v9 }
 0x147   : > { %1351 = vrot.lane.b32.xlu1 %v1335_v28, %s1937_s19 }
 0x148   : > { %1347 = vrot.lane.b32.xlu0 %v1333_v9, %s1937_s19 }
 0x1b5   : > { %v1350_v32 = vpop.permute.xlu1 %1349 }
 0x1b6   : > { %1360 = vst.msk [vmem:[%s348_s11 + $0x10] sm:$0xff] %vm1357_vm8, %v1350_v32  ;;  %v1346_v30 = vpop.permute.xlu0 %1345 }
 0x1b7   : > { %1358 = vst.msk [vmem:[%s348_s11] sm:$0xff] %vm1357_vm8, %v1346_v30 }
 0x1b9   : > { %v1352_v33 = vpop.permute.xlu1 %1351 }
 0x1ba   : > { %1361 = vst.msk [vmem:[%s348_s11 + $0x18] sm:$0xff] %vm1357_vm8, %v1352_v33  ;;  %v1348_v34 = vpop.permute.xlu0 %1347 }
 0x1bb   : > { %1359 = vst.msk [vmem:[%s348_s11 + $0x8] sm:$0xff] %vm1357_vm8, %v1348_v34 }
 0x1bc PF: > { %s16_s22 = sadd.s32 1, %s1935_s22   ;;  %s2315_s18 = smov %s1927_s20 }
 0x1bd   : > { %p13_p9 = scmp.ge.s32.totalorder %s16_s22, 6   ;;  %s2316_s19 = smov %s1931_s21 }
 0x1be   : > { %s2317_s20 = smov %s2320_s23  ;;  %s2318_s21 = smov %s2324_s24 }
 0x1bf   :  { %15 = sbr.rel (!%p13_p9) target bundleno = 3 (0x3), region = 81 }

// kernel: _pfin_forward_impl.7
= control target key start
LH: loop header
LB: loop body
LE: loop exit
PB: predicated region body
PF: predicated region fallthrough
CT: control target
= control target key end

     0   :  { %s3897_s15 = smov 0   ;;  %s3899_s16 = smov 0   ;;  %s5280_s0 = inlined_call_operand.vmem [shape: bf16[2,18,18,64], index: 0, kind: input, shape index: {}]   ;;  %s5281_s1 = inlined_call_operand.vmem [shape: bf16[2,2,1,18,64], index: 1, kind: input, shape index: {}]   ;;  %s5282_s2 = inlined_call_operand.vmem [shape: bf16[2,576,64], index: 2, kind: input, shape index: {}]   ;;  %s5283_s3 = inlined_call_operand.vmem [shape: f32[1,64], index: 3, kind: input, shape index: {}]   ;;  %s5284_s4 = inlined_call_operand.vmem [shape: bf16[2,8,8,64], index: 4, kind: output, shape index: {}]  }
   0x1   :  { %s3901_s17 = smov 0   ;;  %s3903_s18 = smov 0  }
   0x2   :  { %s3905_s19 = smov 0  }
   0x3 LB: > { %s23_s20 = sadd.s32 1, %s3861_s17  ;;  %s26_s21 = sadd.s32 1, %s3865_s18  ;;  %s3869_s19 = sphi %s3905_s19, %s14_s19   ;;  %s3865_s18 = sphi %s3903_s18, %s5559_s18   ;;  %s3861_s17 = sphi %s3901_s17, %s5558_s17   ;;  %s3857_s16 = sphi %s3899_s16, %s5557_s16   ;;  %s3853_s15 = sphi %s3897_s15, %s5556_s15  }
   0x4   : > { %p24_p0 = scmp.ge.s32.totalorder %s23_s20, 2  ;;  %p3462_p1 = scmp.ge.s32.totalorder %s3869_s19, 1 }
   0x5   : > { %p220_p2 = scmp.lt.s32.totalorder %s3869_s19, 5 }
   0x6   : > { %s5561_s20 = smov (%p24_p0, %s23_s20), 0  ;;  %s5563_s21 = smov (!%p24_p0, %s26_s21), %s3865_s18 }
   0x7   : > { %p221_p3 = pnand %p3462_p1, %p220_p2  ;;  %p28_p4 = scmp.ge.s32.totalorder %s5563_s21, 2 }
   0x9   : > { %s5565_s21 = smov (%p28_p4, %s5563_s21), 0  ;;  %224 = sbr.rel (%p221_p3) target bundleno = 457 (0x1c9), region = 36 }
  0x10   : > { %p280_p5 = scmp.lt.s32.totalorder %s3857_s16, 1  ;;  %s3463_s22 = sshll.u32 %s3853_s15, 3  ;;  %v373_v0 = vlaneseq  ;;  %v3871_v1 = vmov 1966171168   ;;  %vm1429_vm0 = vcmask 1041409   ;;  %vm1432_vm1 = vcmask 1042434  }
  0x11   : > { %p282_p6 = scmp.lt.s32.totalorder %s3463_s22, 17  ;;  %p297_p7 = scmp.lt.s32.totalorder %s3853_s15, 1  ;;  %v371_v2 = vunpack.c.l.s4 %v3871_v1  ;;  %vm1435_vm2 = vcmask 1043459   ;;  %vm1438_vm3 = vcmask 1044484   ;;  %vm1441_vm4 = vcmask 1045509  }
  0x12   : > { %s5567_s16 = smov (!%p280_p5, %s3857_s16), 1  ;;  %v374_v3 = vshrl.u32 %v373_v0, 7  ;;  %vm1444_vm5 = vcmask 1046534   ;;  %vm1447_vm6 = vcmask 1047559   ;;  %vm1517_vm7 = vcmask 523264  }
  0x13   : > { %s5569_s22 = smov (!%p282_p6, %s3463_s22), 17  ;;  %s3752_s23 = smul.u32 288, %s5567_s16  ;;  %v372_v6 = vunpack.c.0.s8 %v371_v2  ;;  %vm3327_vm8 = vcmask 519168  }
  0x14   : > { %s3748_s24 = smul.u32 3, %s5569_s22 }
  0x15   : > { %s3937_s27 = scalar_lea.vmem %s5282_s2, %s3752_s23  ;;  %s3749_s28 = smul.u32 54, %s5567_s16  ;;  %v3953_v11 = vsub.s32 %v372_v6, %v374_v3 }
  0x16   : > { %v3794_v4 = vld [vmem:[%s3937_s27 + $0x20] sm:$0xff]   ;;  %s298_s29 = scalar_select %p297_p7, %s3853_s15, 1  ;;  %v3796_v7 = vld [vmem:[%s3937_s27 + $0x28] sm:$0xff]   ;;  %v3798_v9 = vld [vmem:[%s3937_s27 + $0x30] sm:$0xff]  }
  0x17   : > { %v3795_v5 = vld [vmem:[%s3937_s27 + $0x80] sm:$0xff]   ;;  %s286_s30 = sadd.s32 %s3749_s28, %s3748_s24  ;;  %s3751_s5 = smul.u32 6, %s5567_s16  ;;  %3608 = vmatprep.subr.bf16.mxu1 %v3794_v4  ;;  %v3797_v8 = vld [vmem:[%s3937_s27 + $0x88] sm:$0xff]   ;;  %v3799_v10 = vld [vmem:[%s3937_s27 + $0x90] sm:$0xff]  }
  0x18   : > { %s3464_s6 = sshll.u32 %s286_s30, 2  ;;  %3656 = vmatprep.subr.bf16.mxu0 %v3795_v5  ;;  %3609 = vmatpush3.bf16.msra.mxu1 %v3794_v4  ;;  %s3750_s7 = smul.u32 3, %s298_s29  ;;  %v3800_v12 = vld [vmem:[%s3937_s27 + $0x38] sm:$0xff]   ;;  %v3968_v23 = vld [vmem:[%s3937_s27] sm:$0xff]  }
  0x19   : > { %3657 = vmatpush3.bf16.msra.mxu0 %v3795_v5  ;;  %3610 = vmatprep.subr.bf16.mxu1 %v3796_v7  ;;  %s3951_s10 = scalar_lea.vmem %s5280_s0, %s3464_s6  ;;  %v3801_v13 = vld [vmem:[%s3937_s27 + $0x98] sm:$0xff]   ;;  %v3803_v26 = vld [vmem:[%s3937_s27 + $0xa0] sm:$0xff]   ;;  %s3467_s23 = sshll.u32 %s3853_s15, 2 }
  0x1a   : > { %3658 = vmatprep.subr.bf16.mxu0 %v3797_v8  ;;  %s301_s11 = sadd.s32 %s3751_s5, %s3750_s7  ;;  %v3470_v14 = vld.sshfl [vmem:[%s3951_s10] sm:$0x33 pattern:$0x75316420]  ;;  %p312_p8 = scmp.lt.s32.totalorder %s3467_s23, 7 }
  0x1b   : > { %v3471_v15 = vld.sshfl [vmem:[%s3951_s10 + $0x4] sm:$0x33 pattern:$0x75316420]  ;;  %v369_v16 = vcombine.high %v3470_v14, %v3470_v14  ;;  %v3960_v17 = vrot.slane %v3470_v14, %v3953_v11  ;;  %s3465_s12 = sshll.u32 %s301_s11, 2  ;;  %s3468_s24 = sshll.u32 %s5567_s16, 3 }
  0x1c   : > { %3611 = vmatpush3.bf16.msra.mxu1 %v3796_v7  ;;  %v3473_v18 = vld.sshfl [vmem:[%s3951_s10 + $0x18] sm:$0x33 pattern:$0x75316420]  ;;  %v393_v19 = vcombine.high %v3471_v15, %v3471_v15  ;;  %v3964_v20 = vrot.slane %v3471_v15, %v3953_v11  ;;  %s3975_s22 = scalar_lea.vmem %s5281_s1, %s3465_s12  ;;  %s5571_s23 = smov (!%p312_p8, %s3467_s23), 7 }
  0x1d   : > { %3659 = vmatpush3.bf16.msra.mxu0 %v3797_v8  ;;  %3612 = vmatprep.subr.bf16.mxu1 %v3798_v9  ;;  %v3474_v21 = vld.sshfl [vmem:[%s3951_s10 + $0x1c] sm:$0x33 pattern:$0x75316420]  ;;  %v431_v22 = vcombine.high %v3473_v18, %v3473_v18  ;;  %v383_v28 = vrot.slane %v369_v16, %v3953_v11  ;;  %v384_v29 = vcombine.high %v3960_v17, %v3960_v17  ;;  %s315_s25 = sadd.s32 %s3468_s24, %s5571_s23 }
  0x1e   : > { %3660 = vmatprep.subr.bf16.mxu0 %v3799_v10  ;;  %v3476_v24 = vld.sshfl [vmem:[%s3951_s10 + $0x30] sm:$0x33 pattern:$0x75316420]  ;;  %v455_v25 = vcombine.high %v3474_v21, %v3474_v21  ;;  %v407_v31 = vrot.slane %v393_v19, %v3953_v11  ;;  %v408_v32 = vcombine.high %v3964_v20, %v3964_v20  ;;  %v3986_v33 = vrot.slane %v3473_v18, %v3953_v11  ;;  %s3469_s28 = sshll.u32 %s315_s25, 2 }
  0x1f   : > { %v3477_v27 = vld.sshfl [vmem:[%s3951_s10 + $0x34] sm:$0x33 pattern:$0x75316420]  ;;  %v493_v34 = vcombine.high %v3476_v24, %v3476_v24  ;;  %v445_v36 = vrot.slane %v431_v22, %v3953_v11  ;;  %v3991_v37 = vrot.slane %v3474_v21, %v3953_v11  ;;  %v3998_v41 = vrot.slane %v3476_v24, %v3953_v11  ;;  %s317_s29 = scalar_lea.vmem %s5284_s4, %s3469_s28 }
  0x20   : > { %3613 = vmatpush3.bf16.msra.mxu1 %v3798_v9  ;;  %v3479_v30 = vld.sshfl [vmem:[%s3951_s10 + $0x48] sm:$0x33 pattern:$0x75316420]  ;;  %v3994_v38 = vrot.slane %v455_v25, %v3953_v11  ;;  %v517_v39 = vcombine.high %v3477_v27, %v3477_v27  ;;  %v4004_v43 = vrot.slane %v3477_v27, %v3953_v11  ;;  %v385_v45 = vcombine.high %v383_v28, %v383_v28 }
  0x21   : > { %3661 = vmatpush3.bf16.msra.mxu0 %v3799_v10  ;;  %3614 = vmatprep.subr.bf16.mxu1 %v3800_v12  ;;  %v3480_v35 = vld.sshfl [vmem:[%s3951_s10 + $0x4c] sm:$0x33 pattern:$0x75316420]  ;;  %v4001_v42 = vrot.slane %v493_v34, %v3953_v11  ;;  %v555_v44 = vcombine.high %v3479_v30, %v3479_v30  ;;  %v4010_v47 = vrot.slane %v3479_v30, %v3953_v11 }
  0x22   : > { %3662 = vmatprep.subr.bf16.mxu0 %v3801_v13  ;;  %v3482_v40 = vld.sshfl [vmem:[%s3975_s22] sm:$0x33 pattern:$0x75316420]  ;;  %v4007_v46 = vrot.slane %v517_v39, %v3953_v11  ;;  %v579_v48 = vcombine.high %v3480_v35, %v3480_v35  ;;  %v409_v49 = vcombine.high %v407_v31, %v407_v31  ;;  %v446_v50 = vcombine.high %v3986_v33, %v3986_v33 }
  0x23   : > { %v4016_v51 = vrot.slane %v555_v44, %v3953_v11  ;;  %v4019_v52 = vrot.slane %v3480_v35, %v3953_v11  ;;  %v447_v53 = vcombine.high %v445_v36, %v445_v36  ;;  %v470_v54 = vcombine.high %v3991_v37, %v3991_v37  ;;  %v4026_v57 = vld.sshfl [vmem:[%s3975_s22 + $0x4] sm:$0x33 pattern:$0x75316420] }
  0x24   : > { %3615 = vmatpush3.bf16.msra.mxu1 %v3800_v12  ;;  %v471_v55 = vcombine.high %v3994_v38, %v3994_v38  ;;  %v617_v56 = vcombine.high %v3482_v40, %v3482_v40  ;;  %v508_v58 = vcombine.high %v3998_v41, %v3998_v41  ;;  %v509_v59 = vcombine.high %v4001_v42, %v4001_v42 }
  0x25   : > { %3663 = vmatpush3.bf16.msra.mxu0 %v3801_v13  ;;  %3620 = vmatprep.subr.bf16.mxu1 %v3968_v23  ;;  %v532_v60 = vcombine.high %v4004_v43, %v4004_v43  ;;  %v4035_v61 = vrot.slane %v579_v48, %v3953_v11  ;;  %v533_v62 = vcombine.high %v4007_v46, %v4007_v46 }
  0x26   : > { %3668 = vmatprep.subr.bf16.mxu0 %v3803_v26  ;;  %v570_v63 = vcombine.high %v4010_v47, %v4010_v47  ;;  %v4042_v0 = vrot.slane %v3482_v40, %v3953_v11  ;;  %v954_v1 = vrot.slane %v3960_v17, %v3953_v11  ;;  %v571_v2 = vcombine.high %v4016_v51, %v4016_v51 }
  0x27   : > { %v594_v3 = vcombine.high %v4019_v52, %v4019_v52  ;;  %v968_v4 = vrot.slane %v383_v28, %v3953_v11  ;;  %v4052_v5 = vrot.slane %v384_v29, %v3953_v11  ;;  %v4055_v6 = vrot.slane %v617_v56, %v3953_v11 }
  0x28   : > { %v641_v7 = vcombine.high %v4026_v57, %v4026_v57  ;;  %v4060_v8 = vrot.slane %v385_v45, %v3953_v11  ;;  %v1010_v9 = vrot.slane %v3964_v20, %v3953_v11  ;;  %v595_v10 = vcombine.high %v4035_v61, %v4035_v61 }
  0x29   : > { %v4067_v12 = vrot.slane %v954_v1, %v3953_v11  ;;  %v975_v13 = vrot.slane %v968_v4, %v3953_v11  ;;  %v1024_v14 = vrot.slane %v407_v31, %v3953_v11  ;;  %v989_v15 = vrot.slane %v4052_v5, %v3953_v11 }
  0x2a   : > { %v1003_v16 = vrot.slane %v4060_v8, %v3953_v11  ;;  %v4076_v17 = vrot.slane %v408_v32, %v3953_v11  ;;  %v4079_v18 = vrot.slane %v409_v49, %v3953_v11  ;;  %v4082_v19 = vrot.slane %v1010_v9, %v3953_v11 }
  0x2b   : > { %v1066_v20 = vrot.slane %v3986_v33, %v3953_v11  ;;  %v1080_v21 = vrot.slane %v445_v36, %v3953_v11  ;;  %v4088_v22 = vrot.slane %v446_v50, %v3953_v11  ;;  %v4091_v24 = vrot.slane %v1024_v14, %v3953_v11 }
  0x2c   : > { %v1045_v25 = vrot.slane %v4076_v17, %v3953_v11  ;;  %v1108_v26 = vrot.slane %v447_v53, %v3953_v11  ;;  %v1122_v27 = vrot.slane %v3991_v37, %v3953_v11  ;;  %v1059_v28 = vrot.slane %v4079_v18, %v3953_v11 }
  0x2d   : > { %v4101_v29 = vrot.slane %v1066_v20, %v3953_v11  ;;  %v1087_v30 = vrot.slane %v1080_v21, %v3953_v11  ;;  %v1136_v31 = vrot.slane %v3994_v38, %v3953_v11  ;;  %v1101_v32 = vrot.slane %v4088_v22, %v3953_v11 }
  0x2e   : > { %v1115_v33 = vrot.slane %v1108_v26, %v3953_v11  ;;  %v1150_v34 = vrot.slane %v470_v54, %v3953_v11  ;;  %v1164_v35 = vrot.slane %v471_v55, %v3953_v11  ;;  %v4112_v36 = vrot.slane %v1122_v27, %v3953_v11 }
  0x2f   : > { %v1178_v37 = vrot.slane %v3998_v41, %v3953_v11  ;;  %v1192_v39 = vrot.slane %v4001_v42, %v3953_v11  ;;  %v1206_v38 = vrot.slane %v508_v58, %v3953_v11  ;;  %v4120_v40 = vrot.slane %v1136_v31, %v3953_v11 }
  0x30   : > { %v1157_v44 = vrot.slane %v1150_v34, %v3953_v11  ;;  %v1220_v45 = vrot.slane %v509_v59, %v3953_v11  ;;  %v1234_v48 = vrot.slane %v4004_v43, %v3953_v11  ;;  %v1171_v49 = vrot.slane %v1164_v35, %v3953_v11 }
  0x31   : > { %v4128_v50 = vrot.slane %v1178_v37, %v3953_v11  ;;  %v1199_v41 = vrot.slane %v1192_v39, %v3953_v11  ;;  %v1248_v42 = vrot.slane %v4007_v46, %v3953_v11  ;;  %v1213_v53 = vrot.slane %v1206_v38, %v3953_v11 }
  0x32   : > { %v1227_v54 = vrot.slane %v1220_v45, %v3953_v11  ;;  %v1262_v55 = vrot.slane %v532_v60, %v3953_v11  ;;  %v1276_v56 = vrot.slane %v533_v62, %v3953_v11  ;;  %v4138_v43 = vrot.slane %v1234_v48, %v3953_v11 }
  0x33   : > { %v1290_v58 = vrot.slane %v4010_v47, %v3953_v11  ;;  %v1304_v59 = vrot.slane %v4016_v51, %v3953_v11  ;;  %v1318_v1 = vrot.slane %v570_v63, %v3953_v11  ;;  %v4146_v46 = vrot.slane %v1248_v42, %v3953_v11 }
  0x34   : > { %v1269_v4 = vrot.slane %v1262_v55, %v3953_v11  ;;  %v1332_v60 = vrot.slane %v571_v2, %v3953_v11  ;;  %v1346_v62 = vrot.slane %v4019_v52, %v3953_v11  ;;  %v1283_v5 = vrot.slane %v1276_v56, %v3953_v11 }
  0x35   : > { %v4154_v8 = vrot.slane %v1290_v58, %v3953_v11  ;;  %v1311_v47 = vrot.slane %v1304_v59, %v3953_v11  ;;  %v1360_v51 = vrot.slane %v4035_v61, %v3953_v11  ;;  %v1325_v63 = vrot.slane %v1318_v1, %v3953_v11 }
  0x36   : > { %v1339_v9 = vrot.slane %v1332_v60, %v3953_v11  ;;  %v1374_v14 = vrot.slane %v594_v3, %v3953_v11  ;;  %v4163_v2 = vrot.slane %v595_v10, %v3953_v11  ;;  %v4166_v52 = vrot.slane %v1346_v62, %v3953_v11 }
  0x37   : > { %5356 = vst [vmem:[#allocation2_spill] sm:$0xff] %v4154_v8  ;;  %v4169_v17 = vrot.slane %v1360_v51, %v3953_v11  ;;  %v5285_v18 = vunpack.c.l.b16 %v4067_v12  ;;  %v4172_v20 = vunpack.c.l.b16 %v975_v13  ;;  %v4177_v21 = vunpack.c.l.b16 %v989_v15 }
  0x38   : > { %v1381_v61 = vrot.slane %v1374_v14, %v3953_v11  ;;  %v1395_v3 = vrot.slane %v4163_v2, %v3953_v11  ;;  %v4179_v10 = vunpack.c.l.b16 %v1003_v16  ;;  %v1400_v22 = vunpack.c.l.b16 %v4082_v19 }
  0x39   : > { %v5289_v26 = vunpack.c.l.b16 %v4091_v24  ;;  %v4183_v27 = vunpack.c.l.b16 %v1045_v25  ;;  %v4185_v31 = vunpack.c.l.b16 %v1059_v28  ;;  %v5286_v13 = vunpack.c.l.b16 %v4101_v29 }
  0x3a   : > { %v4188_v34 = vunpack.c.l.b16 %v1087_v30  ;;  %v4190_v35 = vunpack.c.l.b16 %v1101_v32  ;;  %v4192_v15 = vunpack.c.l.b16 %v1115_v33  ;;  %v5288_v16 = vunpack.c.l.b16 %v4112_v36 }
  0x3b   : > { %v5291_v37 = vunpack.c.l.b16 %v4120_v40  ;;  %v4196_v39 = vunpack.c.l.b16 %v1157_v44  ;;  %v4198_v25 = vunpack.c.l.b16 %v1171_v49  ;;  %v5293_v28 = vunpack.c.l.b16 %v4128_v50 }
  0x3c   : > { %v4201_v38 = vunpack.c.l.b16 %v1199_v41  ;;  %v4203_v30 = vunpack.c.l.b16 %v1213_v53  ;;  %v4205_v32 = vunpack.c.l.b16 %v1227_v54  ;;  %v5302_v33 = vunpack.c.l.b16 %v4138_v43 }
  0x3d   : > { %v5301_v45 = vunpack.c.l.b16 %v4146_v46  ;;  %v4209_v48 = vunpack.c.l.b16 %v1269_v4  ;;  %v4211_v42 = vunpack.c.l.b16 %v1283_v5  ;;  %v5299_v44 = vunpack.c.l.b16 %v4154_v8 }
  0x3e   : > { %v4214_v49 = vunpack.c.l.b16 %v1311_v47  ;;  %v4216_v55 = vunpack.c.l.b16 %v1325_v63  ;;  %v4218_v41 = vunpack.c.l.b16 %v1339_v9  ;;  %v5300_v53 = vunpack.c.l.b16 %v4166_v52 }
  0x3f   : > { %5357 = vst [vmem:[#allocation3_spill] sm:$0xff] %v4209_v48  ;;  %5358 = vst [vmem:[#allocation4_spill] sm:$0xff] %v4211_v42  ;;  %v5303_v54 = vunpack.c.l.b16 %v4169_v17  ;;  %v4222_v56 = vunpack.c.l.b16 %v1381_v61  ;;  %v1428_v58 = vrot.slane %v5285_v18, 1  ;;  %v5287_v59 = vrot.slane %v4177_v21, 7 }
  0x40   : > { %5359 = vst [vmem:[#allocation5_spill] sm:$0xff] %v4214_v49  ;;  %5360 = vst [vmem:[#allocation6_spill] sm:$0xff] %v4216_v55  ;;  %v5290_v1 = vrot.slane %v4179_v10, 6  ;;  %v4230_v4 = vrot.slane %v1400_v22, 5  ;;  %v4234_v60 = vrot.slane %v5289_v26, 4  ;;  %v5295_v5 = vrot.slane %v4183_v27, 3 }
  0x41   : > { %5361 = vst [vmem:[#allocation7_spill] sm:$0xff] %v4218_v41  ;;  %5362 = vst [vmem:[#allocation8_spill] sm:$0xff] %v4222_v56  ;;  %v1430_v62 = vsel %vm1429_vm0, %v4172_v20, %v1428_v58  ;;  %v5296_v47 = vrot.slane %v4185_v31, 2  ;;  %v1449_v51 = vrot.slane %v5286_v13, 1  ;;  %v5292_v9 = vrot.slane %v4190_v35, 7 }
  0x42   : > { %5363 = vst [vmem:[#allocation9_spill] sm:$0xff] %v4230_v4  ;;  %5364 = vst [vmem:[#allocation10_spill] sm:$0xff] %v4234_v60  ;;  %v1433_v63 = vsel %vm1432_vm1, %v5287_v59, %v1430_v62  ;;  %v5294_v14 = vrot.slane %v4192_v15, 6  ;;  %v4249_v61 = vrot.slane %v5288_v16, 5  ;;  %v4258_v13 = vrot.slane %v5291_v37, 4 }
  0x43   : > { %v1436_v58 = vsel %vm1435_vm2, %v5290_v1, %v1433_v63  ;;  %v1450_v18 = vsel %vm1429_vm0, %v4188_v34, %v1449_v51  ;;  %v5297_v62 = vrot.slane %v4196_v39, 3  ;;  %v5298_v26 = vrot.slane %v4198_v25, 2 }
  0x44   : > { %5365 = vst [vmem:[#allocation11_spill] sm:$0xff] %v4249_v61  ;;  %5366 = vst [vmem:[#allocation12_spill] sm:$0xff] %v4258_v13  ;;  %v1439_v59 = vsel %vm1438_vm3, %v4230_v4, %v1436_v58  ;;  %v1452_v16 = vsel %vm1432_vm1, %v5292_v9, %v1450_v18  ;;  %v1463_v63 = vrot.slane %v5293_v28, 1  ;;  %v1465_v37 = vrot.slane %v4203_v30, 7 }
  0x45   : > { %v1442_v51 = vsel %vm1441_vm4, %v4234_v60, %v1439_v59  ;;  %v1454_v1 = vsel %vm1435_vm2, %v5294_v14, %v1452_v16  ;;  %v5308_v58 = vrot.slane %v4205_v32, 6  ;;  %v4285_v59 = vrot.slane %v5302_v33, 5 }
  0x46   : > { %v1445_v18 = vsel %vm1444_vm5, %v5295_v5, %v1442_v51  ;;  %v1456_v9 = vsel %vm1438_vm3, %v4249_v61, %v1454_v1  ;;  %v1464_v28 = vsel %vm1429_vm0, %v4201_v38, %v1463_v63  ;;  %v4290_v16 = vunpack.c.l.b16 %v1395_v3 }
  0x47   : > { %v1458_v14 = vsel %vm1441_vm4, %v4258_v13, %v1456_v9  ;;  %v1466_v51 = vsel %vm1432_vm1, %v1465_v37, %v1464_v28  ;;  %v4297_v1 = vrot.slane %v5301_v45, 4  ;;  %v1448_v63 = vsel %vm1447_vm6, %v5296_v47, %v1445_v18 }
  0x48   : > { %5367 = vst [vmem:[#allocation13_spill] sm:$0xff] %v4290_v16  ;;  %v1460_v5 = vsel %vm1444_vm5, %v5297_v62, %v1458_v14  ;;  %v1468_v2 = vsel %vm1435_vm2, %v5308_v58, %v1466_v51  ;;  %v5307_v3 = vrot.slane %v4209_v48, 3  ;;  %v1477_v18 = vrot.slane %v5299_v44, 1 }
  0x49   : > { %v4312_v28 = vsel %vm1447_vm6, %v5298_v26, %v1460_v5  ;;  %v1470_v9 = vsel %vm1438_vm3, %v4285_v59, %v1468_v2  ;;  %v5305_v47 = vrot.slane %v4216_v55, 7  ;;  %v4321_v14 = vrot.slane %v4026_v57, %v3953_v11 }
  0x4a   : > { %5368 = vst [vmem:[#allocation14_spill] sm:$0xff] %v4312_v28  ;;  %v1472_v51 = vsel %vm1441_vm4, %v4297_v1, %v1470_v9  ;;  %v5304_v62 = vrot.slane %v4218_v41, 6  ;;  %v4328_v5 = vrot.slane %v5300_v53, 5  ;;  %v4334_v2 = vrot.slane %v641_v7, %v3953_v11 }
  0x4b   : > { %v5306_v26 = vrot.slane %v4211_v42, 2  ;;  %v1478_v44 = vsel %vm1429_vm0, %v4214_v49, %v1477_v18  ;;  %v4341_v9 = vrot.slane %v5303_v54, 4  ;;  %v1474_v53 = vsel %vm1444_vm5, %v5307_v3, %v1472_v51 }
  0x4c   : > { %5369 = vst [vmem:[#allocation15_spill] sm:$0xff] %v4328_v5  ;;  %v1480_v45 = vsel %vm1432_vm1, %v5305_v47, %v1478_v44  ;;  %v5309_v57 = vrot.slane %v4222_v56, 3  ;;  %v1491_v7 = vpack.c.b16 %v4312_v28, %v1448_v63  ;;  %v5310_v33 = vrot.slane %v4290_v16, 2 }
  0x4d   : > { %5370 = vst [vmem:[#allocation16_spill] sm:$0xff] %v4341_v9  ;;  %v1482_v18 = vsel %vm1435_vm2, %v5304_v62, %v1480_v45  ;;  %v632_v51 = vcombine.high %v4042_v0, %v4042_v0  ;;  %v4363_v44 = vsel %vm1447_vm6, %v5306_v26, %v1474_v53  ;;  %v633_v45 = vcombine.high %v4055_v6, %v4055_v6  ;;  %v3806_v26 = vld [vmem:[%s3937_s27 + $0x10] sm:$0xff]  }
  0x4e   : > { %v1484_v54 = vsel %vm1438_vm3, %v4328_v5, %v1482_v18  ;;  %3616 = vmatprep.mubr.msk.bf16.mxu1 %vm1517_vm7, %v1491_v7  ;;  %5371 = vst [vmem:[#allocation17_spill] sm:$0xff] %v4363_v44  ;;  %v656_v18 = vcombine.high %v4321_v14, %v4321_v14  ;;  %v657_v7 = vcombine.high %v4334_v2, %v4334_v2  ;;  %v4388_v58 = vrot.slane %v1400_v22, 4 }
  0x4f   : > { %v1486_v63 = vsel %vm1441_vm4, %v4341_v9, %v1484_v54  ;;  %v2928_v54 = vrot.slane %v4321_v14, %v3953_v11 }
  0x50   : > { %v1488_v62 = vsel %vm1444_vm5, %v5309_v57, %v1486_v63  ;;  %v5373_v63 = vunpack.c.l.b16 %v4091_v24  ;;  %v5375_v24 = vunpack.c.l.b16 %v4120_v40  ;;  %v5376_v40 = vrot.slane %v4205_v32, 6 }
  0x51   : > { %v4379_v53 = vsel %vm1447_vm6, %v5310_v33, %v1488_v62  ;;  %v3804_v33 = vld [vmem:[%s3937_s27 + $0x8] sm:$0xff]   ;;  %v2900_v62 = vrot.slane %v632_v51, %v3953_v11  ;;  %v5377_v51 = vunpack.c.l.b16 %v4138_v43  ;;  %v2970_v43 = vrot.slane %v657_v7, %v3953_v11  ;;  %v4488_v7 = vld [vmem:[%s3937_s27 + $0x40] sm:$0xff]  }
  0x52   : > { %5372 = vst [vmem:[#allocation18_spill] sm:$0xff] %v4379_v53  ;;  %v1492_v3 = vpack.c.b16 %v4379_v53, %v4363_v44  ;;  %v4392_v57 = vrot.slane %v5373_v63, 3  ;;  %v5374_v53 = vunpack.c.l.b16 %v4112_v36  ;;  %v4406_v22 = vrot.slane %v5375_v24, 3  ;;  %5391 = vst [vmem:[#allocation27_spill] sm:$0xff] %v4488_v7 }
  0x53   : > { %v1794_v36 = vsel %vm1429_vm0, %v1465_v37, %v4201_v38  ;;  %v2907_v37 = vrot.slane %v2900_v62, %v3953_v11  ;;  %v5383_v62 = vrot.slane %v4211_v42, 2 }
  0x54   : > { %v4402_v19 = vrot.slane %v5374_v53, 4  ;;  %3617 = vmatmul.mubr.msk.bf16.vlgmr.msra.gmra.mrb[0].mxu1 %vm1517_vm7, %v1492_v3  ;;  %v2872_v53 = vrot.slane %v4042_v0, %v3953_v11  ;;  %v1795_v24 = vsel %vm1432_vm1, %v5376_v40, %v1794_v36  ;;  %v2914_v3 = vrot.slane %v633_v45, %v3953_v11 }
  0x55   : > { %3621 = vmatpush3.bf16.msra.mxu1 %v3968_v23  ;;  %v1796_v0 = vsel %vm1435_vm2, %v4285_v59, %v1795_v24  ;;  %v2886_v23 = vrot.slane %v4055_v6, %v3953_v11  ;;  %v2942_v36 = vrot.slane %v4334_v2, %v3953_v11  ;;  %v4435_v45 = vrot.slane %v5377_v51, 4 }
  0x56   : > { %3622 = vmatprep.subr.bf16.mxu1 %v3804_v33  ;;  %v1797_v14 = vsel %vm1438_vm3, %v4297_v1, %v1796_v0  ;;  %v4440_v40 = vrot.slane %v2872_v53, %v3953_v11  ;;  %v5380_v59 = vrot.slane %v4209_v48, 3  ;;  %v2921_v24 = vrot.slane %v2914_v3, %v3953_v11  ;;  %v3486_v53 = vld.sshfl [vmem:[%s3951_s10 + $0x10] sm:$0x33 pattern:$0x75316420] }
  0x57   : > { %5378 = vst [vmem:[#allocation19_spill] sm:$0xff] %v4435_v45  ;;  %v2956_v2 = vrot.slane %v656_v18, %v3953_v11  ;;  %v5381_v51 = vunpack.c.l.b16 %v4146_v46  ;;  %v2935_v3 = vrot.slane %v2928_v54, %v3953_v11  ;;  %v3808_v18 = vld [vmem:[%s3937_s27 + $0x18] sm:$0xff]   ;;  %v2949_v46 = vrot.slane %v2942_v36, %v3953_v11  ;;  %v3485_v54 = vld.sshfl [vmem:[%s3951_s10 + $0xc] sm:$0x33 pattern:$0x75316420] }
  0x58   : > { %5379 = vst [vmem:[#allocation20_spill] sm:$0xff] %v4440_v40  ;;  %v1798_v6 = vsel %vm1441_vm4, %v5380_v59, %v1797_v14  ;;  %v4464_v14 = vunpack.c.l.b16 %v2907_v37  ;;  %v5386_v36 = vunpack.c.l.b16 %v4166_v52  ;;  %v4478_v63 = vunpack.c.l.b16 %v2921_v24 }
  0x59   : > { %3623 = vmatpush3.bf16.msra.mxu1 %v3804_v33  ;;  %v4451_v1 = vrot.slane %v5381_v51, 3  ;;  %v4457_v0 = vsel %vm1444_vm5, %v5383_v62, %v1798_v6  ;;  %v2893_v33 = vrot.slane %v2886_v23, %v3953_v11  ;;  %v2963_v51 = vrot.slane %v2956_v2, %v3953_v11 }
  0x5a   : > { %5384 = vst [vmem:[#allocation22_spill] sm:$0xff] %v4457_v0  ;;  %3624 = vmatprep.subr.bf16.mxu1 %v3806_v26  ;;  %5385 = vst [vmem:[#allocation23_spill] sm:$0xff] %v4464_v14  ;;  %v2977_v6 = vrot.slane %v2970_v43, %v3953_v11  ;;  %v5313_v62 = vunpack.c.l.b16 %v4440_v40  ;;  %v4476_v37 = vrot.slane %v5386_v36, 4  ;;  %v5389_v2 = vunpack.c.l.b16 %v4169_v17 }
  0x5b   : > { %5382 = vst [vmem:[#allocation21_spill] sm:$0xff] %v4451_v1  ;;  %5388 = vst [vmem:[#allocation25_spill] sm:$0xff] %v4478_v63  ;;  %v2982_v9 = vunpack.c.l.b16 %v2935_v3  ;;  %v4491_v36 = vunpack.c.l.b16 %v2893_v33  ;;  %v2983_v24 = vunpack.c.l.b16 %v2949_v46  ;;  %v3488_v17 = vld.sshfl [vmem:[%s3951_s10 + $0x24] sm:$0x33 pattern:$0x75316420]  ;;  %v691_v0 = vcombine.high %v3485_v54, %v3485_v54 }
  0x5c   : > { %5387 = vst [vmem:[#allocation24_spill] sm:$0xff] %v4476_v37  ;;  %v4482_v59 = vrot.slane %v5389_v2, 3  ;;  %v3093_v47 = vrot.slane %v5313_v62, 1  ;;  %v4495_v2 = vunpack.c.l.b16 %v2963_v51  ;;  %v4497_v23 = vunpack.c.l.b16 %v2977_v6 }
  0x5d   : > { %3625 = vmatpush3.bf16.msra.mxu1 %v3806_v26  ;;  %v698_v52 = vrot.slane %v3485_v54, %v3953_v11  ;;  %v715_v33 = vcombine.high %v3486_v53, %v3486_v53  ;;  %v4504_v46 = vrot.slane %v2982_v9, 4  ;;  %v3489_v26 = vld.sshfl [vmem:[%s3951_s10 + $0x28] sm:$0x33 pattern:$0x75316420]  ;;  %v722_v6 = vrot.slane %v3486_v53, %v3953_v11 }
  0x5e   : > { %5390 = vst [vmem:[#allocation26_spill] sm:$0xff] %v4482_v59  ;;  %3626 = vmatprep.subr.bf16.mxu1 %v3808_v18  ;;  %5392 = vst [vmem:[#allocation28_spill] sm:$0xff] %v4495_v2  ;;  %v3094_v51 = vsel %vm1429_vm0, %v4491_v36, %v3093_v47  ;;  %v753_v5 = vcombine.high %v3488_v17, %v3488_v17  ;;  %v4511_v3 = vrot.slane %v2983_v24, 3  ;;  %v4517_v28 = vrot.slane %v2982_v9, 5 }
  0x5f   : > { %5393 = vst [vmem:[#allocation29_spill] sm:$0xff] %v4497_v23  ;;  %5394 = vst [vmem:[#allocation30_spill] sm:$0xff] %v4504_v46  ;;  %v705_v62 = vrot.slane %v691_v0, %v3953_v11  ;;  %v729_v43 = vrot.slane %v715_v33, %v3953_v11  ;;  %v760_v54 = vrot.slane %v3488_v17, %v3953_v11  ;;  %v5397_v46 = vrot.slane %v4464_v14, 7 }
  0x60   : > { %5395 = vst [vmem:[#allocation31_spill] sm:$0xff] %v4511_v3  ;;  %5396 = vst [vmem:[#allocation32_spill] sm:$0xff] %v4517_v28  ;;  %v706_v44 = vcombine.high %v698_v52, %v698_v52  ;;  %v767_v47 = vrot.slane %v753_v5, %v3953_v11  ;;  %v777_v13 = vcombine.high %v3489_v26, %v3489_v26  ;;  %v5399_v53 = vrot.slane %v4478_v63, 6 }
  0x61   : > { %3627 = vmatpush3.bf16.msra.mxu1 %v3808_v18  ;;  %v3096_v40 = vsel %vm1432_vm1, %v5397_v46, %v3094_v51  ;;  %v707_v3 = vcombine.high %v705_v62, %v705_v62  ;;  %v730_v33 = vcombine.high %v722_v6, %v722_v6  ;;  %v731_v61 = vcombine.high %v729_v43, %v729_v43 }
  0x62   : > { %3632 = vmatprep.subr.bf16.mxu1 %v4488_v7  ;;  %v784_v17 = vrot.slane %v3489_v26, %v3953_v11  ;;  %v4526_v18 = vrot.slane %v2983_v24, 4  ;;  %v768_v9 = vcombine.high %v760_v54, %v760_v54  ;;  %v769_v28 = vcombine.high %v767_v47, %v767_v47  ;;  %v3494_v7 = vld.sshfl [vmem:[%s3951_s10 + $0x54] sm:$0x33 pattern:$0x75316420] }
  0x63   : > { %v791_v5 = vrot.slane %v777_v13, %v3953_v11  ;;  %v4532_v2 = vsel %vm1435_vm2, %v5399_v53, %v3096_v40  ;;  %v1909_v46 = vrot.slane %v698_v52, %v3953_v11  ;;  %v1923_v51 = vrot.slane %v705_v62, %v3953_v11 }
  0x64   : > { %5398 = vst [vmem:[#allocation33_spill] sm:$0xff] %v4526_v18  ;;  %5400 = vst [vmem:[#allocation34_spill] sm:$0xff] %v4532_v2  ;;  %v1937_v0 = vrot.slane %v706_v44, %v3953_v11  ;;  %v792_v23 = vcombine.high %v784_v17, %v784_v17  ;;  %v1951_v26 = vrot.slane %v707_v3, %v3953_v11 }
  0x65   : > { %v1965_v24 = vrot.slane %v722_v6, %v3953_v11  ;;  %v1979_v18 = vrot.slane %v729_v43, %v3953_v11  ;;  %v793_v14 = vcombine.high %v791_v5, %v791_v5  ;;  %v1993_v13 = vrot.slane %v730_v33, %v3953_v11 }
  0x66   : > { %v2007_v63 = vrot.slane %v731_v61, %v3953_v11  ;;  %v2021_v40 = vrot.slane %v760_v54, %v3953_v11  ;;  %v2035_v52 = vrot.slane %v767_v47, %v3953_v11  ;;  %v2049_v62 = vrot.slane %v768_v9, %v3953_v11 }
  0x67   : > { %v2063_v44 = vrot.slane %v769_v28, %v3953_v11  ;;  %v2077_v53 = vrot.slane %v784_v17, %v3953_v11  ;;  %v4548_v3 = vrot.slane %v1909_v46, %v3953_v11  ;;  %v1930_v43 = vrot.slane %v1923_v51, %v3953_v11 }
  0x68   : > { %v1944_v6 = vrot.slane %v1937_v0, %v3953_v11  ;;  %v2091_v33 = vrot.slane %v791_v5, %v3953_v11  ;;  %v1958_v61 = vrot.slane %v1951_v26, %v3953_v11  ;;  %v1972_v54 = vrot.slane %v1965_v24, %v3953_v11 }
  0x69   : > { %5401 = vst [vmem:[#allocation35_spill] sm:$0xff] %v4548_v3  ;;  %v1986_v47 = vrot.slane %v1979_v18, %v3953_v11  ;;  %v2000_v9 = vrot.slane %v1993_v13, %v3953_v11  ;;  %v2014_v28 = vrot.slane %v2007_v63, %v3953_v11  ;;  %v4559_v17 = vrot.slane %v2021_v40, %v3953_v11 }
  0x6a   : > { %v2105_v46 = vrot.slane %v792_v23, %v3953_v11  ;;  %v2119_v51 = vrot.slane %v793_v14, %v3953_v11  ;;  %v2042_v0 = vrot.slane %v2035_v52, %v3953_v11  ;;  %v2056_v5 = vrot.slane %v2049_v62, %v3953_v11 }
  0x6b   : > { %5402 = vst [vmem:[#allocation36_spill] sm:$0xff] %v4559_v17  ;;  %v2070_v26 = vrot.slane %v2063_v44, %v3953_v11  ;;  %v4567_v24 = vrot.slane %v2077_v53, %v3953_v11  ;;  %v4570_v18 = vrot.slane %v2091_v33, %v3953_v11  ;;  %v5331_v23 = vunpack.c.l.b16 %v4548_v3 }
  0x6c   : > { %v2112_v63 = vrot.slane %v2105_v46, %v3953_v11  ;;  %v2126_v13 = vrot.slane %v2119_v51, %v3953_v11  ;;  %v4575_v40 = vunpack.c.l.b16 %v1930_v43  ;;  %v4577_v14 = vunpack.c.l.b16 %v1944_v6 }
  0x6d   : > { %v4579_v52 = vunpack.c.l.b16 %v1958_v61  ;;  %v2355_v62 = vunpack.c.l.b16 %v1972_v54  ;;  %v2356_v44 = vunpack.c.l.b16 %v1986_v47  ;;  %v4581_v2 = vunpack.c.l.b16 %v2000_v9 }
  0x6e   : > { %v4583_v53 = vunpack.c.l.b16 %v2014_v28  ;;  %v4586_v60 = vunpack.c.l.b16 %v2042_v0  ;;  %v4588_v46 = vunpack.c.l.b16 %v2056_v5  ;;  %v4590_v51 = vunpack.c.l.b16 %v2070_v26 }
  0x6f   : > { %v2363_v43 = vunpack.c.l.b16 %v4567_v24  ;;  %v2364_v6 = vunpack.c.l.b16 %v4570_v18  ;;  %v4594_v61 = vunpack.c.l.b16 %v2112_v63  ;;  %v4596_v54 = vunpack.c.l.b16 %v2126_v13  ;;  %v3491_v13 = vld.sshfl [vmem:[%s3951_s10 + $0x3c] sm:$0x33 pattern:$0x75316420] }
  0x70   : > { %v4601_v0 = vrot.slane %v2355_v62, 4  ;;  %v4603_v5 = vrot.slane %v2356_v44, 3  ;;  %v2532_v63 = vrot.slane %v5331_v23, 1  ;;  %v5334_v47 = vrot.slane %v4577_v14, 7 }
  0x71   : > { %v4613_v33 = vrot.slane %v2355_v62, 5  ;;  %v4615_v28 = vrot.slane %v2356_v44, 4  ;;  %v5341_v62 = vrot.slane %v4588_v46, 7  ;;  %v4629_v3 = vrot.slane %v2363_v43, 5 }
  0x72   : > { %5403 = vst [vmem:[#allocation37_spill] sm:$0xff] %v4601_v0  ;;  %5404 = vst [vmem:[#allocation38_spill] sm:$0xff] %v4603_v5  ;;  %v3492_v0 = vld.sshfl [vmem:[%s3951_s10 + $0x40] sm:$0x33 pattern:$0x75316420]  ;;  %v2533_v26 = vsel %vm1429_vm0, %v4575_v40, %v2532_v63  ;;  %v5405_v5 = vunpack.c.l.b16 %v4559_v17  ;;  %v815_v4 = vcombine.high %v3491_v13, %v3491_v13  ;;  %v877_v42 = vcombine.high %v3494_v7, %v3494_v7 }
  0x73   : > { %v2535_v9 = vsel %vm1432_vm1, %v5334_v47, %v2533_v26  ;;  %v5406_v63 = vrot.slane %v4579_v52, 6  ;;  %v4636_v17 = vrot.slane %v2364_v6, 4  ;;  %v839_v16 = vcombine.high %v3492_v0, %v3492_v0  ;;  %v3495_v44 = vld.sshfl [vmem:[%s3951_s10 + $0x58] sm:$0x33 pattern:$0x75316420] }
  0x74   : > { %v2546_v23 = vrot.slane %v5405_v5, 1  ;;  %v822_v5 = vrot.slane %v3491_v13, %v3953_v11  ;;  %v5408_v56 = vrot.slane %v4581_v2, 3  ;;  %v5409_v59 = vrot.slane %v4583_v53, 2 }
  0x75   : > { %v2537_v24 = vsel %vm1435_vm2, %v5406_v63, %v2535_v9  ;;  %v5407_v63 = vrot.slane %v4590_v51, 6  ;;  %v4675_v48 = vrot.slane %v2363_v43, 4  ;;  %v908_v37 = vrot.slane %v3495_v44, %v3953_v11 }
  0x76   : > { %v2547_v18 = vsel %vm1429_vm0, %v4586_v60, %v2546_v23  ;;  %v2539_v26 = vsel %vm1438_vm3, %v4613_v33, %v2537_v24  ;;  %v853_v24 = vrot.slane %v839_v16, %v3953_v11  ;;  %v891_v16 = vrot.slane %v877_v42, %v3953_v11 }
  0x77   : > { %v2549_v47 = vsel %vm1432_vm1, %v5341_v62, %v2547_v18  ;;  %v2541_v9 = vsel %vm1441_vm4, %v4615_v28, %v2539_v26  ;;  %v829_v26 = vrot.slane %v815_v4, %v3953_v11  ;;  %v5411_v4 = vrot.slane %v4596_v54, 2  ;;  %5412 = vst [vmem:[#allocation39_spill] sm:$0xff] %v4675_v48 }
  0x78   : > { %v2551_v23 = vsel %vm1435_vm2, %v5407_v63, %v2549_v47  ;;  %v2543_v18 = vsel %vm1444_vm5, %v5408_v56, %v2541_v9  ;;  %v846_v63 = vrot.slane %v3492_v0, %v3953_v11  ;;  %v5410_v56 = vrot.slane %v4594_v61, 3 }
  0x79   : > { %v2553_v62 = vsel %vm1438_vm3, %v4629_v3, %v2551_v23  ;;  %v2545_v47 = vsel %vm1447_vm6, %v5409_v59, %v2543_v18  ;;  %v830_v23 = vcombine.high %v822_v5, %v822_v5  ;;  %v831_v59 = vcombine.high %v829_v26, %v829_v26 }
  0x7a   : > { %v2555_v13 = vsel %vm1441_vm4, %v4636_v17, %v2553_v62  ;;  %v884_v18 = vrot.slane %v3494_v7, %v3953_v11  ;;  %v901_v62 = vcombine.high %v3495_v44, %v3495_v44  ;;  %v4679_v55 = vrot.slane %v2364_v6, 3 }
  0x7b   : > { %v2557_v9 = vsel %vm1444_vm5, %v5410_v56, %v2555_v13  ;;  %v854_v13 = vcombine.high %v846_v63, %v846_v63  ;;  %v855_v56 = vcombine.high %v853_v24, %v853_v24  ;;  %v2133_v7 = vrot.slane %v822_v5, %v3953_v11 }
  0x7c   : > { %v2559_v41 = vsel %vm1447_vm6, %v5411_v4, %v2557_v9  ;;  %5413 = vst [vmem:[#allocation40_spill] sm:$0xff] %v4679_v55  ;;  %v915_v1 = vrot.slane %v901_v62, %v3953_v11  ;;  %v892_v9 = vcombine.high %v884_v18, %v884_v18  ;;  %v893_v4 = vcombine.high %v891_v16, %v891_v16 }
  0x7d   : > { %v2588_v0 = vpack.c.b16 %v2559_v41, %v2545_v47  ;;  %v2147_v43 = vrot.slane %v829_v26, %v3953_v11  ;;  %v2161_v42 = vrot.slane %v830_v23, %v3953_v11  ;;  %v2175_v44 = vrot.slane %v831_v59, %v3953_v11 }
  0x7e   : > { %v2189_v6 = vrot.slane %v846_v63, %v3953_v11  ;;  %v916_v55 = vcombine.high %v908_v37, %v908_v37  ;;  %v917_v62 = vcombine.high %v915_v1, %v915_v1  ;;  %v2217_v48 = vrot.slane %v854_v13, %v3953_v11 }
  0x7f   : > { %3664 = vmatprep.mubr.msk.bf16.mxu0 %vm1517_vm7, %v2588_v0  ;;  %v2203_v0 = vrot.slane %v853_v24, %v3953_v11  ;;  %v2231_v5 = vrot.slane %v855_v56, %v3953_v11  ;;  %v2245_v26 = vrot.slane %v884_v18, %v3953_v11  ;;  %v2259_v41 = vrot.slane %v891_v16, %v3953_v11 }
  0x80   : > { %v4696_v23 = vrot.slane %v2133_v7, %v3953_v11  ;;  %v2154_v59 = vrot.slane %v2147_v43, %v3953_v11  ;;  %v2273_v63 = vrot.slane %v892_v9, %v3953_v11  ;;  %v2287_v47 = vrot.slane %v893_v4, %v3953_v11 }
  0x81   : > { %v2168_v49 = vrot.slane %v2161_v42, %v3953_v11  ;;  %v2182_v24 = vrot.slane %v2175_v44, %v3953_v11  ;;  %v2196_v13 = vrot.slane %v2189_v6, %v3953_v11  ;;  %v2301_v56 = vrot.slane %v908_v37, %v3953_v11 }
  0x82   : > { %5414 = vst [vmem:[#allocation41_spill] sm:$0xff] %v4696_v23  ;;  %v2210_v18 = vrot.slane %v2203_v0, %v3953_v11  ;;  %v2315_v16 = vrot.slane %v915_v1, %v3953_v11  ;;  %v2329_v7 = vrot.slane %v916_v55, %v3953_v11  ;;  %v2343_v43 = vrot.slane %v917_v62, %v3953_v11 }
  0x83   : > { %v2224_v9 = vrot.slane %v2217_v48, %v3953_v11  ;;  %v2238_v4 = vrot.slane %v2231_v5, %v3953_v11  ;;  %v4712_v42 = vrot.slane %v2245_v26, %v3953_v11  ;;  %v2266_v44 = vrot.slane %v2259_v41, %v3953_v11 }
  0x84   : > { %v2280_v6 = vrot.slane %v2273_v63, %v3953_v11  ;;  %v2294_v37 = vrot.slane %v2287_v47, %v3953_v11  ;;  %v4718_v0 = vrot.slane %v2301_v56, %v3953_v11  ;;  %v4721_v55 = vrot.slane %v2315_v16, %v3953_v11 }
  0x85   : > { %5415 = vst [vmem:[#allocation42_spill] sm:$0xff] %v4712_v42  ;;  %v2336_v1 = vrot.slane %v2329_v7, %v3953_v11  ;;  %v2350_v48 = vrot.slane %v2343_v43, %v3953_v11  ;;  %v5351_v62 = vunpack.c.l.b16 %v4696_v23  ;;  %v4726_v5 = vunpack.c.l.b16 %v2154_v59 }
  0x86   : > { %5416 = vst [vmem:[#allocation43_spill] sm:$0xff] %v4718_v0  ;;  %5417 = vst [vmem:[#allocation44_spill] sm:$0xff] %v4721_v55  ;;  %v4728_v26 = vunpack.c.l.b16 %v2168_v49  ;;  %v4730_v41 = vunpack.c.l.b16 %v2182_v24  ;;  %v2371_v63 = vunpack.c.l.b16 %v2196_v13  ;;  %v2372_v47 = vunpack.c.l.b16 %v2210_v18 }
  0x87   : > { %v4732_v8 = vunpack.c.l.b16 %v2224_v9  ;;  %v4734_v56 = vunpack.c.l.b16 %v2238_v4  ;;  %v4737_v45 = vunpack.c.l.b16 %v2266_v44  ;;  %v4739_v7 = vunpack.c.l.b16 %v2280_v6 }
  0x88   : > { %v4741_v43 = vunpack.c.l.b16 %v2294_v37  ;;  %v4745_v24 = vunpack.c.l.b16 %v2336_v1  ;;  %v4747_v13 = vunpack.c.l.b16 %v2350_v48  ;;  %v4751_v4 = vrot.slane %v2371_v63, 4 }
  0x89   : > { %v4753_v44 = vrot.slane %v2372_v47, 3  ;;  %v2560_v59 = vrot.slane %v5351_v62, 1  ;;  %v4761_v49 = vrot.slane %v2371_v63, 5  ;;  %v4763_v18 = vrot.slane %v2372_v47, 4 }
  0x8a   : > { %5418 = vst [vmem:[#allocation45_spill] sm:$0xff] %v4751_v4  ;;  %v5421_v48 = vunpack.c.l.b16 %v4718_v0  ;;  %v5422_v47 = vrot.slane %v4728_v26, 7  ;;  %v5424_v1 = vrot.slane %v4730_v41, 6  ;;  %v5436_v0 = vrot.slane %v4734_v56, 2 }
  0x8b   : > { %5419 = vst [vmem:[#allocation46_spill] sm:$0xff] %v4753_v44  ;;  %v5420_v44 = vunpack.c.l.b16 %v4712_v42  ;;  %v2561_v37 = vsel %vm1429_vm0, %v4726_v5, %v2560_v59 }
  0x8c   : > { %v4775_v63 = vrot.slane %v5421_v48, 5  ;;  %v2563_v9 = vsel %vm1432_vm1, %v5422_v47, %v2561_v37  ;;  %v5425_v48 = vrot.slane %v4739_v7, 7  ;;  %v5426_v47 = vunpack.c.l.b16 %v4067_v12 }
  0x8d   : > { %v2574_v6 = vrot.slane %v5420_v44, 1  ;;  %v5423_v44 = vunpack.c.l.b16 %v4721_v55  ;;  %v2565_v62 = vsel %vm1435_vm2, %v5424_v1, %v2563_v9  ;;  %v5428_v55 = vrot.slane %v4741_v43, 6 }
  0x8e   : > { %v2567_v59 = vsel %vm1438_vm3, %v4761_v49, %v2565_v62  ;;  %v5429_v1 = vrot.slane %v4177_v21, 6  ;;  %v5431_v37 = vrot.slane %v4188_v34, 7 }
  0x8f   : > { %v2575_v16 = vsel %vm1429_vm0, %v4737_v45, %v2574_v6  ;;  %v4784_v42 = vrot.slane %v5423_v44, 4  ;;  %v5427_v6 = vrot.slane %v4172_v20, 7 }
  0x90   : > { %v2577_v4 = vsel %vm1432_vm1, %v5425_v48, %v2575_v16  ;;  %v5430_v48 = vunpack.c.l.b16 %v4101_v29  ;;  %v3487_v29 = vld.sshfl [vmem:[%s3951_s10 + $0x14] sm:$0x1 pattern:$0x75316420] }
  0x91   : > { %v1574_v44 = vsel %vm1429_vm0, %v5427_v6, %v5426_v47  ;;  %v2579_v9 = vsel %vm1435_vm2, %v5428_v55, %v2577_v4  ;;  %v2569_v47 = vsel %vm1441_vm4, %v4763_v18, %v2567_v59  ;;  %v5432_v6 = vrot.slane %v4179_v10, 5 }
  0x92   : > { %v1576_v16 = vsel %vm1432_vm1, %v5429_v1, %v1574_v44  ;;  %v1588_v12 = vsel %vm1429_vm0, %v5431_v37, %v5430_v48  ;;  %v2581_v62 = vsel %vm1438_vm3, %v4775_v63, %v2579_v9  ;;  %v5433_v4 = vrot.slane %v4190_v35, 6 }
  0x93   : > { %v1578_v55 = vsel %vm1435_vm2, %v5432_v6, %v1576_v16  ;;  %v5434_v1 = vrot.slane %v4732_v8, 3  ;;  %v2583_v59 = vsel %vm1441_vm4, %v4784_v42, %v2581_v62  ;;  %v5435_v48 = vrot.slane %v4192_v15, 5  ;;  %v3490_v6 = vld.sshfl [vmem:[%s3951_s10 + $0x2c] sm:$0x1 pattern:$0x75316420] }
  0x94   : > { %v1590_v44 = vsel %vm1432_vm1, %v5433_v4, %v1588_v12  ;;  %v1580_v9 = vsel %vm1438_vm3, %v4388_v58, %v1578_v55  ;;  %v5437_v4 = vrot.slane %v4745_v24, 3  ;;  %v5438_v58 = vrot.slane %v4747_v13, 2 }
  0x95   : > { %v2571_v37 = vsel %vm1444_vm5, %v5434_v1, %v2569_v47  ;;  %v1592_v16 = vsel %vm1435_vm2, %v5435_v48, %v1590_v44  ;;  %v1582_v47 = vsel %vm1441_vm4, %v4392_v57, %v1580_v9  ;;  %v5439_v44 = vrot.slane %v4183_v27, 2  ;;  %v3805_v48 = vld [vmem:[%s3937_s27 + $0xa8] sm:$0xff]  }
  0x96   : > { %v2573_v12 = vsel %vm1447_vm6, %v5436_v0, %v2571_v37  ;;  %v2585_v23 = vsel %vm1444_vm5, %v5437_v4, %v2583_v59  ;;  %v1594_v62 = vsel %vm1438_vm3, %v4402_v19, %v1592_v16  ;;  %v745_v37 = vrot.slane %v3487_v29, %v3953_v11 }
  0x97   : > { %v2587_v55 = vsel %vm1447_vm6, %v5438_v58, %v2585_v23  ;;  %v1584_v1 = vsel %vm1444_vm5, %v5439_v44, %v1582_v47  ;;  %v1596_v0 = vsel %vm1441_vm4, %v4406_v22, %v1594_v62  ;;  %v5440_v57 = vrot.slane %v4185_v31, 1 }
  0x98   : > { %v2589_v59 = vpack.c.b16 %v2587_v55, %v2573_v12  ;;  %v5441_v9 = vrot.slane %v4196_v39, 2  ;;  %v807_v16 = vrot.slane %v3490_v6, %v3953_v11  ;;  %v5442_v4 = vrot.slane %v4198_v25, 1 }
  0x99   : > { %v1586_v19 = vsel %vm1447_vm6, %v5440_v57, %v1584_v1  ;;  %v2687_v22 = vrot.slane %v745_v37, %v3953_v11  ;;  %v5443_v29 = vrot.slane %v4577_v14, 7  ;;  %v5444_v62 = vrot.slane %v4588_v46, 7  ;;  %v3830_v57 = vld [vmem:[%s3937_s27 + $0xa0] sm:$0xff]  }
  0x9a   : > { %v1598_v23 = vsel %vm1444_vm5, %v5441_v9, %v1596_v0  ;;  %3665 = vmatmul.mubr.msk.bf16.vlgmr.msra.gmra.mrb[0].mxu0 %vm1517_vm7, %v2589_v59  ;;  %v2701_v55 = vrot.slane %v807_v16, %v3953_v11  ;;  %v5445_v44 = vrot.slane %v4579_v52, 6  ;;  %v5446_v0 = vrot.slane %v4590_v51, 6 }
  0x9b   : > { %v4864_v47 = vsel %vm1447_vm6, %v5442_v4, %v1598_v23  ;;  %v2741_v12 = vsel %vm1429_vm0, %v5443_v29, %v4575_v40  ;;  %v2749_v58 = vsel %vm1429_vm0, %v5444_v62, %v4586_v60  ;;  %3669 = vmatpush3.bf16.msra.mxu0 %v3830_v57  ;;  %v2694_v9 = vrot.slane %v2687_v22, %v3953_v11  ;;  %v3807_v29 = vld [vmem:[%s3937_s27 + $0xb0] sm:$0xff]   ;;  %v3493_v62 = vld.sshfl [vmem:[%s3951_s10 + $0x44] sm:$0x1 pattern:$0x75316420] }
  0x9c   : > { %v1629_v6 = vpack.c.b16 %v4864_v47, %v1586_v19  ;;  %v2742_v1 = vsel %vm1432_vm1, %v5445_v44, %v2741_v12  ;;  %v2750_v37 = vsel %vm1432_vm1, %v5446_v0, %v2749_v58  ;;  %v5447_v23 = vunpack.c.l.b16 %v4128_v50  ;;  %3670 = vmatprep.subr.bf16.mxu0 %v3805_v48 }
  0x9d   : > { %v2743_v59 = vsel %vm1435_vm2, %v4613_v33, %v2742_v1  ;;  %v2751_v19 = vsel %vm1435_vm2, %v4629_v3, %v2750_v37  ;;  %v5448_v16 = vrot.slane %v4201_v38, 7  ;;  %v2708_v12 = vrot.slane %v2701_v55, %v3953_v11  ;;  %v3496_v1 = vld.sshfl [vmem:[%s3951_s10 + $0x5c] sm:$0x1 pattern:$0x75316420] }
  0x9e   : > { %3628 = vmatprep.mubr.msk.bf16.mxu1 %vm1517_vm7, %v1629_v6  ;;  %v2744_v22 = vsel %vm1438_vm3, %v4615_v28, %v2743_v59  ;;  %v2752_v33 = vsel %vm1438_vm3, %v4636_v17, %v2751_v19  ;;  %v2986_v3 = vrot.slane %v4491_v36, 7  ;;  %v2737_v50 = vunpack.c.l.b16 %v2694_v9 }
  0x9f   : > { %v1602_v4 = vsel %vm1429_vm0, %v5448_v16, %v5447_v23  ;;  %v5449_v38 = vrot.slane %v4581_v2, 3  ;;  %v5450_v44 = vrot.slane %v4594_v61, 3  ;;  %v5451_v55 = vrot.slane %v4203_v30, 6  ;;  %3671 = vmatpush3.bf16.msra.mxu0 %v3805_v48  ;;  %v5455_v16 = vld [vmem:[#allocation19_spill] sm:$0xff] }
  0xa0   : > { %v2738_v0 = vunpack.c.l.b16 %v2708_v12  ;;  %v5452_v17 = vrot.slane %v4583_v53, 2  ;;  %v5453_v57 = vrot.slane %v4596_v54, 2  ;;  %v5454_v59 = vrot.slane %v4205_v32, 5  ;;  %v5458_v12 = vld [vmem:[#allocation5_spill] sm:$0xff]  ;;  %3672 = vmatprep.subr.bf16.mxu0 %v3807_v29 }
  0xa1   : > { %v2745_v58 = vsel %vm1441_vm4, %v5449_v38, %v2744_v22  ;;  %v2753_v6 = vsel %vm1441_vm4, %v5450_v44, %v2752_v33  ;;  %v1604_v28 = vsel %vm1432_vm1, %v5451_v55, %v1602_v4  ;;  %v2747_v23 = vrot.slane %v2737_v50, 1  ;;  %v5456_v4 = vld [vmem:[#allocation2_spill] sm:$0xff]  ;;  %v3809_v44 = vld [vmem:[%s3937_s27 + $0xb8] sm:$0xff]  }
  0xa2   : > { %v2746_v37 = vsel %vm1444_vm5, %v5452_v17, %v2745_v58  ;;  %v2754_v9 = vsel %vm1444_vm5, %v5453_v57, %v2753_v6  ;;  %v1606_v19 = vsel %vm1435_vm2, %v5454_v59, %v1604_v28  ;;  %v5457_v22 = vunpack.c.l.b16 %v5456_v4  ;;  %v5460_v55 = vld [vmem:[#allocation21_spill] sm:$0xff]  ;;  %v5461_v28 = vld [vmem:[#allocation6_spill] sm:$0xff]  ;;  %v5463_v59 = vld [vmem:[#allocation3_spill] sm:$0xff] }
  0xa3   : > { %v1608_v30 = vsel %vm1438_vm3, %v5455_v16, %v1606_v19  ;;  %v5459_v33 = vrot.slane %v5458_v12, 7  ;;  %v869_v58 = vrot.slane %v3493_v62, %v3953_v11  ;;  %v2755_v6 = vrot.slane %v2738_v0, 1  ;;  %v5465_v62 = vld [vmem:[#allocation7_spill] sm:$0xff]  ;;  %3673 = vmatpush3.bf16.msra.mxu0 %v3807_v29 }
  0xa4   : > { %v1610_v32 = vsel %vm1441_vm4, %v5460_v55, %v1608_v30  ;;  %v5462_v48 = vrot.slane %v5461_v28, 6  ;;  %v931_v17 = vrot.slane %v3496_v1, %v3953_v11  ;;  %v2748_v57 = vsel %vm1447_vm6, %v2747_v23, %v2746_v37  ;;  %v5469_v1 = vld [vmem:[#allocation24_spill] sm:$0xff]  ;;  %3674 = vmatprep.subr.bf16.mxu0 %v3809_v44 }
  0xa5   : > { %v1616_v38 = vsel %vm1429_vm0, %v5459_v33, %v5457_v22  ;;  %v5464_v19 = vrot.slane %v5463_v59, 2  ;;  %v5466_v4 = vrot.slane %v5465_v62, 5  ;;  %v2715_v22 = vrot.slane %v869_v58, %v3953_v11  ;;  %v5467_v33 = vld [vmem:[#allocation4_spill] sm:$0xff]  ;;  %v3811_v59 = vld [vmem:[%s3937_s27 + $0xc0] sm:$0xff]  }
  0xa6   : > { %v1618_v50 = vsel %vm1432_vm1, %v5462_v48, %v1616_v38  ;;  %v2756_v30 = vsel %vm1447_vm6, %v2755_v6, %v2754_v9  ;;  %v5468_v38 = vrot.slane %v5467_v33, 1  ;;  %v2729_v23 = vrot.slane %v931_v17, %v3953_v11  ;;  %v5470_v48 = vld [vmem:[#allocation26_spill] sm:$0xff]  ;;  %v5476_v33 = vld [vmem:[#allocation13_spill] sm:$0xff] }
  0xa7   : > { %v1612_v16 = vsel %vm1444_vm5, %v5464_v19, %v1610_v32  ;;  %v1620_v0 = vsel %vm1435_vm2, %v5466_v4, %v1618_v50  ;;  %v2773_v32 = vpack.c.b16 %v2756_v30, %v2748_v57  ;;  %v2722_v58 = vrot.slane %v2715_v22, %v3953_v11  ;;  %v5472_v19 = vld [vmem:[#allocation8_spill] sm:$0xff]  ;;  %v3472_v30 = vld.sshfl [vmem:[%s3951_s10 + $0x8] sm:$0x1 pattern:$0x75316420]  ;;  %3675 = vmatpush3.bf16.msra.mxu0 %v3809_v44 }
  0xa8   : > { %v4950_v55 = vsel %vm1447_vm6, %v5468_v38, %v1612_v16  ;;  %v1622_v37 = vsel %vm1438_vm3, %v5469_v1, %v1620_v0  ;;  %v5471_v9 = vrot.slane %v4728_v26, 7  ;;  %v5473_v16 = vrot.slane %v5472_v19, 2  ;;  %3680 = vmatprep.subr.bf16.mxu0 %v3811_v59 }
  0xa9   : > { %v1624_v50 = vsel %vm1441_vm4, %v5470_v48, %v1622_v37  ;;  %v2736_v29 = vrot.slane %v2729_v23, %v3953_v11  ;;  %v5474_v57 = vrot.slane %v4730_v41, 6  ;;  %v5475_v0 = vrot.slane %v4739_v7, 7  ;;  %3676 = vmatprep.mubr.msk.bf16.mxu0 %vm1517_vm7, %v2773_v32 }
  0xaa   : > { %v2757_v6 = vsel %vm1429_vm0, %v5471_v9, %v4726_v5  ;;  %v1626_v17 = vsel %vm1444_vm5, %v5473_v16, %v1624_v50  ;;  %v5477_v38 = vrot.slane %v5476_v33, 1  ;;  %v2739_v37 = vunpack.c.l.b16 %v2722_v58  ;;  %v3475_v9 = vld.sshfl [vmem:[%s3951_s10 + $0x20] sm:$0x1 pattern:$0x75316420] }
  0xab   : > { %v2758_v4 = vsel %vm1432_vm1, %v5474_v57, %v2757_v6  ;;  %v2765_v22 = vsel %vm1429_vm0, %v5475_v0, %v4737_v45  ;;  %v5478_v48 = vrot.slane %v4741_v43, 6  ;;  %v2740_v16 = vunpack.c.l.b16 %v2736_v29  ;;  %v3812_v57 = vld [vmem:[%s3937_s27 + $0x48] sm:$0xff]  }
  0xac   : > { %v4979_v1 = vsel %vm1447_vm6, %v5477_v38, %v1626_v17  ;;  %v2759_v23 = vsel %vm1435_vm2, %v4761_v49, %v2758_v4  ;;  %v5479_v58 = vrot.slane %v4732_v8, 3  ;;  %v2763_v4 = vrot.slane %v2739_v37, 1 }
  0xad   : > { %v2766_v50 = vsel %vm1432_vm1, %v5478_v48, %v2765_v22  ;;  %v1630_v6 = vpack.c.b16 %v4979_v1, %v4950_v55  ;;  %v2760_v32 = vsel %vm1438_vm3, %v4763_v18, %v2759_v23  ;;  %v423_v22 = vrot.slane %v3472_v30, %v3953_v11  ;;  %v5482_v23 = vld [vmem:[#allocation27_spill] sm:$0xff] }
  0xae   : > { %v2767_v17 = vsel %vm1435_vm2, %v4775_v63, %v2766_v50  ;;  %v2761_v49 = vsel %vm1441_vm4, %v5479_v58, %v2760_v32  ;;  %v5480_v18 = vrot.slane %v4734_v56, 2  ;;  %v5481_v44 = vrot.slane %v4745_v24, 3 }
  0xaf   : > { %v2768_v0 = vsel %vm1438_vm3, %v4784_v42, %v2767_v17  ;;  %3629 = vmatmul.mubr.msk.bf16.vlgmr.msra.gmra.mrb[0].mxu1 %vm1517_vm7, %v1630_v6  ;;  %v2771_v38 = vrot.slane %v2740_v16, 1  ;;  %v485_v37 = vrot.slane %v3475_v9, %v3953_v11  ;;  %v5483_v30 = vrot.slane %v4747_v13, 2  ;;  %v3814_v9 = vld [vmem:[%s3937_s27 + $0x50] sm:$0xff]  }
  0xb0   : > { %v2762_v63 = vsel %vm1444_vm5, %v5480_v18, %v2761_v49  ;;  %v2769_v29 = vsel %vm1441_vm4, %v5481_v44, %v2768_v0  ;;  %3633 = vmatpush3.bf16.msra.mxu1 %v5482_v23  ;;  %v1724_v50 = vrot.slane %v423_v22, %v3953_v11  ;;  %v5484_v6 = vrot.slane %v4177_v21, 7  ;;  %v3478_v22 = vld.sshfl [vmem:[%s3951_s10 + $0x38] sm:$0x1 pattern:$0x75316420]  ;;  %v3813_v21 = vld [vmem:[%s3937_s27 + $0xc8] sm:$0xff]  }
  0xb1   : > { %v2764_v42 = vsel %vm1447_vm6, %v2763_v4, %v2762_v63  ;;  %v2770_v48 = vsel %vm1444_vm5, %v5483_v30, %v2769_v29  ;;  %3634 = vmatprep.subr.bf16.mxu1 %v3812_v57  ;;  %v1738_v17 = vrot.slane %v485_v37, %v3953_v11  ;;  %v5485_v58 = vrot.slane %v4179_v10, 6  ;;  %v5487_v63 = vld [vmem:[#allocation9_spill] sm:$0xff]  ;;  %v5489_v23 = vld [vmem:[#allocation10_spill] sm:$0xff] }
  0xb2   : > { %v1778_v32 = vsel %vm1429_vm0, %v5484_v6, %v4172_v20  ;;  %v2772_v16 = vsel %vm1447_vm6, %v2771_v38, %v2770_v48  ;;  %v5486_v4 = vrot.slane %v4190_v35, 7  ;;  %v1731_v20 = vrot.slane %v1724_v50, %v3953_v11  ;;  %v3481_v38 = vld.sshfl [vmem:[%s3951_s10 + $0x50] sm:$0x1 pattern:$0x75316420] }
  0xb3   : > { %v1779_v49 = vsel %vm1432_vm1, %v5485_v58, %v1778_v32  ;;  %v2774_v18 = vpack.c.b16 %v2772_v16, %v2764_v42  ;;  %v5488_v29 = vrot.slane %v4192_v15, 6  ;;  %v1745_v37 = vrot.slane %v1738_v17, %v3953_v11  ;;  %v5492_v6 = vld [vmem:[#allocation12_spill] sm:$0xff]  ;;  %v3816_v17 = vld [vmem:[%s3937_s27 + $0x58] sm:$0xff]  }
  0xb4   : > { %v1786_v0 = vsel %vm1429_vm0, %v5486_v4, %v4188_v34  ;;  %v1780_v44 = vsel %vm1435_vm2, %v5487_v63, %v1779_v49  ;;  %v5490_v34 = vld [vmem:[#allocation11_spill] sm:$0xff]  ;;  %v3000_v30 = vpack.c.b16 %v4950_v55, %v4864_v47  ;;  %3635 = vmatpush3.bf16.msra.mxu1 %v3812_v57  ;;  %v1774_v48 = vunpack.c.l.b16 %v1731_v20  ;;  %v3815_v4 = vld [vmem:[%s3937_s27 + $0xd0] sm:$0xff]  }
  0xb5   : > { %v1787_v10 = vsel %vm1432_vm1, %v5488_v29, %v1786_v0  ;;  %v1781_v35 = vsel %vm1438_vm3, %v5489_v23, %v1780_v44  ;;  %3677 = vmatmul.mubr.msk.bf16.vlgmr.msra.gmra.mrb[0].mxu0 %vm1517_vm7, %v2774_v18  ;;  %v5491_v15 = vrot.slane %v4183_v27, 3  ;;  %v547_v16 = vrot.slane %v3478_v22, %v3953_v11  ;;  %3636 = vmatprep.subr.bf16.mxu1 %v3814_v9  ;;  %v5498_v29 = vld [vmem:[#allocation20_spill] sm:$0xff] }
  0xb6   : > { %v1788_v42 = vsel %vm1435_vm2, %v5490_v34, %v1787_v10  ;;  %3681 = vmatpush3.bf16.msra.mxu0 %v3811_v59  ;;  %v1775_v58 = vunpack.c.l.b16 %v1745_v37  ;;  %v5493_v49 = vrot.slane %v4185_v31, 2  ;;  %v5494_v55 = vrot.slane %v4196_v39, 3  ;;  %3688 = vmatprep.mubr.msk.bf16.mxu0 %vm1517_vm7, %v3000_v30  ;;  %v3818_v30 = vld [vmem:[%s3937_s27 + $0x60] sm:$0xff]  }
  0xb7   : > { %v1782_v50 = vsel %vm1441_vm4, %v5491_v15, %v1781_v35  ;;  %v1789_v32 = vsel %vm1438_vm3, %v5492_v6, %v1788_v42  ;;  %v609_v27 = vrot.slane %v3481_v38, %v3953_v11  ;;  %3682 = vmatprep.subr.bf16.mxu0 %v3813_v21  ;;  %v1784_v0 = vrot.slane %v1774_v48, 1  ;;  %v5501_v35 = vld [vmem:[#allocation23_spill] sm:$0xff] }
  0xb8   : > { %v1783_v47 = vsel %vm1444_vm5, %v5493_v49, %v1782_v50  ;;  %v1790_v57 = vsel %vm1441_vm4, %v5494_v55, %v1789_v32  ;;  %v5495_v18 = vrot.slane %v4198_v25, 2  ;;  %v1752_v31 = vrot.slane %v547_v16, %v3953_v11  ;;  %3637 = vmatpush3.bf16.msra.mxu1 %v3814_v9  ;;  %v5503_v9 = vld [vmem:[#allocation16_spill] sm:$0xff]  ;;  %v3817_v50 = vld [vmem:[%s3937_s27 + $0xd8] sm:$0xff]  }
  0xb9   : > { %v5496_v22 = vrot.slane %v5461_v28, 7  ;;  %v1792_v20 = vrot.slane %v1775_v58, 1  ;;  %v1766_v63 = vrot.slane %v609_v27, %v3953_v11  ;;  %v5497_v44 = vrot.slane %v5465_v62, 6  ;;  %3638 = vmatprep.subr.bf16.mxu1 %v3816_v17  ;;  %v5505_v58 = vld [vmem:[#allocation25_spill] sm:$0xff] }
  0xba   : > { %v1791_v59 = vsel %vm1444_vm5, %v5495_v18, %v1790_v57  ;;  %v5499_v10 = vunpack.c.l.b16 %v5498_v29  ;;  %v1785_v37 = vsel %vm1447_vm6, %v1784_v0, %v1783_v47  ;;  %v1759_v28 = vrot.slane %v1752_v31, %v3953_v11  ;;  %3683 = vmatpush3.bf16.msra.mxu0 %v3813_v21  ;;  %v5508_v0 = vld [vmem:[#allocation30_spill] sm:$0xff]  ;;  %v5509_v18 = vld [vmem:[#allocation35_spill] sm:$0xff] }
  0xbb   : > { %v1802_v39 = vsel %vm1429_vm0, %v5496_v22, %v5458_v12  ;;  %v5500_v12 = vld [vmem:[#allocation15_spill] sm:$0xff]  ;;  %v5502_v34 = vrot.slane %v5501_v35, 6  ;;  %v5086_v42 = vsel %vm1447_vm6, %v1792_v20, %v1791_v59  ;;  %v2411_v15 = vrot.slane %v4726_v5, 7  ;;  %3684 = vmatprep.subr.bf16.mxu0 %v3815_v4 }
  0xbc   : > { %v1803_v25 = vsel %vm1432_vm1, %v5497_v44, %v1802_v39  ;;  %v2987_v38 = vsel %vm1429_vm0, %v2986_v3, %v5499_v10  ;;  %v1773_v3 = vrot.slane %v1766_v63, %v3953_v11  ;;  %v1810_v6 = vpack.c.b16 %v5086_v42, %v1785_v37  ;;  %3639 = vmatpush3.bf16.msra.mxu1 %v3816_v17  ;;  %v5512_v39 = vld [vmem:[#allocation31_spill] sm:$0xff]  ;;  %v5514_v44 = vld [vmem:[#allocation36_spill] sm:$0xff] }
  0xbd   : > { %v1804_v23 = vsel %vm1435_vm2, %v5500_v12, %v1803_v25  ;;  %v2989_v62 = vsel %vm1432_vm1, %v5502_v34, %v2987_v38  ;;  %v1776_v32 = vunpack.c.l.b16 %v1759_v28  ;;  %v5504_v16 = vrot.slane %v5472_v19, 3  ;;  %3644 = vmatprep.subr.bf16.mxu1 %v3818_v30  ;;  %v5517_v17 = vld [vmem:[#allocation28_spill] sm:$0xff]  ;;  %v5521_v34 = vld [vmem:[#allocation22_spill] sm:$0xff] }
  0xbe   : > { %v1805_v48 = vsel %vm1438_vm3, %v5503_v9, %v1804_v23  ;;  %v5506_v49 = vrot.slane %v5505_v58, 5  ;;  %v1777_v55 = vunpack.c.l.b16 %v1773_v3  ;;  %v5507_v57 = vrot.slane %v5476_v33, 2  ;;  %3640 = vmatprep.mubr.msk.bf16.mxu1 %vm1517_vm7, %v1810_v6  ;;  %3685 = vmatpush3.bf16.msra.mxu0 %v3815_v4 }
  0xbf   : > { %v1806_v21 = vsel %vm1441_vm4, %v5504_v16, %v1805_v48  ;;  %v5510_v59 = vunpack.c.l.b16 %v5509_v18  ;;  %v5511_v31 = vrot.slane %v4575_v40, 7  ;;  %v1800_v22 = vrot.slane %v1776_v32, 1  ;;  %3686 = vmatprep.subr.bf16.mxu0 %v3817_v50  ;;  %v5524_v48 = vld [vmem:[#allocation37_spill] sm:$0xff]  ;;  %v5529_v18 = vld [vmem:[#allocation40_spill] sm:$0xff] }
  0xc0   : > { %v2991_v47 = vsel %vm1435_vm2, %v5506_v49, %v2989_v62  ;;  %v1807_v27 = vsel %vm1444_vm5, %v5507_v57, %v1806_v21  ;;  %v5513_v33 = vrot.slane %v4577_v14, 6  ;;  %v5515_v25 = vunpack.c.l.b16 %v5514_v44  ;;  %v5522_v62 = vld [vmem:[#allocation29_spill] sm:$0xff]  ;;  %v5526_v21 = vld [vmem:[#allocation38_spill] sm:$0xff]  ;;  %v5535_v44 = vld [vmem:[#allocation43_spill] sm:$0xff] }
  0xc1   : > { %v2993_v5 = vsel %vm1438_vm3, %v5508_v0, %v2991_v47  ;;  %v2384_v19 = vsel %vm1429_vm0, %v5511_v31, %v5510_v59  ;;  %v5516_v29 = vrot.slane %v4586_v60, 7  ;;  %v1808_v40 = vrot.slane %v1777_v55, 1  ;;  %v3819_v60 = vld [vmem:[%s3937_s27 + $0xe0] sm:$0xff]   ;;  %v5527_v47 = vld [vmem:[#allocation39_spill] sm:$0xff]  ;;  %v5530_v59 = vld [vmem:[#allocation41_spill] sm:$0xff] }
  0xc2   : > { %v2995_v20 = vsel %vm1441_vm4, %v5512_v39, %v2993_v5  ;;  %v2386_v63 = vsel %vm1432_vm1, %v5513_v33, %v2384_v19  ;;  %v5518_v38 = vrot.slane %v5517_v17, 2  ;;  %v5519_v28 = vrot.slane %v4579_v52, 5  ;;  %v3820_v0 = vld [vmem:[%s3937_s27 + $0x68] sm:$0xff]   ;;  %3687 = vmatpush3.bf16.msra.mxu0 %v3817_v50 }
  0xc3   : > { %v2398_v10 = vsel %vm1429_vm0, %v5516_v29, %v5515_v25  ;;  %v5520_v12 = vrot.slane %v4588_v46, 6  ;;  %v5134_v4 = vsel %vm1447_vm6, %v1800_v22, %v5521_v34  ;;  %v5523_v3 = vrot.slane %v5522_v62, 1  ;;  %3692 = vmatprep.subr.bf16.mxu0 %v3819_v60  ;;  %v5544_v34 = vld [vmem:[#allocation34_spill] sm:$0xff] }
  0xc4   : > { %v2997_v37 = vsel %vm1444_vm5, %v5518_v38, %v2995_v20  ;;  %v2388_v14 = vsel %vm1435_vm2, %v5519_v28, %v2386_v63  ;;  %v5525_v52 = vrot.slane %v4590_v51, 5  ;;  %v5145_v46 = vsel %vm1447_vm6, %v1808_v40, %v1807_v27  ;;  %v5541_v28 = vld [vmem:[#allocation45_spill] sm:$0xff] }
  0xc5   : > { %v2400_v23 = vsel %vm1432_vm1, %v5520_v12, %v2398_v10  ;;  %v2999_v9 = vsel %vm1447_vm6, %v5523_v3, %v2997_v37  ;;  %v2390_v6 = vsel %vm1438_vm3, %v5524_v48, %v2388_v14  ;;  %v1811_v57 = vpack.c.b16 %v5145_v46, %v5134_v4  ;;  %v5542_v12 = vld [vmem:[#allocation42_spill] sm:$0xff] }
  0xc6   : > { %v2402_v32 = vsel %vm1435_vm2, %v5525_v52, %v2400_v23  ;;  %v3001_v16 = vpack.c.b16 %v2999_v9, %v4979_v1  ;;  %v2392_v49 = vsel %vm1441_vm4, %v5526_v21, %v2390_v6  ;;  %v5528_v51 = vrot.slane %v4581_v2, 2  ;;  %v5547_v6 = vld [vmem:[#allocation46_spill] sm:$0xff] }
  0xc7   : > { %v2404_v55 = vsel %vm1438_vm3, %v5527_v47, %v2402_v32  ;;  %v5531_v1 = vunpack.c.l.b16 %v5530_v59  ;;  %v5532_v19 = vrot.slane %v4583_v53, 1  ;;  %v5533_v39 = vrot.slane %v4594_v61, 2  ;;  %3641 = vmatmul.mubr.msk.bf16.vlgmr.msra.gmra.mrb[0].mxu1 %vm1517_vm7, %v1811_v57  ;;  %v3821_v53 = vld [vmem:[%s3937_s27 + $0xe8] sm:$0xff]  }
  0xc8   : > { %v2394_v5 = vsel %vm1444_vm5, %v5528_v51, %v2392_v49  ;;  %v2406_v27 = vsel %vm1441_vm4, %v5529_v18, %v2404_v55  ;;  %v5534_v2 = vrot.slane %v4728_v26, 6  ;;  %v2425_v63 = vrot.slane %v4737_v45, 7  ;;  %v5539_v45 = vld [vmem:[#allocation44_spill] sm:$0xff]  ;;  %3645 = vmatpush3.bf16.msra.mxu1 %v3818_v30  ;;  %3689 = vmatmul.mubr.msk.bf16.vlgmr.msra.gmra.mrb[0].mxu0 %vm1517_vm7, %v3001_v16  ;;  %v5550_v49 = vld [vmem:[#allocation14_spill] sm:$0xff]  ;;  %v5552_v55 = vld [vmem:[#allocation33_spill] sm:$0xff] }
  0xc9   : > { %v2412_v31 = vsel %vm1429_vm0, %v2411_v15, %v5531_v1  ;;  %v2396_v22 = vsel %vm1447_vm6, %v5532_v19, %v2394_v5  ;;  %v2408_v20 = vsel %vm1444_vm5, %v5533_v39, %v2406_v27  ;;  %v5536_v25 = vunpack.c.l.b16 %v5535_v44  ;;  %3646 = vmatprep.subr.bf16.mxu1 %v3820_v0  ;;  %v3822_v30 = vld [vmem:[%s3937_s27 + $0x70] sm:$0xff]   ;;  %3693 = vmatpush3.bf16.msra.mxu0 %v3819_v60  ;;  %v3484_v60 = vld.sshfl [vmem:[%s3975_s22 + $0x8] sm:$0x1 pattern:$0x75316420]  ;;  %v3824_v5 = vld [vmem:[%s3937_s27 + $0x78] sm:$0xff]  }
  0xca   : > { %v2414_v33 = vsel %vm1432_vm1, %v5534_v2, %v2412_v31  ;;  %v5537_v15 = vrot.slane %v4596_v54, 1  ;;  %v5538_v50 = vrot.slane %v4730_v41, 5  ;;  %v3223_v10 = vpack.c.b16 %v5134_v4, %v5086_v42  ;;  %v5545_v41 = vld [vmem:[#allocation32_spill] sm:$0xff]  ;;  %3694 = vmatprep.subr.bf16.mxu0 %v3821_v53  ;;  %v3826_v2 = vld [vmem:[%s3937_s27 + $0x100] sm:$0xff]  }
  0xcb   : > { %v2431_v29 = vrot.slane %v5536_v25, 4  ;;  %v5540_v40 = vunpack.c.l.b16 %v5539_v45  ;;  %v5543_v54 = vunpack.c.l.b16 %v5542_v12  ;;  %v3100_v3 = vsel %vm1438_vm3, %v5545_v41, %v5544_v34  ;;  %v3823_v16 = vld [vmem:[%s3937_s27 + $0xf0] sm:$0xff]   ;;  %v5555_v44 = vld [vmem:[#allocation18_spill] sm:$0xff] }
  0xcc   : > { %v2410_v61 = vsel %vm1447_vm6, %v5537_v15, %v2408_v20  ;;  %v2416_v26 = vsel %vm1435_vm2, %v5538_v50, %v2414_v33  ;;  %v2421_v42 = vrot.slane %v4732_v8, 2  ;;  %v2435_v4 = vrot.slane %v4745_v24, 2  ;;  %3647 = vmatpush3.bf16.msra.mxu1 %v3820_v0  ;;  %v3828_v15 = vld [vmem:[%s3937_s27 + $0x110] sm:$0xff]   ;;  %v3829_v50 = vld [vmem:[%s3937_s27 + $0x118] sm:$0xff]   ;;  %v3551_v12 = vld [vmem:[%s5283_s3] ss:$0 sm:$0xff] }
  0xcd   : > { %v2433_v38 = vrot.slane %v5540_v40, 3  ;;  %v2439_v37 = vpack.c.b16 %v2410_v61, %v2396_v22  ;;  %v2418_v14 = vsel %vm1438_vm3, %v5541_v28, %v2416_v26  ;;  %v2426_v23 = vsel %vm1429_vm0, %v2425_v63, %v5543_v54  ;;  %3648 = vmatprep.subr.bf16.mxu1 %v3822_v30  ;;  %3695 = vmatpush3.bf16.msra.mxu0 %v3821_v53 }
  0xce   : > { %v5546_v9 = vrot.slane %v4739_v7, 6  ;;  %v2420_v52 = vsel %vm1441_vm4, %v5547_v6, %v2418_v14  ;;  %v5548_v32 = vrot.slane %v4741_v43, 5  ;;  %v3103_v24 = vrot.slane %v5517_v17, 3  ;;  %v5549_v7 = vld [vmem:[#allocation17_spill] sm:$0xff]  ;;  %3696 = vmatprep.subr.bf16.mxu0 %v3823_v16 }
  0xcf   : > { %3652 = vmatprep.mubr.msk.bf16.mxu1 %vm1517_vm7, %v2439_v37  ;;  %v5551_v47 = vpack.c.b16 %v5549_v7, %v5550_v49  ;;  %v3102_v57 = vsel %vm1441_vm4, %v5552_v55, %v3100_v3  ;;  %v2423_v43 = vrot.slane %v4734_v56, 1  ;;  %v2437_v51 = vrot.slane %v4747_v13, 1  ;;  %v3825_v56 = vld [vmem:[%s3937_s27 + $0xf8] sm:$0xff]  }
  0xd0   : > { %v2428_v48 = vsel %vm1432_vm1, %v5546_v9, %v2426_v23  ;;  %v2422_v18 = vsel %vm1444_vm5, %v2421_v42, %v2420_v52  ;;  %v3105_v59 = vrot.slane %v5522_v62, 2  ;;  %v671_v1 = vrot.slane %v3484_v60, %v3953_v11  ;;  %3649 = vmatpush3.bf16.msra.mxu1 %v3822_v30 }
  0xd1   : > { %v2430_v8 = vsel %vm1435_vm2, %v5548_v32, %v2428_v48  ;;  %3700 = vmatprep.mubr.msk.bf16.mxu0 %vm1517_vm7, %v5551_v47  ;;  %v3104_v31 = vsel %vm1444_vm5, %v3103_v24, %v3102_v57  ;;  %v2424_v13 = vsel %vm1447_vm6, %v2423_v43, %v2422_v18  ;;  %v5553_v19 = vrot.slane %v5501_v35, 7  ;;  %3650 = vmatprep.subr.bf16.mxu1 %v3824_v5 }
  0xd2   : > { %v2432_v21 = vsel %vm1438_vm3, %v2431_v29, %v2430_v8  ;;  %v3106_v62 = vsel %vm1447_vm6, %v3105_v59, %v3104_v31  ;;  %3697 = vmatpush3.bf16.msra.mxu0 %v3823_v16  ;;  %v3206_v39 = vrot.slane %v671_v1, %v3953_v11  ;;  %v5554_v33 = vrot.slane %v5505_v58, 6  ;;  %v3827_v29 = vld [vmem:[%s3937_s27 + $0x108] sm:$0xff]  }
  0xd3   : > { %v2434_v17 = vsel %vm1441_vm4, %v2433_v38, %v2432_v21  ;;  %v3215_v22 = vsel %vm1429_vm0, %v5553_v19, %v4491_v36  ;;  %3698 = vmatprep.subr.bf16.mxu0 %v3825_v56  ;;  %v3108_v35 = vpack.c.b16 %v3106_v62, %v5555_v44 }
  0xd4   : > { %v2436_v27 = vsel %vm1444_vm5, %v2435_v4, %v2434_v17  ;;  %v3216_v63 = vsel %vm1432_vm1, %v5554_v33, %v3215_v22  ;;  %3651 = vmatpush3.bf16.msra.mxu1 %v3824_v5  ;;  %v3213_v36 = vrot.slane %v3206_v39, %v3953_v11 }
  0xd5   : > { %v2438_v0 = vsel %vm1447_vm6, %v2437_v51, %v2436_v27  ;;  %v3217_v25 = vsel %vm1435_vm2, %v5545_v41, %v3216_v63 }
  0xd6   : > { %v2440_v20 = vpack.c.b16 %v2438_v0, %v2424_v13  ;;  %3699 = vmatpush3.bf16.msra.mxu0 %v3825_v56  ;;  %v3218_v58 = vsel %vm1438_vm3, %v5552_v55, %v3217_v25  ;;  %v3214_v53 = vunpack.c.l.b16 %v3213_v36 }
  0xd7   : > { %3704 = vmatprep.subr.bf16.mxu0 %v3826_v2  ;;  %v3219_v11 = vsel %vm1441_vm4, %v3103_v24, %v3218_v58 }
  0xd8   : > { %3653 = vmatmul.mubr.msk.bf16.vlgmr.msra.gmra.mrb[0].mxu1 %vm1517_vm7, %v2440_v20  ;;  %v3221_v61 = vrot.slane %v3214_v53, 1  ;;  %v3220_v26 = vsel %vm1444_vm5, %v3105_v59, %v3219_v11 }
  0xd9   : > { %3701 = vmatmul.mubr.msk.bf16.vlgmr.msra.gmra.mrb[0].mxu0 %vm1517_vm7, %v3108_v35 }
  0xda   : > { %3705 = vmatpush3.bf16.msra.mxu0 %v3826_v2  ;;  %3712 = vmatprep.mubr.msk.bf16.mxu0 %vm1517_vm7, %v3223_v10  ;;  %v3222_v45 = vsel %vm1447_vm6, %v3221_v61, %v3220_v26 }
  0xdb   : > { %3706 = vmatprep.subr.bf16.mxu0 %v3827_v29  ;;  %v3224_v40 = vpack.c.b16 %v3222_v45, %v5145_v46 }
  0xde   : > { %3707 = vmatpush3.bf16.msra.mxu0 %v3827_v29 }
  0xdf   : > { %3708 = vmatprep.subr.bf16.mxu0 %v3828_v15 }
  0xe2   : > { %3709 = vmatpush3.bf16.msra.mxu0 %v3828_v15 }
  0xe3   : > { %3710 = vmatprep.subr.bf16.mxu0 %v3829_v50 }
  0xe6   : > { %3711 = vmatpush3.bf16.msra.mxu0 %v3829_v50 }
  0xe9   : > { %3713 = vmatmul.mubr.msk.bf16.vlgmr.msra.gmra.mrb[0].mxu0 %vm1517_vm7, %v3224_v40 }
 0x1ab   : > { %v3654_v10 = vpop.f32.mrb[0].mxu1 }
 0x1ac   : > { %v2505_v38 = vpop.f32.mrb[1].mxu1 }
 0x1ad   : > { %v3655_v37 = vpop.f32.mrb[2].mxu1 }
 0x1ae   : > { %v2508_v28 = vpop.f32.mrb[3].mxu1 }
 0x1bc   : > { %v3714_v14 = vpop.f32.mrb[0].mxu0 }
 0x1bd   : > { %v3716_v54 = vadd.f32 %v3714_v14, %v3654_v10  ;;  %v3289_v23 = vpop.f32.mrb[1].mxu0 }
 0x1be   : > { %v3717_v46 = vadd.f32 %v3289_v23, %v2505_v38  ;;  %v3715_v34 = vpop.f32.mrb[2].mxu0 }
 0x1bf   : > { %v3317_v41 = vadd.f32 %v3716_v54, %v3551_v12  ;;  %v3718_v3 = vadd.f32 %v3715_v34, %v3655_v37  ;;  %v3292_v42 = vpop.f32.mrb[3].mxu0 }
 0x1c0   : > { %v3315_v4 = vadd.f32 %v3717_v46, %v3551_v12  ;;  %v3719_v30 = vadd.f32 %v3292_v42, %v2508_v28 }
 0x1c1   : > { %v3321_v9 = vmax.f32 %v3317_v41, 0.0  ;;  %v3318_v48 = vadd.f32 %v3718_v3, %v3551_v12 }
 0x1c2   : > { %v3319_v6 = vmax.f32 %v3315_v4, 0.0  ;;  %v3316_v52 = vadd.f32 %v3719_v30, %v3551_v12 }
 0x1c3   : > { %v3325_v32 = vpack.c.bf16 %v3321_v9, %v3321_v9  ;;  %v3322_v8 = vmax.f32 %v3318_v48, 0.0 }
 0x1c4   : > { %v3323_v24 = vpack.c.bf16 %v3319_v6, %v3319_v6  ;;  %v3320_v16 = vmax.f32 %v3316_v52, 0.0 }
 0x1c5   : > { %3330 = vst.msk [vmem:[%s317_s29 + $0x8] sm:$0xf] %vm3327_vm8, %v3325_v32  ;;  %v3326_v21 = vpack.c.bf16 %v3322_v8, %v3322_v8 }
 0x1c6   : > { %3328 = vst.msk [vmem:[%s317_s29] sm:$0xf] %vm3327_vm8, %v3323_v24  ;;  %v3324_v7 = vpack.c.bf16 %v3320_v16, %v3320_v16 }
 0x1c7   : > { %3331 = vst.msk [vmem:[%s317_s29 + $0xc] sm:$0xf] %vm3327_vm8, %v3326_v21 }
 0x1c8   : > { %3329 = vst.msk [vmem:[%s317_s29 + $0x4] sm:$0xf] %vm3327_vm8, %v3324_v7 }
 0x1c9 PF: > { %s14_s19 = sadd.s32 1, %s3869_s19   ;;  %s5556_s15 = smov %s3861_s17 }
 0x1ca   : > { %p11_p9 = scmp.ge.s32.totalorder %s14_s19, 6   ;;  %s5557_s16 = smov %s3865_s18 }
 0x1cb   : > { %s5558_s17 = smov %s5561_s20  ;;  %s5559_s18 = smov %s5565_s21 }
 0x1cc   :  { %13 = sbr.rel (!%p11_p9) target bundleno = 3 (0x3), region = 72 }

</bundles_post_ra>
